<compile_context>
chip_gen: v7x
topology: tpu7x:2x2x1
jax: 0.10.0
libtpu: 0.0.40
codegen_flags: <defaults>
</compile_context>

<pallas_src>
import functools
import math

import jax
import jax.numpy as jnp
from jax.experimental import pallas as pl
from jax.experimental.pallas import tpu as pltpu


def clip_layer_kernel(x_ref,
                      ln1_g_ref, ln1_b_ref,
                      w_qkv_ref, b_qkv_ref,
                      w_out_ref, b_out_ref,
                      ln2_g_ref, ln2_b_ref,
                      w_fc1_ref, b_fc1_ref,
                      w_fc2_ref, b_fc2_ref,
                      o_ref,
                      ctx_scr,
                      *, n_head: int):
    x = x_ref[...]                       # (S, D) float32 (batch dim squeezed)
    S, D = x.shape
    d_head = D // n_head
    eps = jnp.float32(1e-5)
    bf16 = jnp.bfloat16
    f32 = jnp.float32

    def layernorm(v, g, b):              # f32 math; rsqrt goes to the EUP
        mu = jnp.mean(v, axis=-1, keepdims=True)
        var = jnp.mean((v - mu) ** 2, axis=-1, keepdims=True)
        return (v - mu) * jax.lax.rsqrt(var + eps) * g + b

    # ---- block 1: LN -> causal MHA -> residual ---------------------------
    h = layernorm(x, ln1_g_ref[...], ln1_b_ref[...])
    qkv = jnp.dot(h.astype(bf16), w_qkv_ref[...],
                  preferred_element_type=f32) + b_qkv_ref[...]

    scale = jnp.float32(1.0 / math.sqrt(d_head))
    q = (qkv[:, 0 * D:1 * D] * scale).astype(bf16)   # scale folded into q
    k = qkv[:, 1 * D:2 * D].astype(bf16)
    v = qkv[:, 2 * D:3 * D].astype(bf16)

    # In-kernel causal additive bias (0 keep / -1e30 masked); generated once
    # per grid step from 2-D iota and reused across heads.
    rows = jax.lax.broadcasted_iota(jnp.int32, (S, S), 0)
    cols = jax.lax.broadcasted_iota(jnp.int32, (S, S), 1)
    mask_bias = jnp.where(cols > rows, jnp.float32(-1e30), jnp.float32(0.0))

    # Per-head attention: each head's context lands in its column slab of the
    # (S, D) VMEM scratch; the out-projection is then a single K=D matmul.
    # TODO(synk): at real CLIP sizes (d_head=64) process heads in 128-lane
    # pairs (or stage q/k/v head-major + lax.fori_loop) so q/k/v slices and
    # ctx stores are vreg-tile aligned and vreg live ranges stay bounded.
    for hd in range(n_head):
        sl = slice(hd * d_head, (hd + 1) * d_head)
        s = jax.lax.dot_general(q[:, sl], k[:, sl],
                                (((1,), (1,)), ((), ())),
                                preferred_element_type=f32)          # (S, S)
        s = s + mask_bias
        s = s - jnp.max(s, axis=-1, keepdims=True)
        p = jnp.exp(s)
        p = p * pl.reciprocal(jnp.sum(p, axis=-1, keepdims=True), approx=True)
        ctx_scr[:, sl] = jnp.dot(p.astype(bf16), v[:, sl],
                                 preferred_element_type=f32)         # (S, dh)

    attn = jnp.dot(ctx_scr[...].astype(bf16), w_out_ref[...],
                   preferred_element_type=f32) + b_out_ref[...]
    x1 = x + attn

    # ---- block 2: LN -> Linear -> QuickGELU -> Linear -> residual --------
    h2 = layernorm(x1, ln2_g_ref[...], ln2_b_ref[...])
    f = jnp.dot(h2.astype(bf16), w_fc1_ref[...],
                preferred_element_type=f32) + b_fc1_ref[...]
    f = f * jax.nn.sigmoid(jnp.float32(1.702) * f)                   # QuickGELU
    f = jnp.dot(f.astype(bf16), w_fc2_ref[...],
                preferred_element_type=f32) + b_fc2_ref[...]

    o_ref[...] = x1 + f


def _vmem_limit_bytes(S, D):
    bf16, f32 = 2, 4
    weights = 12 * D * D * bf16                    # resident bf16 weights
    small = 12 * D * f32                           # biases + LN params
    io = 2 * 2 * S * D * f32                       # double-buffered x / out blocks
    acts = 14 * S * D * f32 + 6 * S * S * f32      # qkv, ctx scratch, FFN, scores
    est = weights + small + io + acts + (6 << 20)  # single hedge for compiler scratch
    # Never below the largest per-generation default (32 MiB); cap at 52 MiB
    # so v7x (64 MiB physical VMEM per TC) keeps headroom for spills.
    return int(min(max(est, 32 << 20), 52 << 20))


def clip_layer(x, params, *, n_head, weight_mode="resident"):
    B, S, D = x.shape
    (ln1_g, ln1_b, w_qkv, b_qkv, w_out, b_out,
     ln2_g, ln2_b, w_fc1, b_fc1, w_fc2, b_fc2) = params

    # bf16 weights feed the MXU (kernel accumulates in f32); biases / LN
    # params stay f32 (VPU path only).
    # TODO(synk): on v7x consider fp8 storage for w_fc1/w_fc2 (halves their
    # HBM DMA + VMEM footprint; the v7x MXU takes fp8 natively).
    w_qkv, w_out, w_fc1, w_fc2 = (w.astype(jnp.bfloat16)
                                  for w in (w_qkv, w_out, w_fc1, w_fc2))

    consts = (ln1_g, ln1_b, w_qkv, b_qkv, w_out, b_out,
              ln2_g, ln2_b, w_fc1, b_fc1, w_fc2, b_fc2)

    if weight_mode == "resident":
        # Grid-invariant operands: whole array resident in VMEM, single copy,
        # no double-buffering, no per-step DMA descriptors.
        # TODO(synk): at small B this ~24*D^2-byte weight copy is a serial
        # prologue (weight-DMA bound on v5e/v6e); block the FFN/QKV weights
        # over a reduction grid axis to pipeline their load under compute.
        def const_spec(arr):
            del arr
            return pl.BlockSpec(memory_space=pltpu.MemorySpace.VMEM)
    elif weight_mode == "single_buffered":
        # Blocked fallback without double-buffering (keeps weight VMEM at 1x;
        # important for v7x's 64 MiB budget).
        def const_spec(arr):
            nd = arr.ndim
            return pl.BlockSpec(arr.shape, lambda *_: (0,) * nd,
                                pipeline_mode=pl.Buffered(1))
    else:  # "double_buffered" -- last-resort plain blocked spec
        def const_spec(arr):
            nd = arr.ndim
            return pl.BlockSpec(arr.shape, lambda *_: (0,) * nd)

    # TODO(synk): for v7x at B=1, add a second "parallel" grid axis over query
    # row tiles (K/V stay full-S) so both TensorCores get work.
    grid_spec = pltpu.PrefetchScalarGridSpec(
        num_scalar_prefetch=0,
        grid=(B,),   # batch axis; "parallel" lets megacore (v7x) split it
        in_specs=[pl.BlockSpec((None, S, D), lambda b: (b, 0, 0))]
                 + [const_spec(c) for c in consts],
        out_specs=pl.BlockSpec((None, S, D), lambda b: (b, 0, 0)),
        scratch_shapes=[pltpu.VMEM((S, D), jnp.float32)],   # per-head ctx slab
    )

    # Advisory cost estimate so XLA schedules surrounding HBM traffic sanely.
    flops = B * (24 * S * D * D + 4 * S * S * D)
    transcendentals = B * (n_head * S * S + 4 * S * D + 2 * S)
    bytes_accessed = 2 * 12 * D * D + 4 * 12 * D + 2 * B * S * D * 4
    cost = pl.CostEstimate(flops=int(flops),
                           transcendentals=int(transcendentals),
                           bytes_accessed=int(bytes_accessed))

    return pl.pallas_call(
        functools.partial(clip_layer_kernel, n_head=n_head),
        out_shape=jax.ShapeDtypeStruct((B, S, D), jnp.float32),
        grid_spec=grid_spec,
        compiler_params=pltpu.CompilerParams(
            dimension_semantics=("parallel",),
            vmem_limit_bytes=_vmem_limit_bytes(S, D)),
        cost_estimate=cost,
    )(x, *consts)


def reference(x, params, *, n_head):
    """Plain-JAX f32 reference mirroring the PyTorch forward pass."""
    (ln1_g, ln1_b, w_qkv, b_qkv, w_out, b_out,
     ln2_g, ln2_b, w_fc1, b_fc1, w_fc2, b_fc2) = params
    B, S, D = x.shape
    d_head = D // n_head

    def ln(v, g, b):
        mu = v.mean(-1, keepdims=True)
        var = ((v - mu) ** 2).mean(-1, keepdims=True)
        return (v - mu) / jnp.sqrt(var + 1e-5) * g[0] + b[0]

    resid = x
    h = ln(x, ln1_g, ln1_b)
    qkv = h @ w_qkv + b_qkv[0]
    q, k, v = jnp.split(qkv, 3, axis=-1)
    q = q.reshape(B, S, n_head, d_head).transpose(0, 2, 1, 3)
    k = k.reshape(B, S, n_head, d_head).transpose(0, 2, 1, 3)
    v = v.reshape(B, S, n_head, d_head).transpose(0, 2, 1, 3)
    s = jnp.einsum("bhqd,bhkd->bhqk", q, k)
    mask = jnp.triu(jnp.ones((S, S), bool), 1)
    s = jnp.where(mask, -jnp.inf, s) / math.sqrt(d_head)
    p = jax.nn.softmax(s, axis=-1)
    o = jnp.einsum("bhqk,bhkd->bhqd", p, v).transpose(0, 2, 1, 3).reshape(B, S, D)
    o = o @ w_out + b_out[0]
    x1 = resid + o
    resid2 = x1
    h2 = ln(x1, ln2_g, ln2_b)
    f = h2 @ w_fc1 + b_fc1[0]
    f = f * jax.nn.sigmoid(1.702 * f)
    f = f @ w_fc2 + b_fc2[0]
    return resid2 + f


if __name__ == "__main__":
    B, S, D, n_head = 2, 8, 32, 4
    key = jax.random.PRNGKey(0)
    keys = jax.random.split(key, 8)

    x = jax.random.normal(keys[0], (B, S, D), jnp.float32)

    # Deterministic parameter init (torch Linear weight is (out, in); we store
    # the transposed (in, out) so the kernel computes x @ W).
    s = 0.05
    params = (
        jnp.ones((1, D), jnp.float32),                                    # ln1 gamma
        jnp.zeros((1, D), jnp.float32),                                   # ln1 beta
        s * jax.random.normal(keys[1], (D, 3 * D), jnp.float32),          # in_proj  W^T
        s * jax.random.normal(keys[2], (1, 3 * D), jnp.float32),          # in_proj  b
        s * jax.random.normal(keys[3], (D, D), jnp.float32),              # out_proj W^T
        s * jax.random.normal(keys[4], (1, D), jnp.float32),              # out_proj b
        jnp.ones((1, D), jnp.float32),                                    # ln2 gamma
        jnp.zeros((1, D), jnp.float32),                                   # ln2 beta
        s * jax.random.normal(keys[5], (D, 4 * D), jnp.float32),          # linear_1 W^T
        s * jax.random.normal(keys[6], (1, 4 * D), jnp.float32),          # linear_1 b
        s * jax.random.normal(keys[7], (4 * D, D), jnp.float32),          # linear_2 W^T
        jnp.zeros((1, D), jnp.float32),                                   # linear_2 b
    )

    out = None
    last_err = None
    # Prefer whole-array VMEM-resident weights; fall back to single-buffered
    # blocked specs, then plain blocked specs, for JAX versions that reject
    # either form alongside a grid.
    for mode in ("resident", "single_buffered", "double_buffered"):
        try:
            out = jax.block_until_ready(
                clip_layer(x, params, n_head=n_head, weight_mode=mode))
            break
        except Exception as e:   # noqa: BLE001
            last_err = e
    if out is None:
        raise last_err

    ref = reference(x, params, n_head=n_head)
    assert out.shape == (B, S, D)
    # bf16 MXU inputs (f32 accumulation) + approx reciprocal => loosened tol.
    assert jnp.allclose(out, ref, rtol=2e-2, atol=2e-2), "mismatch vs reference"

    print("KERNEL_OK")
</pallas_src>

<mosaic_0001>
module attributes {stable_mosaic.version = 11 : i64} {
  func.func @clip_layer_kernel(%arg0: i32, %arg1: memref<1x8x32xf32, #tpu.memory_space<vmem>>, %arg2: memref<1x32xf32, #tpu.memory_space<vmem>>, %arg3: memref<1x32xf32, #tpu.memory_space<vmem>>, %arg4: memref<32x96xbf16, #tpu.memory_space<vmem>>, %arg5: memref<1x96xf32, #tpu.memory_space<vmem>>, %arg6: memref<32x32xbf16, #tpu.memory_space<vmem>>, %arg7: memref<1x32xf32, #tpu.memory_space<vmem>>, %arg8: memref<1x32xf32, #tpu.memory_space<vmem>>, %arg9: memref<1x32xf32, #tpu.memory_space<vmem>>, %arg10: memref<32x128xbf16, #tpu.memory_space<vmem>>, %arg11: memref<1x128xf32, #tpu.memory_space<vmem>>, %arg12: memref<128x32xbf16, #tpu.memory_space<vmem>>, %arg13: memref<1x32xf32, #tpu.memory_space<vmem>>, %arg14: memref<1x8x32xf32, #tpu.memory_space<vmem>>, %arg15: memref<8x32xf32, #tpu.memory_space<vmem>>) attributes {dimension_semantics = [#tpu.dimension_semantics<parallel>], iteration_bounds = array<i64: 2>, scalar_prefetch = 0 : i64, scratch_operands = 1 : i64, tpu.core_type = #tpu.core_type<tc>, window_params = [{transform_indices = @transform_0, window_bounds = array<i64: 1, 8, 32>}, {pipeline_mode = #tpu.pipeline_mode<synchronous>, transform_indices = @transform_1, window_bounds = array<i64: 1, 32>}, {pipeline_mode = #tpu.pipeline_mode<synchronous>, transform_indices = @transform_2, window_bounds = array<i64: 1, 32>}, {pipeline_mode = #tpu.pipeline_mode<synchronous>, transform_indices = @transform_3, window_bounds = array<i64: 32, 96>}, {pipeline_mode = #tpu.pipeline_mode<synchronous>, transform_indices = @transform_4, window_bounds = array<i64: 1, 96>}, {pipeline_mode = #tpu.pipeline_mode<synchronous>, transform_indices = @transform_5, window_bounds = array<i64: 32, 32>}, {pipeline_mode = #tpu.pipeline_mode<synchronous>, transform_indices = @transform_6, window_bounds = array<i64: 1, 32>}, {pipeline_mode = #tpu.pipeline_mode<synchronous>, transform_indices = @transform_7, window_bounds = array<i64: 1, 32>}, {pipeline_mode = #tpu.pipeline_mode<synchronous>, transform_indices = @transform_8, window_bounds = array<i64: 1, 32>}, {pipeline_mode = #tpu.pipeline_mode<synchronous>, transform_indices = @transform_9, window_bounds = array<i64: 32, 128>}, {pipeline_mode = #tpu.pipeline_mode<synchronous>, transform_indices = @transform_10, window_bounds = array<i64: 1, 128>}, {pipeline_mode = #tpu.pipeline_mode<synchronous>, transform_indices = @transform_11, window_bounds = array<i64: 128, 32>}, {pipeline_mode = #tpu.pipeline_mode<synchronous>, transform_indices = @transform_12, window_bounds = array<i64: 1, 32>}, {transform_indices = @transform_13, window_bounds = array<i64: 1, 8, 32>}]} {
    %c0 = arith.constant 0 : index
    %c0_0 = arith.constant 0 : index
    %c0_1 = arith.constant 0 : index
    %0 = vector.load %arg1[%c0, %c0_0, %c0_1] : memref<1x8x32xf32, #tpu.memory_space<vmem>>, vector<1x8x32xf32>
    %1 = vector.shape_cast %0 : vector<1x8x32xf32> to vector<8x32xf32>
    %c0_2 = arith.constant 0 : index
    %c0_3 = arith.constant 0 : index
    %2 = vector.load %arg2[%c0_2, %c0_3] : memref<1x32xf32, #tpu.memory_space<vmem>>, vector<1x32xf32>
    %c0_4 = arith.constant 0 : index
    %c0_5 = arith.constant 0 : index
    %3 = vector.load %arg3[%c0_4, %c0_5] : memref<1x32xf32, #tpu.memory_space<vmem>>, vector<1x32xf32>
    %cst = arith.constant dense<0.000000e+00> : vector<8xf32>
    %4 = vector.multi_reduction <add>, %1, %cst [1] : vector<8x32xf32> to vector<8xf32>
    %5 = vector.shape_cast %4 : vector<8xf32> to vector<8x1xf32>
    %cst_6 = arith.constant 3.200000e+01 : f32
    %6 = vector.broadcast %cst_6 : f32 to vector<8x1xf32>
    %7 = arith.divf %5, %6 : vector<8x1xf32>
    %8 = vector.broadcast %7 : vector<8x1xf32> to vector<8x32xf32>
    %9 = arith.subf %1, %8 : vector<8x32xf32>
    %10 = arith.mulf %9, %9 : vector<8x32xf32>
    %cst_7 = arith.constant dense<0.000000e+00> : vector<8xf32>
    %11 = vector.multi_reduction <add>, %10, %cst_7 [1] : vector<8x32xf32> to vector<8xf32>
    %12 = vector.shape_cast %11 : vector<8xf32> to vector<8x1xf32>
    %cst_8 = arith.constant 3.200000e+01 : f32
    %13 = vector.broadcast %cst_8 : f32 to vector<8x1xf32>
    %14 = arith.divf %12, %13 : vector<8x1xf32>
    %15 = vector.broadcast %7 : vector<8x1xf32> to vector<8x32xf32>
    %16 = arith.subf %1, %15 : vector<8x32xf32>
    %cst_9 = arith.constant 9.99999974E-6 : f32
    %17 = vector.broadcast %cst_9 : f32 to vector<8x1xf32>
    %18 = arith.addf %14, %17 : vector<8x1xf32>
    %19 = math.rsqrt %18 : vector<8x1xf32>
    %20 = vector.broadcast %19 : vector<8x1xf32> to vector<8x32xf32>
    %21 = arith.mulf %16, %20 : vector<8x32xf32>
    %22 = vector.broadcast %2 : vector<1x32xf32> to vector<8x32xf32>
    %23 = arith.mulf %21, %22 : vector<8x32xf32>
    %24 = vector.broadcast %3 : vector<1x32xf32> to vector<8x32xf32>
    %25 = arith.addf %23, %24 : vector<8x32xf32>
    %26 = arith.truncf %25 : vector<8x32xf32> to vector<8x32xbf16>
    %c0_10 = arith.constant 0 : index
    %c0_11 = arith.constant 0 : index
    %27 = vector.load %arg4[%c0_10, %c0_11] : memref<32x96xbf16, #tpu.memory_space<vmem>>, vector<32x96xbf16>
    %cst_12 = arith.constant dense<0.000000e+00> : vector<8x96xf32>
    %28 = tpu.matmul %26, %27, %cst_12 {dimension_numbers = #tpu.dot_dimension_numbers<[1], [0], [0], [1], [0, 0, 1, 1], [], []>} : vector<8x32xbf16>, vector<32x96xbf16>, vector<8x96xf32> -> vector<8x96xf32>
    %c0_13 = arith.constant 0 : index
    %c0_14 = arith.constant 0 : index
    %29 = vector.load %arg5[%c0_13, %c0_14] : memref<1x96xf32, #tpu.memory_space<vmem>>, vector<1x96xf32>
    %30 = vector.broadcast %29 : vector<1x96xf32> to vector<8x96xf32>
    %31 = arith.addf %28, %30 : vector<8x96xf32>
    %32 = vector.extract_strided_slice %31 {offsets = [0, 0], sizes = [8, 32], strides = [1, 1]} : vector<8x96xf32> to vector<8x32xf32>
    %cst_15 = arith.constant 0.353553385 : f32
    %33 = vector.broadcast %cst_15 : f32 to vector<8x32xf32>
    %34 = arith.mulf %32, %33 : vector<8x32xf32>
    %35 = arith.truncf %34 : vector<8x32xf32> to vector<8x32xbf16>
    %36 = vector.extract_strided_slice %31 {offsets = [0, 32], sizes = [8, 32], strides = [1, 1]} : vector<8x96xf32> to vector<8x32xf32>
    %37 = arith.truncf %36 : vector<8x32xf32> to vector<8x32xbf16>
    %38 = vector.extract_strided_slice %31 {offsets = [0, 64], sizes = [8, 32], strides = [1, 1]} : vector<8x96xf32> to vector<8x32xf32>
    %39 = arith.truncf %38 : vector<8x32xf32> to vector<8x32xbf16>
    %40 = tpu.iota {dimensions = array<i32: 0>} : vector<8x8xi32>
    %41 = tpu.iota {dimensions = array<i32: 1>} : vector<8x8xi32>
    %42 = arith.cmpi sgt, %41, %40 : vector<8x8xi32>
    %cst_16 = arith.constant -1.000000e+30 : f32
    %cst_17 = arith.constant 0.000000e+00 : f32
    %43 = vector.broadcast %cst_16 : f32 to vector<8x8xf32>
    %44 = vector.broadcast %cst_17 : f32 to vector<8x8xf32>
    %45 = arith.select %42, %43, %44 : vector<8x8xi1>, vector<8x8xf32>
    %46 = vector.extract_strided_slice %35 {offsets = [0, 0], sizes = [8, 8], strides = [1, 1]} : vector<8x32xbf16> to vector<8x8xbf16>
    %47 = vector.extract_strided_slice %37 {offsets = [0, 0], sizes = [8, 8], strides = [1, 1]} : vector<8x32xbf16> to vector<8x8xbf16>
    %cst_18 = arith.constant dense<0.000000e+00> : vector<8x8xf32>
    %48 = tpu.matmul %46, %47, %cst_18 {dimension_numbers = #tpu.dot_dimension_numbers<[1], [1], [0], [0], [0, 0, 1, 0], [], []>} : vector<8x8xbf16>, vector<8x8xbf16>, vector<8x8xf32> -> vector<8x8xf32>
    %49 = arith.addf %48, %45 : vector<8x8xf32>
    %cst_19 = arith.constant dense<0xFF800000> : vector<8xf32>
    %50 = vector.multi_reduction <maximumf>, %49, %cst_19 [1] : vector<8x8xf32> to vector<8xf32>
    %51 = vector.shape_cast %50 : vector<8xf32> to vector<8x1xf32>
    %52 = vector.broadcast %51 : vector<8x1xf32> to vector<8x8xf32>
    %53 = arith.subf %49, %52 : vector<8x8xf32>
    %54 = math.exp %53 : vector<8x8xf32>
    %cst_20 = arith.constant dense<0.000000e+00> : vector<8xf32>
    %55 = vector.multi_reduction <add>, %54, %cst_20 [1] : vector<8x8xf32> to vector<8xf32>
    %56 = vector.shape_cast %55 : vector<8xf32> to vector<8x1xf32>
    %57 = tpu.reciprocal %56 {approx = true} : vector<8x1xf32> -> vector<8x1xf32>
    %58 = vector.broadcast %57 : vector<8x1xf32> to vector<8x8xf32>
    %59 = arith.mulf %54, %58 : vector<8x8xf32>
    %60 = arith.truncf %59 : vector<8x8xf32> to vector<8x8xbf16>
    %61 = vector.extract_strided_slice %39 {offsets = [0, 0], sizes = [8, 8], strides = [1, 1]} : vector<8x32xbf16> to vector<8x8xbf16>
    %cst_21 = arith.constant dense<0.000000e+00> : vector<8x8xf32>
    %62 = tpu.matmul %60, %61, %cst_21 {dimension_numbers = #tpu.dot_dimension_numbers<[1], [0], [0], [1], [0, 0, 1, 1], [], []>} : vector<8x8xbf16>, vector<8x8xbf16>, vector<8x8xf32> -> vector<8x8xf32>
    %c0_22 = arith.constant 0 : index
    %c0_23 = arith.constant 0 : index
    %63 = vector.load %arg15[%c0_22, %c0_23] : memref<8x32xf32, #tpu.memory_space<vmem>>, vector<8x8xf32>
    tpu.vector_store %arg15[%c0_22, %c0_23], %62 {strides = array<i32>} : memref<8x32xf32, #tpu.memory_space<vmem>>, vector<8x8xf32>,
    %64 = vector.extract_strided_slice %35 {offsets = [0, 8], sizes = [8, 8], strides = [1, 1]} : vector<8x32xbf16> to vector<8x8xbf16>
    %65 = vector.extract_strided_slice %37 {offsets = [0, 8], sizes = [8, 8], strides = [1, 1]} : vector<8x32xbf16> to vector<8x8xbf16>
    %cst_24 = arith.constant dense<0.000000e+00> : vector<8x8xf32>
    %66 = tpu.matmul %64, %65, %cst_24 {dimension_numbers = #tpu.dot_dimension_numbers<[1], [1], [0], [0], [0, 0, 1, 0], [], []>} : vector<8x8xbf16>, vector<8x8xbf16>, vector<8x8xf32> -> vector<8x8xf32>
    %67 = arith.addf %66, %45 : vector<8x8xf32>
    %cst_25 = arith.constant dense<0xFF800000> : vector<8xf32>
    %68 = vector.multi_reduction <maximumf>, %67, %cst_25 [1] : vector<8x8xf32> to vector<8xf32>
    %69 = vector.shape_cast %68 : vector<8xf32> to vector<8x1xf32>
    %70 = vector.broadcast %69 : vector<8x1xf32> to vector<8x8xf32>
    %71 = arith.subf %67, %70 : vector<8x8xf32>
    %72 = math.exp %71 : vector<8x8xf32>
    %cst_26 = arith.constant dense<0.000000e+00> : vector<8xf32>
    %73 = vector.multi_reduction <add>, %72, %cst_26 [1] : vector<8x8xf32> to vector<8xf32>
    %74 = vector.shape_cast %73 : vector<8xf32> to vector<8x1xf32>
    %75 = tpu.reciprocal %74 {approx = true} : vector<8x1xf32> -> vector<8x1xf32>
    %76 = vector.broadcast %75 : vector<8x1xf32> to vector<8x8xf32>
    %77 = arith.mulf %72, %76 : vector<8x8xf32>
    %78 = arith.truncf %77 : vector<8x8xf32> to vector<8x8xbf16>
    %79 = vector.extract_strided_slice %39 {offsets = [0, 8], sizes = [8, 8], strides = [1, 1]} : vector<8x32xbf16> to vector<8x8xbf16>
    %cst_27 = arith.constant dense<0.000000e+00> : vector<8x8xf32>
    %80 = tpu.matmul %78, %79, %cst_27 {dimension_numbers = #tpu.dot_dimension_numbers<[1], [0], [0], [1], [0, 0, 1, 1], [], []>} : vector<8x8xbf16>, vector<8x8xbf16>, vector<8x8xf32> -> vector<8x8xf32>
    %c0_28 = arith.constant 0 : index
    %c8 = arith.constant 8 : index
    %81 = vector.load %arg15[%c0_28, %c8] : memref<8x32xf32, #tpu.memory_space<vmem>>, vector<8x8xf32>
    tpu.vector_store %arg15[%c0_28, %c8], %80 {strides = array<i32>} : memref<8x32xf32, #tpu.memory_space<vmem>>, vector<8x8xf32>,
    %82 = vector.extract_strided_slice %35 {offsets = [0, 16], sizes = [8, 8], strides = [1, 1]} : vector<8x32xbf16> to vector<8x8xbf16>
    %83 = vector.extract_strided_slice %37 {offsets = [0, 16], sizes = [8, 8], strides = [1, 1]} : vector<8x32xbf16> to vector<8x8xbf16>
    %cst_29 = arith.constant dense<0.000000e+00> : vector<8x8xf32>
    %84 = tpu.matmul %82, %83, %cst_29 {dimension_numbers = #tpu.dot_dimension_numbers<[1], [1], [0], [0], [0, 0, 1, 0], [], []>} : vector<8x8xbf16>, vector<8x8xbf16>, vector<8x8xf32> -> vector<8x8xf32>
    %85 = arith.addf %84, %45 : vector<8x8xf32>
    %cst_30 = arith.constant dense<0xFF800000> : vector<8xf32>
    %86 = vector.multi_reduction <maximumf>, %85, %cst_30 [1] : vector<8x8xf32> to vector<8xf32>
    %87 = vector.shape_cast %86 : vector<8xf32> to vector<8x1xf32>
    %88 = vector.broadcast %87 : vector<8x1xf32> to vector<8x8xf32>
    %89 = arith.subf %85, %88 : vector<8x8xf32>
    %90 = math.exp %89 : vector<8x8xf32>
    %cst_31 = arith.constant dense<0.000000e+00> : vector<8xf32>
    %91 = vector.multi_reduction <add>, %90, %cst_31 [1] : vector<8x8xf32> to vector<8xf32>
    %92 = vector.shape_cast %91 : vector<8xf32> to vector<8x1xf32>
    %93 = tpu.reciprocal %92 {approx = true} : vector<8x1xf32> -> vector<8x1xf32>
    %94 = vector.broadcast %93 : vector<8x1xf32> to vector<8x8xf32>
    %95 = arith.mulf %90, %94 : vector<8x8xf32>
    %96 = arith.truncf %95 : vector<8x8xf32> to vector<8x8xbf16>
    %97 = vector.extract_strided_slice %39 {offsets = [0, 16], sizes = [8, 8], strides = [1, 1]} : vector<8x32xbf16> to vector<8x8xbf16>
    %cst_32 = arith.constant dense<0.000000e+00> : vector<8x8xf32>
    %98 = tpu.matmul %96, %97, %cst_32 {dimension_numbers = #tpu.dot_dimension_numbers<[1], [0], [0], [1], [0, 0, 1, 1], [], []>} : vector<8x8xbf16>, vector<8x8xbf16>, vector<8x8xf32> -> vector<8x8xf32>
    %c0_33 = arith.constant 0 : index
    %c16 = arith.constant 16 : index
    %99 = vector.load %arg15[%c0_33, %c16] : memref<8x32xf32, #tpu.memory_space<vmem>>, vector<8x8xf32>
    tpu.vector_store %arg15[%c0_33, %c16], %98 {strides = array<i32>} : memref<8x32xf32, #tpu.memory_space<vmem>>, vector<8x8xf32>,
    %100 = vector.extract_strided_slice %35 {offsets = [0, 24], sizes = [8, 8], strides = [1, 1]} : vector<8x32xbf16> to vector<8x8xbf16>
    %101 = vector.extract_strided_slice %37 {offsets = [0, 24], sizes = [8, 8], strides = [1, 1]} : vector<8x32xbf16> to vector<8x8xbf16>
    %cst_34 = arith.constant dense<0.000000e+00> : vector<8x8xf32>
    %102 = tpu.matmul %100, %101, %cst_34 {dimension_numbers = #tpu.dot_dimension_numbers<[1], [1], [0], [0], [0, 0, 1, 0], [], []>} : vector<8x8xbf16>, vector<8x8xbf16>, vector<8x8xf32> -> vector<8x8xf32>
    %103 = arith.addf %102, %45 : vector<8x8xf32>
    %cst_35 = arith.constant dense<0xFF800000> : vector<8xf32>
    %104 = vector.multi_reduction <maximumf>, %103, %cst_35 [1] : vector<8x8xf32> to vector<8xf32>
    %105 = vector.shape_cast %104 : vector<8xf32> to vector<8x1xf32>
    %106 = vector.broadcast %105 : vector<8x1xf32> to vector<8x8xf32>
    %107 = arith.subf %103, %106 : vector<8x8xf32>
    %108 = math.exp %107 : vector<8x8xf32>
    %cst_36 = arith.constant dense<0.000000e+00> : vector<8xf32>
    %109 = vector.multi_reduction <add>, %108, %cst_36 [1] : vector<8x8xf32> to vector<8xf32>
    %110 = vector.shape_cast %109 : vector<8xf32> to vector<8x1xf32>
    %111 = tpu.reciprocal %110 {approx = true} : vector<8x1xf32> -> vector<8x1xf32>
    %112 = vector.broadcast %111 : vector<8x1xf32> to vector<8x8xf32>
    %113 = arith.mulf %108, %112 : vector<8x8xf32>
    %114 = arith.truncf %113 : vector<8x8xf32> to vector<8x8xbf16>
    %115 = vector.extract_strided_slice %39 {offsets = [0, 24], sizes = [8, 8], strides = [1, 1]} : vector<8x32xbf16> to vector<8x8xbf16>
    %cst_37 = arith.constant dense<0.000000e+00> : vector<8x8xf32>
    %116 = tpu.matmul %114, %115, %cst_37 {dimension_numbers = #tpu.dot_dimension_numbers<[1], [0], [0], [1], [0, 0, 1, 1], [], []>} : vector<8x8xbf16>, vector<8x8xbf16>, vector<8x8xf32> -> vector<8x8xf32>
    %c0_38 = arith.constant 0 : index
    %c24 = arith.constant 24 : index
    %117 = vector.load %arg15[%c0_38, %c24] : memref<8x32xf32, #tpu.memory_space<vmem>>, vector<8x8xf32>
    tpu.vector_store %arg15[%c0_38, %c24], %116 {strides = array<i32>} : memref<8x32xf32, #tpu.memory_space<vmem>>, vector<8x8xf32>,
    %c0_39 = arith.constant 0 : index
    %c0_40 = arith.constant 0 : index
    %118 = vector.load %arg15[%c0_39, %c0_40] : memref<8x32xf32, #tpu.memory_space<vmem>>, vector<8x32xf32>
    %119 = arith.truncf %118 : vector<8x32xf32> to vector<8x32xbf16>
    %c0_41 = arith.constant 0 : index
    %c0_42 = arith.constant 0 : index
    %120 = vector.load %arg6[%c0_41, %c0_42] : memref<32x32xbf16, #tpu.memory_space<vmem>>, vector<32x32xbf16>
    %cst_43 = arith.constant dense<0.000000e+00> : vector<8x32xf32>
    %121 = tpu.matmul %119, %120, %cst_43 {dimension_numbers = #tpu.dot_dimension_numbers<[1], [0], [0], [1], [0, 0, 1, 1], [], []>} : vector<8x32xbf16>, vector<32x32xbf16>, vector<8x32xf32> -> vector<8x32xf32>
    %c0_44 = arith.constant 0 : index
    %c0_45 = arith.constant 0 : index
    %122 = vector.load %arg7[%c0_44, %c0_45] : memref<1x32xf32, #tpu.memory_space<vmem>>, vector<1x32xf32>
    %123 = vector.broadcast %122 : vector<1x32xf32> to vector<8x32xf32>
    %124 = arith.addf %121, %123 : vector<8x32xf32>
    %125 = arith.addf %1, %124 : vector<8x32xf32>
    %c0_46 = arith.constant 0 : index
    %c0_47 = arith.constant 0 : index
    %126 = vector.load %arg8[%c0_46, %c0_47] : memref<1x32xf32, #tpu.memory_space<vmem>>, vector<1x32xf32>
    %c0_48 = arith.constant 0 : index
    %c0_49 = arith.constant 0 : index
    %127 = vector.load %arg9[%c0_48, %c0_49] : memref<1x32xf32, #tpu.memory_space<vmem>>, vector<1x32xf32>
    %cst_50 = arith.constant dense<0.000000e+00> : vector<8xf32>
    %128 = vector.multi_reduction <add>, %125, %cst_50 [1] : vector<8x32xf32> to vector<8xf32>
    %129 = vector.shape_cast %128 : vector<8xf32> to vector<8x1xf32>
    %cst_51 = arith.constant 3.200000e+01 : f32
    %130 = vector.broadcast %cst_51 : f32 to vector<8x1xf32>
    %131 = arith.divf %129, %130 : vector<8x1xf32>
    %132 = vector.broadcast %131 : vector<8x1xf32> to vector<8x32xf32>
    %133 = arith.subf %125, %132 : vector<8x32xf32>
    %134 = arith.mulf %133, %133 : vector<8x32xf32>
    %cst_52 = arith.constant dense<0.000000e+00> : vector<8xf32>
    %135 = vector.multi_reduction <add>, %134, %cst_52 [1] : vector<8x32xf32> to vector<8xf32>
    %136 = vector.shape_cast %135 : vector<8xf32> to vector<8x1xf32>
    %cst_53 = arith.constant 3.200000e+01 : f32
    %137 = vector.broadcast %cst_53 : f32 to vector<8x1xf32>
    %138 = arith.divf %136, %137 : vector<8x1xf32>
    %139 = vector.broadcast %131 : vector<8x1xf32> to vector<8x32xf32>
    %140 = arith.subf %125, %139 : vector<8x32xf32>
    %cst_54 = arith.constant 9.99999974E-6 : f32
    %141 = vector.broadcast %cst_54 : f32 to vector<8x1xf32>
    %142 = arith.addf %138, %141 : vector<8x1xf32>
    %143 = math.rsqrt %142 : vector<8x1xf32>
    %144 = vector.broadcast %143 : vector<8x1xf32> to vector<8x32xf32>
    %145 = arith.mulf %140, %144 : vector<8x32xf32>
    %146 = vector.broadcast %126 : vector<1x32xf32> to vector<8x32xf32>
    %147 = arith.mulf %145, %146 : vector<8x32xf32>
    %148 = vector.broadcast %127 : vector<1x32xf32> to vector<8x32xf32>
    %149 = arith.addf %147, %148 : vector<8x32xf32>
    %150 = arith.truncf %149 : vector<8x32xf32> to vector<8x32xbf16>
    %c0_55 = arith.constant 0 : index
    %c0_56 = arith.constant 0 : index
    %151 = vector.load %arg10[%c0_55, %c0_56] : memref<32x128xbf16, #tpu.memory_space<vmem>>, vector<32x128xbf16>
    %cst_57 = arith.constant dense<0.000000e+00> : vector<8x128xf32>
    %152 = tpu.matmul %150, %151, %cst_57 {dimension_numbers = #tpu.dot_dimension_numbers<[1], [0], [0], [1], [0, 0, 1, 1], [], []>} : vector<8x32xbf16>, vector<32x128xbf16>, vector<8x128xf32> -> vector<8x128xf32>
    %c0_58 = arith.constant 0 : index
    %c0_59 = arith.constant 0 : index
    %153 = vector.load %arg11[%c0_58, %c0_59] : memref<1x128xf32, #tpu.memory_space<vmem>>, vector<1x128xf32>
    %154 = vector.broadcast %153 : vector<1x128xf32> to vector<8x128xf32>
    %155 = arith.addf %152, %154 : vector<8x128xf32>
    %cst_60 = arith.constant 1.702000e+00 : f32
    %156 = vector.broadcast %cst_60 : f32 to vector<8x128xf32>
    %157 = arith.mulf %156, %155 : vector<8x128xf32>
    %158 = arith.negf %157 : vector<8x128xf32>
    %159 = math.exp %158 : vector<8x128xf32>
    %cst_61 = arith.constant 1.000000e+00 : f32
    %160 = vector.broadcast %cst_61 : f32 to vector<8x128xf32>
    %161 = arith.addf %160, %159 : vector<8x128xf32>
    %162 = arith.divf %160, %161 : vector<8x128xf32>
    %163 = arith.mulf %155, %162 : vector<8x128xf32>
    %164 = arith.truncf %163 : vector<8x128xf32> to vector<8x128xbf16>
    %c0_62 = arith.constant 0 : index
    %c0_63 = arith.constant 0 : index
    %165 = vector.load %arg12[%c0_62, %c0_63] : memref<128x32xbf16, #tpu.memory_space<vmem>>, vector<128x32xbf16>
    %cst_64 = arith.constant dense<0.000000e+00> : vector<8x32xf32>
    %166 = tpu.matmul %164, %165, %cst_64 {dimension_numbers = #tpu.dot_dimension_numbers<[1], [0], [0], [1], [0, 0, 1, 1], [], []>} : vector<8x128xbf16>, vector<128x32xbf16>, vector<8x32xf32> -> vector<8x32xf32>
    %c0_65 = arith.constant 0 : index
    %c0_66 = arith.constant 0 : index
    %167 = vector.load %arg13[%c0_65, %c0_66] : memref<1x32xf32, #tpu.memory_space<vmem>>, vector<1x32xf32>
    %168 = vector.broadcast %167 : vector<1x32xf32> to vector<8x32xf32>
    %169 = arith.addf %166, %168 : vector<8x32xf32>
    %170 = arith.addf %125, %169 : vector<8x32xf32>
    %c0_67 = arith.constant 0 : index
    %c0_68 = arith.constant 0 : index
    %c0_69 = arith.constant 0 : index
    %171 = vector.load %arg14[%c0_67, %c0_68, %c0_69] : memref<1x8x32xf32, #tpu.memory_space<vmem>>, vector<1x8x32xf32>
    %172 = vector.shape_cast %171 : vector<1x8x32xf32> to vector<8x32xf32>
    %173 = vector.shape_cast %170 : vector<8x32xf32> to vector<1x8x32xf32>
    tpu.vector_store %arg14[%c0_67, %c0_68, %c0_69], %173 {strides = array<i32>} : memref<1x8x32xf32, #tpu.memory_space<vmem>>, vector<1x8x32xf32>,
    return
  }
  func.func @transform_0(%arg0: i32) -> (i32, i32, i32) {
    %c0_i32 = arith.constant 0 : i32
    %c0_i32_0 = arith.constant 0 : i32
    %c0_i32_1 = arith.constant 0 : i32
    return %arg0, %c0_i32, %c0_i32_0 : i32, i32, i32
  }
  func.func @transform_1(%arg0: i32) -> (i32, i32) {
    %c0_i32 = arith.constant 0 : i32
    %c0_i32_0 = arith.constant 0 : i32
    %c0_i32_1 = arith.constant 0 : i32
    return %c0_i32, %c0_i32_0 : i32, i32
  }
  func.func @transform_2(%arg0: i32) -> (i32, i32) {
    %c0_i32 = arith.constant 0 : i32
    %c0_i32_0 = arith.constant 0 : i32
    %c0_i32_1 = arith.constant 0 : i32
    return %c0_i32, %c0_i32_0 : i32, i32
  }
  func.func @transform_3(%arg0: i32) -> (i32, i32) {
    %c0_i32 = arith.constant 0 : i32
    %c0_i32_0 = arith.constant 0 : i32
    %c0_i32_1 = arith.constant 0 : i32
    return %c0_i32, %c0_i32_0 : i32, i32
  }
  func.func @transform_4(%arg0: i32) -> (i32, i32) {
    %c0_i32 = arith.constant 0 : i32
    %c0_i32_0 = arith.constant 0 : i32
    %c0_i32_1 = arith.constant 0 : i32
    return %c0_i32, %c0_i32_0 : i32, i32
  }
  func.func @transform_5(%arg0: i32) -> (i32, i32) {
    %c0_i32 = arith.constant 0 : i32
    %c0_i32_0 = arith.constant 0 : i32
    %c0_i32_1 = arith.constant 0 : i32
    return %c0_i32, %c0_i32_0 : i32, i32
  }
  func.func @transform_6(%arg0: i32) -> (i32, i32) {
    %c0_i32 = arith.constant 0 : i32
    %c0_i32_0 = arith.constant 0 : i32
    %c0_i32_1 = arith.constant 0 : i32
    return %c0_i32, %c0_i32_0 : i32, i32
  }
  func.func @transform_7(%arg0: i32) -> (i32, i32) {
    %c0_i32 = arith.constant 0 : i32
    %c0_i32_0 = arith.constant 0 : i32
    %c0_i32_1 = arith.constant 0 : i32
    return %c0_i32, %c0_i32_0 : i32, i32
  }
  func.func @transform_8(%arg0: i32) -> (i32, i32) {
    %c0_i32 = arith.constant 0 : i32
    %c0_i32_0 = arith.constant 0 : i32
    %c0_i32_1 = arith.constant 0 : i32
    return %c0_i32, %c0_i32_0 : i32, i32
  }
  func.func @transform_9(%arg0: i32) -> (i32, i32) {
    %c0_i32 = arith.constant 0 : i32
    %c0_i32_0 = arith.constant 0 : i32
    %c0_i32_1 = arith.constant 0 : i32
    return %c0_i32, %c0_i32_0 : i32, i32
  }
  func.func @transform_10(%arg0: i32) -> (i32, i32) {
    %c0_i32 = arith.constant 0 : i32
    %c0_i32_0 = arith.constant 0 : i32
    %c0_i32_1 = arith.constant 0 : i32
    return %c0_i32, %c0_i32_0 : i32, i32
  }
  func.func @transform_11(%arg0: i32) -> (i32, i32) {
    %c0_i32 = arith.constant 0 : i32
    %c0_i32_0 = arith.constant 0 : i32
    %c0_i32_1 = arith.constant 0 : i32
    return %c0_i32, %c0_i32_0 : i32, i32
  }
  func.func @transform_12(%arg0: i32) -> (i32, i32) {
    %c0_i32 = arith.constant 0 : i32
    %c0_i32_0 = arith.constant 0 : i32
    %c0_i32_1 = arith.constant 0 : i32
    return %c0_i32, %c0_i32_0 : i32, i32
  }
  func.func @transform_13(%arg0: i32) -> (i32, i32, i32) {
    %c0_i32 = arith.constant 0 : i32
    %c0_i32_0 = arith.constant 0 : i32
    %c0_i32_1 = arith.constant 0 : i32
    return %arg0, %c0_i32, %c0_i32_0 : i32, i32, i32
  }
}

module attributes {stable_mosaic.version = 11 : i64} {
  func.func @clip_layer_kernel(%arg0: i32, %arg1: memref<1x8x32xf32, #tpu.memory_space<vmem>>, %arg2: memref<1x32xf32, #tpu.memory_space<vmem>>, %arg3: memref<1x32xf32, #tpu.memory_space<vmem>>, %arg4: memref<32x96xbf16, #tpu.memory_space<vmem>>, %arg5: memref<1x96xf32, #tpu.memory_space<vmem>>, %arg6: memref<32x32xbf16, #tpu.memory_space<vmem>>, %arg7: memref<1x32xf32, #tpu.memory_space<vmem>>, %arg8: memref<1x32xf32, #tpu.memory_space<vmem>>, %arg9: memref<1x32xf32, #tpu.memory_space<vmem>>, %arg10: memref<32x128xbf16, #tpu.memory_space<vmem>>, %arg11: memref<1x128xf32, #tpu.memory_space<vmem>>, %arg12: memref<128x32xbf16, #tpu.memory_space<vmem>>, %arg13: memref<1x32xf32, #tpu.memory_space<vmem>>, %arg14: memref<1x8x32xf32, #tpu.memory_space<vmem>>, %arg15: memref<8x32xf32, #tpu.memory_space<vmem>>) attributes {dimension_semantics = [#tpu.dimension_semantics<parallel>], iteration_bounds = array<i64: 2>, scalar_prefetch = 0 : i64, scratch_operands = 1 : i64, tpu.core_type = #tpu.core_type<tc>, window_params = [{transform_indices = @transform_0, window_bounds = array<i64: 1, 8, 32>}, {pipeline_mode = #tpu.pipeline_mode<synchronous>, transform_indices = @transform_1, window_bounds = array<i64: 1, 32>}, {pipeline_mode = #tpu.pipeline_mode<synchronous>, transform_indices = @transform_2, window_bounds = array<i64: 1, 32>}, {pipeline_mode = #tpu.pipeline_mode<synchronous>, transform_indices = @transform_3, window_bounds = array<i64: 32, 96>}, {pipeline_mode = #tpu.pipeline_mode<synchronous>, transform_indices = @transform_4, window_bounds = array<i64: 1, 96>}, {pipeline_mode = #tpu.pipeline_mode<synchronous>, transform_indices = @transform_5, window_bounds = array<i64: 32, 32>}, {pipeline_mode = #tpu.pipeline_mode<synchronous>, transform_indices = @transform_6, window_bounds = array<i64: 1, 32>}, {pipeline_mode = #tpu.pipeline_mode<synchronous>, transform_indices = @transform_7, window_bounds = array<i64: 1, 32>}, {pipeline_mode = #tpu.pipeline_mode<synchronous>, transform_indices = @transform_8, window_bounds = array<i64: 1, 32>}, {pipeline_mode = #tpu.pipeline_mode<synchronous>, transform_indices = @transform_9, window_bounds = array<i64: 32, 128>}, {pipeline_mode = #tpu.pipeline_mode<synchronous>, transform_indices = @transform_10, window_bounds = array<i64: 1, 128>}, {pipeline_mode = #tpu.pipeline_mode<synchronous>, transform_indices = @transform_11, window_bounds = array<i64: 128, 32>}, {pipeline_mode = #tpu.pipeline_mode<synchronous>, transform_indices = @transform_12, window_bounds = array<i64: 1, 32>}, {transform_indices = @transform_13, window_bounds = array<i64: 1, 8, 32>}]} {
    %c0 = arith.constant 0 : index
    %c0_0 = arith.constant 0 : index
    %c0_1 = arith.constant 0 : index
    %0 = vector.load %arg1[%c0, %c0_0, %c0_1] : memref<1x8x32xf32, #tpu.memory_space<vmem>>, vector<1x8x32xf32>
    %1 = vector.shape_cast %0 : vector<1x8x32xf32> to vector<8x32xf32>
    %c0_2 = arith.constant 0 : index
    %c0_3 = arith.constant 0 : index
    %2 = vector.load %arg2[%c0_2, %c0_3] : memref<1x32xf32, #tpu.memory_space<vmem>>, vector<1x32xf32>
    %c0_4 = arith.constant 0 : index
    %c0_5 = arith.constant 0 : index
    %3 = vector.load %arg3[%c0_4, %c0_5] : memref<1x32xf32, #tpu.memory_space<vmem>>, vector<1x32xf32>
    %cst = arith.constant dense<0.000000e+00> : vector<8xf32>
    %4 = vector.multi_reduction <add>, %1, %cst [1] : vector<8x32xf32> to vector<8xf32>
    %5 = vector.shape_cast %4 : vector<8xf32> to vector<8x1xf32>
    %cst_6 = arith.constant 3.200000e+01 : f32
    %6 = vector.broadcast %cst_6 : f32 to vector<8x1xf32>
    %7 = arith.divf %5, %6 : vector<8x1xf32>
    %8 = vector.broadcast %7 : vector<8x1xf32> to vector<8x32xf32>
    %9 = arith.subf %1, %8 : vector<8x32xf32>
    %10 = arith.mulf %9, %9 : vector<8x32xf32>
    %cst_7 = arith.constant dense<0.000000e+00> : vector<8xf32>
    %11 = vector.multi_reduction <add>, %10, %cst_7 [1] : vector<8x32xf32> to vector<8xf32>
    %12 = vector.shape_cast %11 : vector<8xf32> to vector<8x1xf32>
    %cst_8 = arith.constant 3.200000e+01 : f32
    %13 = vector.broadcast %cst_8 : f32 to vector<8x1xf32>
    %14 = arith.divf %12, %13 : vector<8x1xf32>
    %15 = vector.broadcast %7 : vector<8x1xf32> to vector<8x32xf32>
    %16 = arith.subf %1, %15 : vector<8x32xf32>
    %cst_9 = arith.constant 9.99999974E-6 : f32
    %17 = vector.broadcast %cst_9 : f32 to vector<8x1xf32>
    %18 = arith.addf %14, %17 : vector<8x1xf32>
    %19 = math.rsqrt %18 : vector<8x1xf32>
    %20 = vector.broadcast %19 : vector<8x1xf32> to vector<8x32xf32>
    %21 = arith.mulf %16, %20 : vector<8x32xf32>
    %22 = vector.broadcast %2 : vector<1x32xf32> to vector<8x32xf32>
    %23 = arith.mulf %21, %22 : vector<8x32xf32>
    %24 = vector.broadcast %3 : vector<1x32xf32> to vector<8x32xf32>
    %25 = arith.addf %23, %24 : vector<8x32xf32>
    %26 = arith.truncf %25 : vector<8x32xf32> to vector<8x32xbf16>
    %c0_10 = arith.constant 0 : index
    %c0_11 = arith.constant 0 : index
    %27 = vector.load %arg4[%c0_10, %c0_11] : memref<32x96xbf16, #tpu.memory_space<vmem>>, vector<32x96xbf16>
    %cst_12 = arith.constant dense<0.000000e+00> : vector<8x96xf32>
    %28 = tpu.matmul %26, %27, %cst_12 {dimension_numbers = #tpu.dot_dimension_numbers<[1], [0], [0], [1], [0, 0, 1, 1], [], []>} : vector<8x32xbf16>, vector<32x96xbf16>, vector<8x96xf32> -> vector<8x96xf32>
    %c0_13 = arith.constant 0 : index
    %c0_14 = arith.constant 0 : index
    %29 = vector.load %arg5[%c0_13, %c0_14] : memref<1x96xf32, #tpu.memory_space<vmem>>, vector<1x96xf32>
    %30 = vector.broadcast %29 : vector<1x96xf32> to vector<8x96xf32>
    %31 = arith.addf %28, %30 : vector<8x96xf32>
    %32 = vector.extract_strided_slice %31 {offsets = [0, 0], sizes = [8, 32], strides = [1, 1]} : vector<8x96xf32> to vector<8x32xf32>
    %cst_15 = arith.constant 0.353553385 : f32
    %33 = vector.broadcast %cst_15 : f32 to vector<8x32xf32>
    %34 = arith.mulf %32, %33 : vector<8x32xf32>
    %35 = arith.truncf %34 : vector<8x32xf32> to vector<8x32xbf16>
    %36 = vector.extract_strided_slice %31 {offsets = [0, 32], sizes = [8, 32], strides = [1, 1]} : vector<8x96xf32> to vector<8x32xf32>
    %37 = arith.truncf %36 : vector<8x32xf32> to vector<8x32xbf16>
    %38 = vector.extract_strided_slice %31 {offsets = [0, 64], sizes = [8, 32], strides = [1, 1]} : vector<8x96xf32> to vector<8x32xf32>
    %39 = arith.truncf %38 : vector<8x32xf32> to vector<8x32xbf16>
    %40 = tpu.iota {dimensions = array<i32: 0>} : vector<8x8xi32>
    %41 = tpu.iota {dimensions = array<i32: 1>} : vector<8x8xi32>
    %42 = arith.cmpi sgt, %41, %40 : vector<8x8xi32>
    %cst_16 = arith.constant -1.000000e+30 : f32
    %cst_17 = arith.constant 0.000000e+00 : f32
    %43 = vector.broadcast %cst_16 : f32 to vector<8x8xf32>
    %44 = vector.broadcast %cst_17 : f32 to vector<8x8xf32>
    %45 = arith.select %42, %43, %44 : vector<8x8xi1>, vector<8x8xf32>
    %46 = vector.extract_strided_slice %35 {offsets = [0, 0], sizes = [8, 8], strides = [1, 1]} : vector<8x32xbf16> to vector<8x8xbf16>
    %47 = vector.extract_strided_slice %37 {offsets = [0, 0], sizes = [8, 8], strides = [1, 1]} : vector<8x32xbf16> to vector<8x8xbf16>
    %cst_18 = arith.constant dense<0.000000e+00> : vector<8x8xf32>
    %48 = tpu.matmul %46, %47, %cst_18 {dimension_numbers = #tpu.dot_dimension_numbers<[1], [1], [0], [0], [0, 0, 1, 0], [], []>} : vector<8x8xbf16>, vector<8x8xbf16>, vector<8x8xf32> -> vector<8x8xf32>
    %49 = arith.addf %48, %45 : vector<8x8xf32>
    %cst_19 = arith.constant dense<0xFF800000> : vector<8xf32>
    %50 = vector.multi_reduction <maximumf>, %49, %cst_19 [1] : vector<8x8xf32> to vector<8xf32>
    %51 = vector.shape_cast %50 : vector<8xf32> to vector<8x1xf32>
    %52 = vector.broadcast %51 : vector<8x1xf32> to vector<8x8xf32>
    %53 = arith.subf %49, %52 : vector<8x8xf32>
    %54 = math.exp %53 : vector<8x8xf32>
    %cst_20 = arith.constant dense<0.000000e+00> : vector<8xf32>
    %55 = vector.multi_reduction <add>, %54, %cst_20 [1] : vector<8x8xf32> to vector<8xf32>
    %56 = vector.shape_cast %55 : vector<8xf32> to vector<8x1xf32>
    %57 = tpu.reciprocal %56 {approx = true} : vector<8x1xf32> -> vector<8x1xf32>
    %58 = vector.broadcast %57 : vector<8x1xf32> to vector<8x8xf32>
    %59 = arith.mulf %54, %58 : vector<8x8xf32>
    %60 = arith.truncf %59 : vector<8x8xf32> to vector<8x8xbf16>
    %61 = vector.extract_strided_slice %39 {offsets = [0, 0], sizes = [8, 8], strides = [1, 1]} : vector<8x32xbf16> to vector<8x8xbf16>
    %cst_21 = arith.constant dense<0.000000e+00> : vector<8x8xf32>
    %62 = tpu.matmul %60, %61, %cst_21 {dimension_numbers = #tpu.dot_dimension_numbers<[1], [0], [0], [1], [0, 0, 1, 1], [], []>} : vector<8x8xbf16>, vector<8x8xbf16>, vector<8x8xf32> -> vector<8x8xf32>
    %c0_22 = arith.constant 0 : index
    %c0_23 = arith.constant 0 : index
    %63 = vector.load %arg15[%c0_22, %c0_23] : memref<8x32xf32, #tpu.memory_space<vmem>>, vector<8x8xf32>
    tpu.vector_store %arg15[%c0_22, %c0_23], %62 {strides = array<i32>} : memref<8x32xf32, #tpu.memory_space<vmem>>, vector<8x8xf32>,
    %64 = vector.extract_strided_slice %35 {offsets = [0, 8], sizes = [8, 8], strides = [1, 1]} : vector<8x32xbf16> to vector<8x8xbf16>
    %65 = vector.extract_strided_slice %37 {offsets = [0, 8], sizes = [8, 8], strides = [1, 1]} : vector<8x32xbf16> to vector<8x8xbf16>
    %cst_24 = arith.constant dense<0.000000e+00> : vector<8x8xf32>
    %66 = tpu.matmul %64, %65, %cst_24 {dimension_numbers = #tpu.dot_dimension_numbers<[1], [1], [0], [0], [0, 0, 1, 0], [], []>} : vector<8x8xbf16>, vector<8x8xbf16>, vector<8x8xf32> -> vector<8x8xf32>
    %67 = arith.addf %66, %45 : vector<8x8xf32>
    %cst_25 = arith.constant dense<0xFF800000> : vector<8xf32>
    %68 = vector.multi_reduction <maximumf>, %67, %cst_25 [1] : vector<8x8xf32> to vector<8xf32>
    %69 = vector.shape_cast %68 : vector<8xf32> to vector<8x1xf32>
    %70 = vector.broadcast %69 : vector<8x1xf32> to vector<8x8xf32>
    %71 = arith.subf %67, %70 : vector<8x8xf32>
    %72 = math.exp %71 : vector<8x8xf32>
    %cst_26 = arith.constant dense<0.000000e+00> : vector<8xf32>
    %73 = vector.multi_reduction <add>, %72, %cst_26 [1] : vector<8x8xf32> to vector<8xf32>
    %74 = vector.shape_cast %73 : vector<8xf32> to vector<8x1xf32>
    %75 = tpu.reciprocal %74 {approx = true} : vector<8x1xf32> -> vector<8x1xf32>
    %76 = vector.broadcast %75 : vector<8x1xf32> to vector<8x8xf32>
    %77 = arith.mulf %72, %76 : vector<8x8xf32>
    %78 = arith.truncf %77 : vector<8x8xf32> to vector<8x8xbf16>
    %79 = vector.extract_strided_slice %39 {offsets = [0, 8], sizes = [8, 8], strides = [1, 1]} : vector<8x32xbf16> to vector<8x8xbf16>
    %cst_27 = arith.constant dense<0.000000e+00> : vector<8x8xf32>
    %80 = tpu.matmul %78, %79, %cst_27 {dimension_numbers = #tpu.dot_dimension_numbers<[1], [0], [0], [1], [0, 0, 1, 1], [], []>} : vector<8x8xbf16>, vector<8x8xbf16>, vector<8x8xf32> -> vector<8x8xf32>
    %c0_28 = arith.constant 0 : index
    %c8 = arith.constant 8 : index
    %81 = vector.load %arg15[%c0_28, %c8] : memref<8x32xf32, #tpu.memory_space<vmem>>, vector<8x8xf32>
    tpu.vector_store %arg15[%c0_28, %c8], %80 {strides = array<i32>} : memref<8x32xf32, #tpu.memory_space<vmem>>, vector<8x8xf32>,
    %82 = vector.extract_strided_slice %35 {offsets = [0, 16], sizes = [8, 8], strides = [1, 1]} : vector<8x32xbf16> to vector<8x8xbf16>
    %83 = vector.extract_strided_slice %37 {offsets = [0, 16], sizes = [8, 8], strides = [1, 1]} : vector<8x32xbf16> to vector<8x8xbf16>
    %cst_29 = arith.constant dense<0.000000e+00> : vector<8x8xf32>
    %84 = tpu.matmul %82, %83, %cst_29 {dimension_numbers = #tpu.dot_dimension_numbers<[1], [1], [0], [0], [0, 0, 1, 0], [], []>} : vector<8x8xbf16>, vector<8x8xbf16>, vector<8x8xf32> -> vector<8x8xf32>
    %85 = arith.addf %84, %45 : vector<8x8xf32>
    %cst_30 = arith.constant dense<0xFF800000> : vector<8xf32>
    %86 = vector.multi_reduction <maximumf>, %85, %cst_30 [1] : vector<8x8xf32> to vector<8xf32>
    %87 = vector.shape_cast %86 : vector<8xf32> to vector<8x1xf32>
    %88 = vector.broadcast %87 : vector<8x1xf32> to vector<8x8xf32>
    %89 = arith.subf %85, %88 : vector<8x8xf32>
    %90 = math.exp %89 : vector<8x8xf32>
    %cst_31 = arith.constant dense<0.000000e+00> : vector<8xf32>
    %91 = vector.multi_reduction <add>, %90, %cst_31 [1] : vector<8x8xf32> to vector<8xf32>
    %92 = vector.shape_cast %91 : vector<8xf32> to vector<8x1xf32>
    %93 = tpu.reciprocal %92 {approx = true} : vector<8x1xf32> -> vector<8x1xf32>
    %94 = vector.broadcast %93 : vector<8x1xf32> to vector<8x8xf32>
    %95 = arith.mulf %90, %94 : vector<8x8xf32>
    %96 = arith.truncf %95 : vector<8x8xf32> to vector<8x8xbf16>
    %97 = vector.extract_strided_slice %39 {offsets = [0, 16], sizes = [8, 8], strides = [1, 1]} : vector<8x32xbf16> to vector<8x8xbf16>
    %cst_32 = arith.constant dense<0.000000e+00> : vector<8x8xf32>
    %98 = tpu.matmul %96, %97, %cst_32 {dimension_numbers = #tpu.dot_dimension_numbers<[1], [0], [0], [1], [0, 0, 1, 1], [], []>} : vector<8x8xbf16>, vector<8x8xbf16>, vector<8x8xf32> -> vector<8x8xf32>
    %c0_33 = arith.constant 0 : index
    %c16 = arith.constant 16 : index
    %99 = vector.load %arg15[%c0_33, %c16] : memref<8x32xf32, #tpu.memory_space<vmem>>, vector<8x8xf32>
    tpu.vector_store %arg15[%c0_33, %c16], %98 {strides = array<i32>} : memref<8x32xf32, #tpu.memory_space<vmem>>, vector<8x8xf32>,
    %100 = vector.extract_strided_slice %35 {offsets = [0, 24], sizes = [8, 8], strides = [1, 1]} : vector<8x32xbf16> to vector<8x8xbf16>
    %101 = vector.extract_strided_slice %37 {offsets = [0, 24], sizes = [8, 8], strides = [1, 1]} : vector<8x32xbf16> to vector<8x8xbf16>
    %cst_34 = arith.constant dense<0.000000e+00> : vector<8x8xf32>
    %102 = tpu.matmul %100, %101, %cst_34 {dimension_numbers = #tpu.dot_dimension_numbers<[1], [1], [0], [0], [0, 0, 1, 0], [], []>} : vector<8x8xbf16>, vector<8x8xbf16>, vector<8x8xf32> -> vector<8x8xf32>
    %103 = arith.addf %102, %45 : vector<8x8xf32>
    %cst_35 = arith.constant dense<0xFF800000> : vector<8xf32>
    %104 = vector.multi_reduction <maximumf>, %103, %cst_35 [1] : vector<8x8xf32> to vector<8xf32>
    %105 = vector.shape_cast %104 : vector<8xf32> to vector<8x1xf32>
    %106 = vector.broadcast %105 : vector<8x1xf32> to vector<8x8xf32>
    %107 = arith.subf %103, %106 : vector<8x8xf32>
    %108 = math.exp %107 : vector<8x8xf32>
    %cst_36 = arith.constant dense<0.000000e+00> : vector<8xf32>
    %109 = vector.multi_reduction <add>, %108, %cst_36 [1] : vector<8x8xf32> to vector<8xf32>
    %110 = vector.shape_cast %109 : vector<8xf32> to vector<8x1xf32>
    %111 = tpu.reciprocal %110 {approx = true} : vector<8x1xf32> -> vector<8x1xf32>
    %112 = vector.broadcast %111 : vector<8x1xf32> to vector<8x8xf32>
    %113 = arith.mulf %108, %112 : vector<8x8xf32>
    %114 = arith.truncf %113 : vector<8x8xf32> to vector<8x8xbf16>
    %115 = vector.extract_strided_slice %39 {offsets = [0, 24], sizes = [8, 8], strides = [1, 1]} : vector<8x32xbf16> to vector<8x8xbf16>
    %cst_37 = arith.constant dense<0.000000e+00> : vector<8x8xf32>
    %116 = tpu.matmul %114, %115, %cst_37 {dimension_numbers = #tpu.dot_dimension_numbers<[1], [0], [0], [1], [0, 0, 1, 1], [], []>} : vector<8x8xbf16>, vector<8x8xbf16>, vector<8x8xf32> -> vector<8x8xf32>
    %c0_38 = arith.constant 0 : index
    %c24 = arith.constant 24 : index
    %117 = vector.load %arg15[%c0_38, %c24] : memref<8x32xf32, #tpu.memory_space<vmem>>, vector<8x8xf32>
    tpu.vector_store %arg15[%c0_38, %c24], %116 {strides = array<i32>} : memref<8x32xf32, #tpu.memory_space<vmem>>, vector<8x8xf32>,
    %c0_39 = arith.constant 0 : index
    %c0_40 = arith.constant 0 : index
    %118 = vector.load %arg15[%c0_39, %c0_40] : memref<8x32xf32, #tpu.memory_space<vmem>>, vector<8x32xf32>
    %119 = arith.truncf %118 : vector<8x32xf32> to vector<8x32xbf16>
    %c0_41 = arith.constant 0 : index
    %c0_42 = arith.constant 0 : index
    %120 = vector.load %arg6[%c0_41, %c0_42] : memref<32x32xbf16, #tpu.memory_space<vmem>>, vector<32x32xbf16>
    %cst_43 = arith.constant dense<0.000000e+00> : vector<8x32xf32>
    %121 = tpu.matmul %119, %120, %cst_43 {dimension_numbers = #tpu.dot_dimension_numbers<[1], [0], [0], [1], [0, 0, 1, 1], [], []>} : vector<8x32xbf16>, vector<32x32xbf16>, vector<8x32xf32> -> vector<8x32xf32>
    %c0_44 = arith.constant 0 : index
    %c0_45 = arith.constant 0 : index
    %122 = vector.load %arg7[%c0_44, %c0_45] : memref<1x32xf32, #tpu.memory_space<vmem>>, vector<1x32xf32>
    %123 = vector.broadcast %122 : vector<1x32xf32> to vector<8x32xf32>
    %124 = arith.addf %121, %123 : vector<8x32xf32>
    %125 = arith.addf %1, %124 : vector<8x32xf32>
    %c0_46 = arith.constant 0 : index
    %c0_47 = arith.constant 0 : index
    %126 = vector.load %arg8[%c0_46, %c0_47] : memref<1x32xf32, #tpu.memory_space<vmem>>, vector<1x32xf32>
    %c0_48 = arith.constant 0 : index
    %c0_49 = arith.constant 0 : index
    %127 = vector.load %arg9[%c0_48, %c0_49] : memref<1x32xf32, #tpu.memory_space<vmem>>, vector<1x32xf32>
    %cst_50 = arith.constant dense<0.000000e+00> : vector<8xf32>
    %128 = vector.multi_reduction <add>, %125, %cst_50 [1] : vector<8x32xf32> to vector<8xf32>
    %129 = vector.shape_cast %128 : vector<8xf32> to vector<8x1xf32>
    %cst_51 = arith.constant 3.200000e+01 : f32
    %130 = vector.broadcast %cst_51 : f32 to vector<8x1xf32>
    %131 = arith.divf %129, %130 : vector<8x1xf32>
    %132 = vector.broadcast %131 : vector<8x1xf32> to vector<8x32xf32>
    %133 = arith.subf %125, %132 : vector<8x32xf32>
    %134 = arith.mulf %133, %133 : vector<8x32xf32>
    %cst_52 = arith.constant dense<0.000000e+00> : vector<8xf32>
    %135 = vector.multi_reduction <add>, %134, %cst_52 [1] : vector<8x32xf32> to vector<8xf32>
    %136 = vector.shape_cast %135 : vector<8xf32> to vector<8x1xf32>
    %cst_53 = arith.constant 3.200000e+01 : f32
    %137 = vector.broadcast %cst_53 : f32 to vector<8x1xf32>
    %138 = arith.divf %136, %137 : vector<8x1xf32>
    %139 = vector.broadcast %131 : vector<8x1xf32> to vector<8x32xf32>
    %140 = arith.subf %125, %139 : vector<8x32xf32>
    %cst_54 = arith.constant 9.99999974E-6 : f32
    %141 = vector.broadcast %cst_54 : f32 to vector<8x1xf32>
    %142 = arith.addf %138, %141 : vector<8x1xf32>
    %143 = math.rsqrt %142 : vector<8x1xf32>
    %144 = vector.broadcast %143 : vector<8x1xf32> to vector<8x32xf32>
    %145 = arith.mulf %140, %144 : vector<8x32xf32>
    %146 = vector.broadcast %126 : vector<1x32xf32> to vector<8x32xf32>
    %147 = arith.mulf %145, %146 : vector<8x32xf32>
    %148 = vector.broadcast %127 : vector<1x32xf32> to vector<8x32xf32>
    %149 = arith.addf %147, %148 : vector<8x32xf32>
    %150 = arith.truncf %149 : vector<8x32xf32> to vector<8x32xbf16>
    %c0_55 = arith.constant 0 : index
    %c0_56 = arith.constant 0 : index
    %151 = vector.load %arg10[%c0_55, %c0_56] : memref<32x128xbf16, #tpu.memory_space<vmem>>, vector<32x128xbf16>
    %cst_57 = arith.constant dense<0.000000e+00> : vector<8x128xf32>
    %152 = tpu.matmul %150, %151, %cst_57 {dimension_numbers = #tpu.dot_dimension_numbers<[1], [0], [0], [1], [0, 0, 1, 1], [], []>} : vector<8x32xbf16>, vector<32x128xbf16>, vector<8x128xf32> -> vector<8x128xf32>
    %c0_58 = arith.constant 0 : index
    %c0_59 = arith.constant 0 : index
    %153 = vector.load %arg11[%c0_58, %c0_59] : memref<1x128xf32, #tpu.memory_space<vmem>>, vector<1x128xf32>
    %154 = vector.broadcast %153 : vector<1x128xf32> to vector<8x128xf32>
    %155 = arith.addf %152, %154 : vector<8x128xf32>
    %cst_60 = arith.constant 1.702000e+00 : f32
    %156 = vector.broadcast %cst_60 : f32 to vector<8x128xf32>
    %157 = arith.mulf %156, %155 : vector<8x128xf32>
    %158 = arith.negf %157 : vector<8x128xf32>
    %159 = math.exp %158 : vector<8x128xf32>
    %cst_61 = arith.constant 1.000000e+00 : f32
    %160 = vector.broadcast %cst_61 : f32 to vector<8x128xf32>
    %161 = arith.addf %160, %159 : vector<8x128xf32>
    %162 = arith.divf %160, %161 : vector<8x128xf32>
    %163 = arith.mulf %155, %162 : vector<8x128xf32>
    %164 = arith.truncf %163 : vector<8x128xf32> to vector<8x128xbf16>
    %c0_62 = arith.constant 0 : index
    %c0_63 = arith.constant 0 : index
    %165 = vector.load %arg12[%c0_62, %c0_63] : memref<128x32xbf16, #tpu.memory_space<vmem>>, vector<128x32xbf16>
    %cst_64 = arith.constant dense<0.000000e+00> : vector<8x32xf32>
    %166 = tpu.matmul %164, %165, %cst_64 {dimension_numbers = #tpu.dot_dimension_numbers<[1], [0], [0], [1], [0, 0, 1, 1], [], []>} : vector<8x128xbf16>, vector<128x32xbf16>, vector<8x32xf32> -> vector<8x32xf32>
    %c0_65 = arith.constant 0 : index
    %c0_66 = arith.constant 0 : index
    %167 = vector.load %arg13[%c0_65, %c0_66] : memref<1x32xf32, #tpu.memory_space<vmem>>, vector<1x32xf32>
    %168 = vector.broadcast %167 : vector<1x32xf32> to vector<8x32xf32>
    %169 = arith.addf %166, %168 : vector<8x32xf32>
    %170 = arith.addf %125, %169 : vector<8x32xf32>
    %c0_67 = arith.constant 0 : index
    %c0_68 = arith.constant 0 : index
    %c0_69 = arith.constant 0 : index
    %171 = vector.load %arg14[%c0_67, %c0_68, %c0_69] : memref<1x8x32xf32, #tpu.memory_space<vmem>>, vector<1x8x32xf32>
    %172 = vector.shape_cast %171 : vector<1x8x32xf32> to vector<8x32xf32>
    %173 = vector.shape_cast %170 : vector<8x32xf32> to vector<1x8x32xf32>
    tpu.vector_store %arg14[%c0_67, %c0_68, %c0_69], %173 {strides = array<i32>} : memref<1x8x32xf32, #tpu.memory_space<vmem>>, vector<1x8x32xf32>,
    return
  }
  func.func @transform_0(%arg0: i32) -> (i32, i32, i32) {
    %c0_i32 = arith.constant 0 : i32
    %c0_i32_0 = arith.constant 0 : i32
    %c0_i32_1 = arith.constant 0 : i32
    return %arg0, %c0_i32, %c0_i32_0 : i32, i32, i32
  }
  func.func @transform_1(%arg0: i32) -> (i32, i32) {
    %c0_i32 = arith.constant 0 : i32
    %c0_i32_0 = arith.constant 0 : i32
    %c0_i32_1 = arith.constant 0 : i32
    return %c0_i32, %c0_i32_0 : i32, i32
  }
  func.func @transform_2(%arg0: i32) -> (i32, i32) {
    %c0_i32 = arith.constant 0 : i32
    %c0_i32_0 = arith.constant 0 : i32
    %c0_i32_1 = arith.constant 0 : i32
    return %c0_i32, %c0_i32_0 : i32, i32
  }
  func.func @transform_3(%arg0: i32) -> (i32, i32) {
    %c0_i32 = arith.constant 0 : i32
    %c0_i32_0 = arith.constant 0 : i32
    %c0_i32_1 = arith.constant 0 : i32
    return %c0_i32, %c0_i32_0 : i32, i32
  }
  func.func @transform_4(%arg0: i32) -> (i32, i32) {
    %c0_i32 = arith.constant 0 : i32
    %c0_i32_0 = arith.constant 0 : i32
    %c0_i32_1 = arith.constant 0 : i32
    return %c0_i32, %c0_i32_0 : i32, i32
  }
  func.func @transform_5(%arg0: i32) -> (i32, i32) {
    %c0_i32 = arith.constant 0 : i32
    %c0_i32_0 = arith.constant 0 : i32
    %c0_i32_1 = arith.constant 0 : i32
    return %c0_i32, %c0_i32_0 : i32, i32
  }
  func.func @transform_6(%arg0: i32) -> (i32, i32) {
    %c0_i32 = arith.constant 0 : i32
    %c0_i32_0 = arith.constant 0 : i32
    %c0_i32_1 = arith.constant 0 : i32
    return %c0_i32, %c0_i32_0 : i32, i32
  }
  func.func @transform_7(%arg0: i32) -> (i32, i32) {
    %c0_i32 = arith.constant 0 : i32
    %c0_i32_0 = arith.constant 0 : i32
    %c0_i32_1 = arith.constant 0 : i32
    return %c0_i32, %c0_i32_0 : i32, i32
  }
  func.func @transform_8(%arg0: i32) -> (i32, i32) {
    %c0_i32 = arith.constant 0 : i32
    %c0_i32_0 = arith.constant 0 : i32
    %c0_i32_1 = arith.constant 0 : i32
    return %c0_i32, %c0_i32_0 : i32, i32
  }
  func.func @transform_9(%arg0: i32) -> (i32, i32) {
    %c0_i32 = arith.constant 0 : i32
    %c0_i32_0 = arith.constant 0 : i32
    %c0_i32_1 = arith.constant 0 : i32
    return %c0_i32, %c0_i32_0 : i32, i32
  }
  func.func @transform_10(%arg0: i32) -> (i32, i32) {
    %c0_i32 = arith.constant 0 : i32
    %c0_i32_0 = arith.constant 0 : i32
    %c0_i32_1 = arith.constant 0 : i32
    return %c0_i32, %c0_i32_0 : i32, i32
  }
  func.func @transform_11(%arg0: i32) -> (i32, i32) {
    %c0_i32 = arith.constant 0 : i32
    %c0_i32_0 = arith.constant 0 : i32
    %c0_i32_1 = arith.constant 0 : i32
    return %c0_i32, %c0_i32_0 : i32, i32
  }
  func.func @transform_12(%arg0: i32) -> (i32, i32) {
    %c0_i32 = arith.constant 0 : i32
    %c0_i32_0 = arith.constant 0 : i32
    %c0_i32_1 = arith.constant 0 : i32
    return %c0_i32, %c0_i32_0 : i32, i32
  }
  func.func @transform_13(%arg0: i32) -> (i32, i32, i32) {
    %c0_i32 = arith.constant 0 : i32
    %c0_i32_0 = arith.constant 0 : i32
    %c0_i32_1 = arith.constant 0 : i32
    return %arg0, %c0_i32, %c0_i32_0 : i32, i32, i32
  }
}

module attributes {stable_mosaic.version = 11 : i64} {
  func.func @clip_layer_kernel(%arg0: i32, %arg1: memref<1x8x32xf32, #tpu.memory_space<vmem>>, %arg2: memref<1x32xf32, #tpu.memory_space<vmem>>, %arg3: memref<1x32xf32, #tpu.memory_space<vmem>>, %arg4: memref<32x96xbf16, #tpu.memory_space<vmem>>, %arg5: memref<1x96xf32, #tpu.memory_space<vmem>>, %arg6: memref<32x32xbf16, #tpu.memory_space<vmem>>, %arg7: memref<1x32xf32, #tpu.memory_space<vmem>>, %arg8: memref<1x32xf32, #tpu.memory_space<vmem>>, %arg9: memref<1x32xf32, #tpu.memory_space<vmem>>, %arg10: memref<32x128xbf16, #tpu.memory_space<vmem>>, %arg11: memref<1x128xf32, #tpu.memory_space<vmem>>, %arg12: memref<128x32xbf16, #tpu.memory_space<vmem>>, %arg13: memref<1x32xf32, #tpu.memory_space<vmem>>, %arg14: memref<1x8x32xf32, #tpu.memory_space<vmem>>, %arg15: memref<8x32xf32, #tpu.memory_space<vmem>>) attributes {dimension_semantics = [#tpu.dimension_semantics<parallel>], iteration_bounds = array<i64: 2>, scalar_prefetch = 0 : i64, scratch_operands = 1 : i64, tpu.core_type = #tpu.core_type<tc>, window_params = [{transform_indices = @transform_0, window_bounds = array<i64: 1, 8, 32>}, {pipeline_mode = #tpu.pipeline_mode<synchronous>, transform_indices = @transform_1, window_bounds = array<i64: 1, 32>}, {pipeline_mode = #tpu.pipeline_mode<synchronous>, transform_indices = @transform_2, window_bounds = array<i64: 1, 32>}, {pipeline_mode = #tpu.pipeline_mode<synchronous>, transform_indices = @transform_3, window_bounds = array<i64: 32, 96>}, {pipeline_mode = #tpu.pipeline_mode<synchronous>, transform_indices = @transform_4, window_bounds = array<i64: 1, 96>}, {pipeline_mode = #tpu.pipeline_mode<synchronous>, transform_indices = @transform_5, window_bounds = array<i64: 32, 32>}, {pipeline_mode = #tpu.pipeline_mode<synchronous>, transform_indices = @transform_6, window_bounds = array<i64: 1, 32>}, {pipeline_mode = #tpu.pipeline_mode<synchronous>, transform_indices = @transform_7, window_bounds = array<i64: 1, 32>}, {pipeline_mode = #tpu.pipeline_mode<synchronous>, transform_indices = @transform_8, window_bounds = array<i64: 1, 32>}, {pipeline_mode = #tpu.pipeline_mode<synchronous>, transform_indices = @transform_9, window_bounds = array<i64: 32, 128>}, {pipeline_mode = #tpu.pipeline_mode<synchronous>, transform_indices = @transform_10, window_bounds = array<i64: 1, 128>}, {pipeline_mode = #tpu.pipeline_mode<synchronous>, transform_indices = @transform_11, window_bounds = array<i64: 128, 32>}, {pipeline_mode = #tpu.pipeline_mode<synchronous>, transform_indices = @transform_12, window_bounds = array<i64: 1, 32>}, {transform_indices = @transform_13, window_bounds = array<i64: 1, 8, 32>}]} {
    %c0 = arith.constant 0 : index
    %c0_0 = arith.constant 0 : index
    %c0_1 = arith.constant 0 : index
    %0 = vector.load %arg1[%c0, %c0_0, %c0_1] : memref<1x8x32xf32, #tpu.memory_space<vmem>>, vector<1x8x32xf32>
    %1 = vector.shape_cast %0 : vector<1x8x32xf32> to vector<8x32xf32>
    %c0_2 = arith.constant 0 : index
    %c0_3 = arith.constant 0 : index
    %2 = vector.load %arg2[%c0_2, %c0_3] : memref<1x32xf32, #tpu.memory_space<vmem>>, vector<1x32xf32>
    %c0_4 = arith.constant 0 : index
    %c0_5 = arith.constant 0 : index
    %3 = vector.load %arg3[%c0_4, %c0_5] : memref<1x32xf32, #tpu.memory_space<vmem>>, vector<1x32xf32>
    %cst = arith.constant dense<0.000000e+00> : vector<8xf32>
    %4 = vector.multi_reduction <add>, %1, %cst [1] : vector<8x32xf32> to vector<8xf32>
    %5 = vector.shape_cast %4 : vector<8xf32> to vector<8x1xf32>
    %cst_6 = arith.constant 3.200000e+01 : f32
    %6 = vector.broadcast %cst_6 : f32 to vector<8x1xf32>
    %7 = arith.divf %5, %6 : vector<8x1xf32>
    %8 = vector.broadcast %7 : vector<8x1xf32> to vector<8x32xf32>
    %9 = arith.subf %1, %8 : vector<8x32xf32>
    %10 = arith.mulf %9, %9 : vector<8x32xf32>
    %cst_7 = arith.constant dense<0.000000e+00> : vector<8xf32>
    %11 = vector.multi_reduction <add>, %10, %cst_7 [1] : vector<8x32xf32> to vector<8xf32>
    %12 = vector.shape_cast %11 : vector<8xf32> to vector<8x1xf32>
    %cst_8 = arith.constant 3.200000e+01 : f32
    %13 = vector.broadcast %cst_8 : f32 to vector<8x1xf32>
    %14 = arith.divf %12, %13 : vector<8x1xf32>
    %15 = vector.broadcast %7 : vector<8x1xf32> to vector<8x32xf32>
    %16 = arith.subf %1, %15 : vector<8x32xf32>
    %cst_9 = arith.constant 9.99999974E-6 : f32
    %17 = vector.broadcast %cst_9 : f32 to vector<8x1xf32>
    %18 = arith.addf %14, %17 : vector<8x1xf32>
    %19 = math.rsqrt %18 : vector<8x1xf32>
    %20 = vector.broadcast %19 : vector<8x1xf32> to vector<8x32xf32>
    %21 = arith.mulf %16, %20 : vector<8x32xf32>
    %22 = vector.broadcast %2 : vector<1x32xf32> to vector<8x32xf32>
    %23 = arith.mulf %21, %22 : vector<8x32xf32>
    %24 = vector.broadcast %3 : vector<1x32xf32> to vector<8x32xf32>
    %25 = arith.addf %23, %24 : vector<8x32xf32>
    %26 = arith.truncf %25 : vector<8x32xf32> to vector<8x32xbf16>
    %c0_10 = arith.constant 0 : index
    %c0_11 = arith.constant 0 : index
    %27 = vector.load %arg4[%c0_10, %c0_11] : memref<32x96xbf16, #tpu.memory_space<vmem>>, vector<32x96xbf16>
    %cst_12 = arith.constant dense<0.000000e+00> : vector<8x96xf32>
    %28 = tpu.matmul %26, %27, %cst_12 {dimension_numbers = #tpu.dot_dimension_numbers<[1], [0], [0], [1], [0, 0, 1, 1], [], []>} : vector<8x32xbf16>, vector<32x96xbf16>, vector<8x96xf32> -> vector<8x96xf32>
    %c0_13 = arith.constant 0 : index
    %c0_14 = arith.constant 0 : index
    %29 = vector.load %arg5[%c0_13, %c0_14] : memref<1x96xf32, #tpu.memory_space<vmem>>, vector<1x96xf32>
    %30 = vector.broadcast %29 : vector<1x96xf32> to vector<8x96xf32>
    %31 = arith.addf %28, %30 : vector<8x96xf32>
    %32 = vector.extract_strided_slice %31 {offsets = [0, 0], sizes = [8, 32], strides = [1, 1]} : vector<8x96xf32> to vector<8x32xf32>
    %cst_15 = arith.constant 0.353553385 : f32
    %33 = vector.broadcast %cst_15 : f32 to vector<8x32xf32>
    %34 = arith.mulf %32, %33 : vector<8x32xf32>
    %35 = arith.truncf %34 : vector<8x32xf32> to vector<8x32xbf16>
    %36 = vector.extract_strided_slice %31 {offsets = [0, 32], sizes = [8, 32], strides = [1, 1]} : vector<8x96xf32> to vector<8x32xf32>
    %37 = arith.truncf %36 : vector<8x32xf32> to vector<8x32xbf16>
    %38 = vector.extract_strided_slice %31 {offsets = [0, 64], sizes = [8, 32], strides = [1, 1]} : vector<8x96xf32> to vector<8x32xf32>
    %39 = arith.truncf %38 : vector<8x32xf32> to vector<8x32xbf16>
    %40 = tpu.iota {dimensions = array<i32: 0>} : vector<8x8xi32>
    %41 = tpu.iota {dimensions = array<i32: 1>} : vector<8x8xi32>
    %42 = arith.cmpi sgt, %41, %40 : vector<8x8xi32>
    %cst_16 = arith.constant -1.000000e+30 : f32
    %cst_17 = arith.constant 0.000000e+00 : f32
    %43 = vector.broadcast %cst_16 : f32 to vector<8x8xf32>
    %44 = vector.broadcast %cst_17 : f32 to vector<8x8xf32>
    %45 = arith.select %42, %43, %44 : vector<8x8xi1>, vector<8x8xf32>
    %46 = vector.extract_strided_slice %35 {offsets = [0, 0], sizes = [8, 8], strides = [1, 1]} : vector<8x32xbf16> to vector<8x8xbf16>
    %47 = vector.extract_strided_slice %37 {offsets = [0, 0], sizes = [8, 8], strides = [1, 1]} : vector<8x32xbf16> to vector<8x8xbf16>
    %cst_18 = arith.constant dense<0.000000e+00> : vector<8x8xf32>
    %48 = tpu.matmul %46, %47, %cst_18 {dimension_numbers = #tpu.dot_dimension_numbers<[1], [1], [0], [0], [0, 0, 1, 0], [], []>} : vector<8x8xbf16>, vector<8x8xbf16>, vector<8x8xf32> -> vector<8x8xf32>
    %49 = arith.addf %48, %45 : vector<8x8xf32>
    %cst_19 = arith.constant dense<0xFF800000> : vector<8xf32>
    %50 = vector.multi_reduction <maximumf>, %49, %cst_19 [1] : vector<8x8xf32> to vector<8xf32>
    %51 = vector.shape_cast %50 : vector<8xf32> to vector<8x1xf32>
    %52 = vector.broadcast %51 : vector<8x1xf32> to vector<8x8xf32>
    %53 = arith.subf %49, %52 : vector<8x8xf32>
    %54 = math.exp %53 : vector<8x8xf32>
    %cst_20 = arith.constant dense<0.000000e+00> : vector<8xf32>
    %55 = vector.multi_reduction <add>, %54, %cst_20 [1] : vector<8x8xf32> to vector<8xf32>
    %56 = vector.shape_cast %55 : vector<8xf32> to vector<8x1xf32>
    %57 = tpu.reciprocal %56 {approx = true} : vector<8x1xf32> -> vector<8x1xf32>
    %58 = vector.broadcast %57 : vector<8x1xf32> to vector<8x8xf32>
    %59 = arith.mulf %54, %58 : vector<8x8xf32>
    %60 = arith.truncf %59 : vector<8x8xf32> to vector<8x8xbf16>
    %61 = vector.extract_strided_slice %39 {offsets = [0, 0], sizes = [8, 8], strides = [1, 1]} : vector<8x32xbf16> to vector<8x8xbf16>
    %cst_21 = arith.constant dense<0.000000e+00> : vector<8x8xf32>
    %62 = tpu.matmul %60, %61, %cst_21 {dimension_numbers = #tpu.dot_dimension_numbers<[1], [0], [0], [1], [0, 0, 1, 1], [], []>} : vector<8x8xbf16>, vector<8x8xbf16>, vector<8x8xf32> -> vector<8x8xf32>
    %c0_22 = arith.constant 0 : index
    %c0_23 = arith.constant 0 : index
    %63 = vector.load %arg15[%c0_22, %c0_23] : memref<8x32xf32, #tpu.memory_space<vmem>>, vector<8x8xf32>
    tpu.vector_store %arg15[%c0_22, %c0_23], %62 {strides = array<i32>} : memref<8x32xf32, #tpu.memory_space<vmem>>, vector<8x8xf32>,
    %64 = vector.extract_strided_slice %35 {offsets = [0, 8], sizes = [8, 8], strides = [1, 1]} : vector<8x32xbf16> to vector<8x8xbf16>
    %65 = vector.extract_strided_slice %37 {offsets = [0, 8], sizes = [8, 8], strides = [1, 1]} : vector<8x32xbf16> to vector<8x8xbf16>
    %cst_24 = arith.constant dense<0.000000e+00> : vector<8x8xf32>
    %66 = tpu.matmul %64, %65, %cst_24 {dimension_numbers = #tpu.dot_dimension_numbers<[1], [1], [0], [0], [0, 0, 1, 0], [], []>} : vector<8x8xbf16>, vector<8x8xbf16>, vector<8x8xf32> -> vector<8x8xf32>
    %67 = arith.addf %66, %45 : vector<8x8xf32>
    %cst_25 = arith.constant dense<0xFF800000> : vector<8xf32>
    %68 = vector.multi_reduction <maximumf>, %67, %cst_25 [1] : vector<8x8xf32> to vector<8xf32>
    %69 = vector.shape_cast %68 : vector<8xf32> to vector<8x1xf32>
    %70 = vector.broadcast %69 : vector<8x1xf32> to vector<8x8xf32>
    %71 = arith.subf %67, %70 : vector<8x8xf32>
    %72 = math.exp %71 : vector<8x8xf32>
    %cst_26 = arith.constant dense<0.000000e+00> : vector<8xf32>
    %73 = vector.multi_reduction <add>, %72, %cst_26 [1] : vector<8x8xf32> to vector<8xf32>
    %74 = vector.shape_cast %73 : vector<8xf32> to vector<8x1xf32>
    %75 = tpu.reciprocal %74 {approx = true} : vector<8x1xf32> -> vector<8x1xf32>
    %76 = vector.broadcast %75 : vector<8x1xf32> to vector<8x8xf32>
    %77 = arith.mulf %72, %76 : vector<8x8xf32>
    %78 = arith.truncf %77 : vector<8x8xf32> to vector<8x8xbf16>
    %79 = vector.extract_strided_slice %39 {offsets = [0, 8], sizes = [8, 8], strides = [1, 1]} : vector<8x32xbf16> to vector<8x8xbf16>
    %cst_27 = arith.constant dense<0.000000e+00> : vector<8x8xf32>
    %80 = tpu.matmul %78, %79, %cst_27 {dimension_numbers = #tpu.dot_dimension_numbers<[1], [0], [0], [1], [0, 0, 1, 1], [], []>} : vector<8x8xbf16>, vector<8x8xbf16>, vector<8x8xf32> -> vector<8x8xf32>
    %c0_28 = arith.constant 0 : index
    %c8 = arith.constant 8 : index
    %81 = vector.load %arg15[%c0_28, %c8] : memref<8x32xf32, #tpu.memory_space<vmem>>, vector<8x8xf32>
    tpu.vector_store %arg15[%c0_28, %c8], %80 {strides = array<i32>} : memref<8x32xf32, #tpu.memory_space<vmem>>, vector<8x8xf32>,
    %82 = vector.extract_strided_slice %35 {offsets = [0, 16], sizes = [8, 8], strides = [1, 1]} : vector<8x32xbf16> to vector<8x8xbf16>
    %83 = vector.extract_strided_slice %37 {offsets = [0, 16], sizes = [8, 8], strides = [1, 1]} : vector<8x32xbf16> to vector<8x8xbf16>
    %cst_29 = arith.constant dense<0.000000e+00> : vector<8x8xf32>
    %84 = tpu.matmul %82, %83, %cst_29 {dimension_numbers = #tpu.dot_dimension_numbers<[1], [1], [0], [0], [0, 0, 1, 0], [], []>} : vector<8x8xbf16>, vector<8x8xbf16>, vector<8x8xf32> -> vector<8x8xf32>
    %85 = arith.addf %84, %45 : vector<8x8xf32>
    %cst_30 = arith.constant dense<0xFF800000> : vector<8xf32>
    %86 = vector.multi_reduction <maximumf>, %85, %cst_30 [1] : vector<8x8xf32> to vector<8xf32>
    %87 = vector.shape_cast %86 : vector<8xf32> to vector<8x1xf32>
    %88 = vector.broadcast %87 : vector<8x1xf32> to vector<8x8xf32>
    %89 = arith.subf %85, %88 : vector<8x8xf32>
    %90 = math.exp %89 : vector<8x8xf32>
    %cst_31 = arith.constant dense<0.000000e+00> : vector<8xf32>
    %91 = vector.multi_reduction <add>, %90, %cst_31 [1] : vector<8x8xf32> to vector<8xf32>
    %92 = vector.shape_cast %91 : vector<8xf32> to vector<8x1xf32>
    %93 = tpu.reciprocal %92 {approx = true} : vector<8x1xf32> -> vector<8x1xf32>
    %94 = vector.broadcast %93 : vector<8x1xf32> to vector<8x8xf32>
    %95 = arith.mulf %90, %94 : vector<8x8xf32>
    %96 = arith.truncf %95 : vector<8x8xf32> to vector<8x8xbf16>
    %97 = vector.extract_strided_slice %39 {offsets = [0, 16], sizes = [8, 8], strides = [1, 1]} : vector<8x32xbf16> to vector<8x8xbf16>
    %cst_32 = arith.constant dense<0.000000e+00> : vector<8x8xf32>
    %98 = tpu.matmul %96, %97, %cst_32 {dimension_numbers = #tpu.dot_dimension_numbers<[1], [0], [0], [1], [0, 0, 1, 1], [], []>} : vector<8x8xbf16>, vector<8x8xbf16>, vector<8x8xf32> -> vector<8x8xf32>
    %c0_33 = arith.constant 0 : index
    %c16 = arith.constant 16 : index
    %99 = vector.load %arg15[%c0_33, %c16] : memref<8x32xf32, #tpu.memory_space<vmem>>, vector<8x8xf32>
    tpu.vector_store %arg15[%c0_33, %c16], %98 {strides = array<i32>} : memref<8x32xf32, #tpu.memory_space<vmem>>, vector<8x8xf32>,
    %100 = vector.extract_strided_slice %35 {offsets = [0, 24], sizes = [8, 8], strides = [1, 1]} : vector<8x32xbf16> to vector<8x8xbf16>
    %101 = vector.extract_strided_slice %37 {offsets = [0, 24], sizes = [8, 8], strides = [1, 1]} : vector<8x32xbf16> to vector<8x8xbf16>
    %cst_34 = arith.constant dense<0.000000e+00> : vector<8x8xf32>
    %102 = tpu.matmul %100, %101, %cst_34 {dimension_numbers = #tpu.dot_dimension_numbers<[1], [1], [0], [0], [0, 0, 1, 0], [], []>} : vector<8x8xbf16>, vector<8x8xbf16>, vector<8x8xf32> -> vector<8x8xf32>
    %103 = arith.addf %102, %45 : vector<8x8xf32>
    %cst_35 = arith.constant dense<0xFF800000> : vector<8xf32>
    %104 = vector.multi_reduction <maximumf>, %103, %cst_35 [1] : vector<8x8xf32> to vector<8xf32>
    %105 = vector.shape_cast %104 : vector<8xf32> to vector<8x1xf32>
    %106 = vector.broadcast %105 : vector<8x1xf32> to vector<8x8xf32>
    %107 = arith.subf %103, %106 : vector<8x8xf32>
    %108 = math.exp %107 : vector<8x8xf32>
    %cst_36 = arith.constant dense<0.000000e+00> : vector<8xf32>
    %109 = vector.multi_reduction <add>, %108, %cst_36 [1] : vector<8x8xf32> to vector<8xf32>
    %110 = vector.shape_cast %109 : vector<8xf32> to vector<8x1xf32>
    %111 = tpu.reciprocal %110 {approx = true} : vector<8x1xf32> -> vector<8x1xf32>
    %112 = vector.broadcast %111 : vector<8x1xf32> to vector<8x8xf32>
    %113 = arith.mulf %108, %112 : vector<8x8xf32>
    %114 = arith.truncf %113 : vector<8x8xf32> to vector<8x8xbf16>
    %115 = vector.extract_strided_slice %39 {offsets = [0, 24], sizes = [8, 8], strides = [1, 1]} : vector<8x32xbf16> to vector<8x8xbf16>
    %cst_37 = arith.constant dense<0.000000e+00> : vector<8x8xf32>
    %116 = tpu.matmul %114, %115, %cst_37 {dimension_numbers = #tpu.dot_dimension_numbers<[1], [0], [0], [1], [0, 0, 1, 1], [], []>} : vector<8x8xbf16>, vector<8x8xbf16>, vector<8x8xf32> -> vector<8x8xf32>
    %c0_38 = arith.constant 0 : index
    %c24 = arith.constant 24 : index
    %117 = vector.load %arg15[%c0_38, %c24] : memref<8x32xf32, #tpu.memory_space<vmem>>, vector<8x8xf32>
    tpu.vector_store %arg15[%c0_38, %c24], %116 {strides = array<i32>} : memref<8x32xf32, #tpu.memory_space<vmem>>, vector<8x8xf32>,
    %c0_39 = arith.constant 0 : index
    %c0_40 = arith.constant 0 : index
    %118 = vector.load %arg15[%c0_39, %c0_40] : memref<8x32xf32, #tpu.memory_space<vmem>>, vector<8x32xf32>
    %119 = arith.truncf %118 : vector<8x32xf32> to vector<8x32xbf16>
    %c0_41 = arith.constant 0 : index
    %c0_42 = arith.constant 0 : index
    %120 = vector.load %arg6[%c0_41, %c0_42] : memref<32x32xbf16, #tpu.memory_space<vmem>>, vector<32x32xbf16>
    %cst_43 = arith.constant dense<0.000000e+00> : vector<8x32xf32>
    %121 = tpu.matmul %119, %120, %cst_43 {dimension_numbers = #tpu.dot_dimension_numbers<[1], [0], [0], [1], [0, 0, 1, 1], [], []>} : vector<8x32xbf16>, vector<32x32xbf16>, vector<8x32xf32> -> vector<8x32xf32>
    %c0_44 = arith.constant 0 : index
    %c0_45 = arith.constant 0 : index
    %122 = vector.load %arg7[%c0_44, %c0_45] : memref<1x32xf32, #tpu.memory_space<vmem>>, vector<1x32xf32>
    %123 = vector.broadcast %122 : vector<1x32xf32> to vector<8x32xf32>
    %124 = arith.addf %121, %123 : vector<8x32xf32>
    %125 = arith.addf %1, %124 : vector<8x32xf32>
    %c0_46 = arith.constant 0 : index
    %c0_47 = arith.constant 0 : index
    %126 = vector.load %arg8[%c0_46, %c0_47] : memref<1x32xf32, #tpu.memory_space<vmem>>, vector<1x32xf32>
    %c0_48 = arith.constant 0 : index
    %c0_49 = arith.constant 0 : index
    %127 = vector.load %arg9[%c0_48, %c0_49] : memref<1x32xf32, #tpu.memory_space<vmem>>, vector<1x32xf32>
    %cst_50 = arith.constant dense<0.000000e+00> : vector<8xf32>
    %128 = vector.multi_reduction <add>, %125, %cst_50 [1] : vector<8x32xf32> to vector<8xf32>
    %129 = vector.shape_cast %128 : vector<8xf32> to vector<8x1xf32>
    %cst_51 = arith.constant 3.200000e+01 : f32
    %130 = vector.broadcast %cst_51 : f32 to vector<8x1xf32>
    %131 = arith.divf %129, %130 : vector<8x1xf32>
    %132 = vector.broadcast %131 : vector<8x1xf32> to vector<8x32xf32>
    %133 = arith.subf %125, %132 : vector<8x32xf32>
    %134 = arith.mulf %133, %133 : vector<8x32xf32>
    %cst_52 = arith.constant dense<0.000000e+00> : vector<8xf32>
    %135 = vector.multi_reduction <add>, %134, %cst_52 [1] : vector<8x32xf32> to vector<8xf32>
    %136 = vector.shape_cast %135 : vector<8xf32> to vector<8x1xf32>
    %cst_53 = arith.constant 3.200000e+01 : f32
    %137 = vector.broadcast %cst_53 : f32 to vector<8x1xf32>
    %138 = arith.divf %136, %137 : vector<8x1xf32>
    %139 = vector.broadcast %131 : vector<8x1xf32> to vector<8x32xf32>
    %140 = arith.subf %125, %139 : vector<8x32xf32>
    %cst_54 = arith.constant 9.99999974E-6 : f32
    %141 = vector.broadcast %cst_54 : f32 to vector<8x1xf32>
    %142 = arith.addf %138, %141 : vector<8x1xf32>
    %143 = math.rsqrt %142 : vector<8x1xf32>
    %144 = vector.broadcast %143 : vector<8x1xf32> to vector<8x32xf32>
    %145 = arith.mulf %140, %144 : vector<8x32xf32>
    %146 = vector.broadcast %126 : vector<1x32xf32> to vector<8x32xf32>
    %147 = arith.mulf %145, %146 : vector<8x32xf32>
    %148 = vector.broadcast %127 : vector<1x32xf32> to vector<8x32xf32>
    %149 = arith.addf %147, %148 : vector<8x32xf32>
    %150 = arith.truncf %149 : vector<8x32xf32> to vector<8x32xbf16>
    %c0_55 = arith.constant 0 : index
    %c0_56 = arith.constant 0 : index
    %151 = vector.load %arg10[%c0_55, %c0_56] : memref<32x128xbf16, #tpu.memory_space<vmem>>, vector<32x128xbf16>
    %cst_57 = arith.constant dense<0.000000e+00> : vector<8x128xf32>
    %152 = tpu.matmul %150, %151, %cst_57 {dimension_numbers = #tpu.dot_dimension_numbers<[1], [0], [0], [1], [0, 0, 1, 1], [], []>} : vector<8x32xbf16>, vector<32x128xbf16>, vector<8x128xf32> -> vector<8x128xf32>
    %c0_58 = arith.constant 0 : index
    %c0_59 = arith.constant 0 : index
    %153 = vector.load %arg11[%c0_58, %c0_59] : memref<1x128xf32, #tpu.memory_space<vmem>>, vector<1x128xf32>
    %154 = vector.broadcast %153 : vector<1x128xf32> to vector<8x128xf32>
    %155 = arith.addf %152, %154 : vector<8x128xf32>
    %cst_60 = arith.constant 1.702000e+00 : f32
    %156 = vector.broadcast %cst_60 : f32 to vector<8x128xf32>
    %157 = arith.mulf %156, %155 : vector<8x128xf32>
    %158 = arith.negf %157 : vector<8x128xf32>
    %159 = math.exp %158 : vector<8x128xf32>
    %cst_61 = arith.constant 1.000000e+00 : f32
    %160 = vector.broadcast %cst_61 : f32 to vector<8x128xf32>
    %161 = arith.addf %160, %159 : vector<8x128xf32>
    %162 = arith.divf %160, %161 : vector<8x128xf32>
    %163 = arith.mulf %155, %162 : vector<8x128xf32>
    %164 = arith.truncf %163 : vector<8x128xf32> to vector<8x128xbf16>
    %c0_62 = arith.constant 0 : index
    %c0_63 = arith.constant 0 : index
    %165 = vector.load %arg12[%c0_62, %c0_63] : memref<128x32xbf16, #tpu.memory_space<vmem>>, vector<128x32xbf16>
    %cst_64 = arith.constant dense<0.000000e+00> : vector<8x32xf32>
    %166 = tpu.matmul %164, %165, %cst_64 {dimension_numbers = #tpu.dot_dimension_numbers<[1], [0], [0], [1], [0, 0, 1, 1], [], []>} : vector<8x128xbf16>, vector<128x32xbf16>, vector<8x32xf32> -> vector<8x32xf32>
    %c0_65 = arith.constant 0 : index
    %c0_66 = arith.constant 0 : index
    %167 = vector.load %arg13[%c0_65, %c0_66] : memref<1x32xf32, #tpu.memory_space<vmem>>, vector<1x32xf32>
    %168 = vector.broadcast %167 : vector<1x32xf32> to vector<8x32xf32>
    %169 = arith.addf %166, %168 : vector<8x32xf32>
    %170 = arith.addf %125, %169 : vector<8x32xf32>
    %c0_67 = arith.constant 0 : index
    %c0_68 = arith.constant 0 : index
    %c0_69 = arith.constant 0 : index
    %171 = vector.load %arg14[%c0_67, %c0_68, %c0_69] : memref<1x8x32xf32, #tpu.memory_space<vmem>>, vector<1x8x32xf32>
    %172 = vector.shape_cast %171 : vector<1x8x32xf32> to vector<8x32xf32>
    %173 = vector.shape_cast %170 : vector<8x32xf32> to vector<1x8x32xf32>
    tpu.vector_store %arg14[%c0_67, %c0_68, %c0_69], %173 {strides = array<i32>} : memref<1x8x32xf32, #tpu.memory_space<vmem>>, vector<1x8x32xf32>,
    return
  }
  func.func @transform_0(%arg0: i32) -> (i32, i32, i32) {
    %c0_i32 = arith.constant 0 : i32
    %c0_i32_0 = arith.constant 0 : i32
    %c0_i32_1 = arith.constant 0 : i32
    return %arg0, %c0_i32, %c0_i32_0 : i32, i32, i32
  }
  func.func @transform_1(%arg0: i32) -> (i32, i32) {
    %c0_i32 = arith.constant 0 : i32
    %c0_i32_0 = arith.constant 0 : i32
    %c0_i32_1 = arith.constant 0 : i32
    return %c0_i32, %c0_i32_0 : i32, i32
  }
  func.func @transform_2(%arg0: i32) -> (i32, i32) {
    %c0_i32 = arith.constant 0 : i32
    %c0_i32_0 = arith.constant 0 : i32
    %c0_i32_1 = arith.constant 0 : i32
    return %c0_i32, %c0_i32_0 : i32, i32
  }
  func.func @transform_3(%arg0: i32) -> (i32, i32) {
    %c0_i32 = arith.constant 0 : i32
    %c0_i32_0 = arith.constant 0 : i32
    %c0_i32_1 = arith.constant 0 : i32
    return %c0_i32, %c0_i32_0 : i32, i32
  }
  func.func @transform_4(%arg0: i32) -> (i32, i32) {
    %c0_i32 = arith.constant 0 : i32
    %c0_i32_0 = arith.constant 0 : i32
    %c0_i32_1 = arith.constant 0 : i32
    return %c0_i32, %c0_i32_0 : i32, i32
  }
  func.func @transform_5(%arg0: i32) -> (i32, i32) {
    %c0_i32 = arith.constant 0 : i32
    %c0_i32_0 = arith.constant 0 : i32
    %c0_i32_1 = arith.constant 0 : i32
    return %c0_i32, %c0_i32_0 : i32, i32
  }
  func.func @transform_6(%arg0: i32) -> (i32, i32) {
    %c0_i32 = arith.constant 0 : i32
    %c0_i32_0 = arith.constant 0 : i32
    %c0_i32_1 = arith.constant 0 : i32
    return %c0_i32, %c0_i32_0 : i32, i32
  }
  func.func @transform_7(%arg0: i32) -> (i32, i32) {
    %c0_i32 = arith.constant 0 : i32
    %c0_i32_0 = arith.constant 0 : i32
    %c0_i32_1 = arith.constant 0 : i32
    return %c0_i32, %c0_i32_0 : i32, i32
  }
  func.func @transform_8(%arg0: i32) -> (i32, i32) {
    %c0_i32 = arith.constant 0 : i32
    %c0_i32_0 = arith.constant 0 : i32
    %c0_i32_1 = arith.constant 0 : i32
    return %c0_i32, %c0_i32_0 : i32, i32
  }
  func.func @transform_9(%arg0: i32) -> (i32, i32) {
    %c0_i32 = arith.constant 0 : i32
    %c0_i32_0 = arith.constant 0 : i32
    %c0_i32_1 = arith.constant 0 : i32
    return %c0_i32, %c0_i32_0 : i32, i32
  }
  func.func @transform_10(%arg0: i32) -> (i32, i32) {
    %c0_i32 = arith.constant 0 : i32
    %c0_i32_0 = arith.constant 0 : i32
    %c0_i32_1 = arith.constant 0 : i32
    return %c0_i32, %c0_i32_0 : i32, i32
  }
  func.func @transform_11(%arg0: i32) -> (i32, i32) {
    %c0_i32 = arith.constant 0 : i32
    %c0_i32_0 = arith.constant 0 : i32
    %c0_i32_1 = arith.constant 0 : i32
    return %c0_i32, %c0_i32_0 : i32, i32
  }
  func.func @transform_12(%arg0: i32) -> (i32, i32) {
    %c0_i32 = arith.constant 0 : i32
    %c0_i32_0 = arith.constant 0 : i32
    %c0_i32_1 = arith.constant 0 : i32
    return %c0_i32, %c0_i32_0 : i32, i32
  }
  func.func @transform_13(%arg0: i32) -> (i32, i32, i32) {
    %c0_i32 = arith.constant 0 : i32
    %c0_i32_0 = arith.constant 0 : i32
    %c0_i32_1 = arith.constant 0 : i32
    return %arg0, %c0_i32, %c0_i32_0 : i32, i32, i32
  }
}

</mosaic_0001>

<bundles_post_ra>
// kernel: tpu_custom_call.1
= control target key start
LH: loop header
LB: loop body
LE: loop exit
PB: predicated region body
PF: predicated region fallthrough
CT: control target
= control target key end

     0   :  { %s2046_s0 = inlined_call_operand.vmem [shape: f32[2,8,32], index: 0, kind: input, shape index: {}]   ;;  %s2047_s1 = inlined_call_operand.vmem [shape: f32[1,32], index: 1, kind: input, shape index: {}]   ;;  %s2048_s2 = inlined_call_operand.vmem [shape: f32[1,32], index: 2, kind: input, shape index: {}]   ;;  %s2049_s3 = inlined_call_operand.vmem [shape: bf16[32,96], index: 3, kind: input, shape index: {}]   ;;  %s2050_s4 = inlined_call_operand.vmem [shape: f32[1,96], index: 4, kind: input, shape index: {}]   ;;  %s2051_s5 = inlined_call_operand.vmem [shape: bf16[32,32], index: 5, kind: input, shape index: {}]   ;;  %s2052_s6 = inlined_call_operand.vmem [shape: f32[1,32], index: 6, kind: input, shape index: {}]   ;;  %s2053_s7 = inlined_call_operand.vmem [shape: f32[1,32], index: 7, kind: input, shape index: {}]   ;;  %s2054_s8 = inlined_call_operand.vmem [shape: f32[1,32], index: 8, kind: input, shape index: {}]   ;;  %s2055_s9 = inlined_call_operand.vmem [shape: bf16[32,128], index: 9, kind: input, shape index: {}]   ;;  %s2056_s10 = inlined_call_operand.vmem [shape: f32[1,128], index: 10, kind: input, shape index: {}]   ;;  %s2057_s11 = inlined_call_operand.vmem [shape: bf16[128,32], index: 11, kind: input, shape index: {}]   ;;  %s2058_s12 = inlined_call_operand.vmem [shape: f32[1,32], index: 12, kind: input, shape index: {}]   ;;  %s2059_s13 = inlined_call_operand.hbm [shape: f32[2,8,32], index: 13, kind: output, shape index: {}]  }
   0x1   :  { %2060 = sst [smem:[#allocation6_spill]] %s2046_s0 }
   0x2   :  { %2061 = sst [smem:[#allocation7_spill]] %s2047_s1 }
   0x3   :  { %2062 = sst [smem:[#allocation8_spill]] %s2048_s2 }
   0x4   :  { %18 = vsyncpa [#allocation4], 0 }
   0x5   :  { %20 = vsyncpa [#allocation4 + $0x1], 0  ;;  %s1780_s25 = smov 0   ;;  %s1782_s26 = smov 0  }
   0x6   :  { %s1784_s27 = smov 0   ;;  %s1786_s28 = smov 0  }
   0x7 LB: > { %s1801_s29 = sadd.s32 4294967295, %s1691_s28   ;;  %s1366_s30 = sadd.s32 4294967294, %s1691_s28   ;;  %s1691_s28 = sphi %s1786_s28, %s2071_s28   ;;  %s1687_s27 = sphi %s1784_s27, %s2070_s27   ;;  %s1683_s26 = sphi %s1782_s26, %s2069_s26   ;;  %s1679_s25 = sphi %s1780_s25, %s2068_s25  }
   0x8   : > { %s1805_s14 = sadd.s32 1, %s1691_s28   ;;  %s311_s15 = sadd.s32 1, %s1687_s27 }
   0x9   : > { %s308_s16 = ssub.s32 %s1691_s28, %s1805_s14  ;;  %p321_p0 = scmp.ne.s32.totalorder %s1687_s27, %s1683_s26 }
   0xa   : > { %p309_p1 = scmp.eq.s32.totalorder %s308_s16, 0  ;;  %p322_p2 = scmp.eq.s32.totalorder %s1801_s29, 1 }
   0xb   : > { %p327_p3 = scmp.ne.s32.totalorder %s1683_s26, %s1679_s25  ;;  %p328_p4 = scmp.eq.s32.totalorder %s1366_s30, 1 }
   0xc   : > { %s1816_s17 = scalar_select %p309_p1, %s1687_s27, %s311_s15  }
   0xd   : > { %p1818_p5 = por %p322_p2, %p321_p0  ;;  %p1822_p6 = por %p328_p4, %p327_p3 }
   0xe   : > { %p1369_p7 = scmp.ge.s32.totalorder %s1691_s28, 1  ;;  %p389_p8 = scmp.lt.s32.totalorder %s1691_s28, 3 }
  0x10   : > { %p390_p9 = pnand %p1369_p7, %p389_p8 }
  0x11   : > { %p432_p10 = scmp.lt.s32.totalorder (!%p390_p9), %s1801_s29, 1  ;;  %vm440_vm0 = vcmask (!%p390_p9), 261120   ;;  %s2065_s0 = sld [smem:[#allocation6_spill]] (!%p390_p9)  ;;  %v1591_v7 = vld [vmem:[%s2049_s3] sm:$0xff] (!%p390_p9)   ;;  %v1693_v8 = vmov (!%p390_p9), 0.0   ;;  %vm1694_vm1 = vmmov (!%p390_p9), 0   ;;  %v539_v40 = vlaneseq (!%p390_p9) }
  0x12   : > { %393 = sbr.rel (%p390_p9) target bundleno = 2619 (0xa3b), region = 72  ;;  %1444 = vmatprep.subr.bf16.mxu0 (!%p390_p9), %v1693_v8  ;;  %1448 = vmatprep.mubr.msk.bf16.mxu0 (!%p390_p9), %vm1694_vm1, %v1693_v8  ;;  %v1592_v9 = vld [vmem:[%s2049_s3 + $0x8] sm:$0xff] (!%p390_p9)   ;;  %s2066_s1 = sld [smem:[#allocation7_spill]] (!%p390_p9)  ;;  %v1374_v20 = vld [vmem:[%s2050_s4] ss:$0 sm:$0xff] (!%p390_p9)  ;;  %vm548_vm2 = vcmask (!%p390_p9), 64512  }
  0x13   : > { %1445 = vmatpush3.bf16.msra.mxu0 (!%p390_p9), %v1591_v7  ;;  %1464 = vmatprep.subr.bf16.mxu1 (!%p390_p9), %v1693_v8  ;;  %s2067_s2 = sld [smem:[#allocation8_spill]] (!%p390_p9)  ;;  %s1695_s16 = smov (!%p390_p9), 96   ;;  %v540_v41 = vshrl.u32 (!%p390_p9), %v539_v40, 7  ;;  %v542_v42 = vand.u32 (!%p390_p9), 127, %v539_v40  ;;  %vm612_vm4 = vcmask (!%p390_p9), 1043456   ;;  %vm772_vm5 = vcmask (!%p390_p9), 130112  }
  0x14   : > { %1446 = vmatprep.subr.bf16.mxu0 (!%p390_p9), %v1693_v8  ;;  %1466 = vmatprep.mubr.msk.bf16.mxu1 (!%p390_p9), %vm1694_vm1, %v1693_v8  ;;  %s1698_s22 = smov (!%p390_p9), 80   ;;  %s1699_s23 = smov (!%p390_p9), 112   ;;  %vm888_vm6 = vcmask (!%p390_p9), 195712   ;;  %vm1004_vm7 = vcmask (!%p390_p9), 261312  }
  0x15   : > { %s1701_s30 = smov (!%p390_p9), 104   ;;  %vm543_vm3 = vcmp.gt.s32.totalorder (!%p390_p9), %v542_v42, %v540_v41  ;;  %s1702_s15 = smov (!%p390_p9), 64  }
  0x16   : > { %v544_v43 = vsel (!%p390_p9), %vm543_vm3, -1e+30, %v1693_v8 }
  0x17   : > { %1447 = vmatpush3.bf16.msra.mxu0 (!%p390_p9), %v1592_v9 }
  0x18   : > { %1452 = vmatprep.subr.bf16.mxu0 (!%p390_p9), %v1693_v8  ;;  %v1372_v14 = vld [vmem:[%s2066_s1] ss:$0 sm:$0xff] (!%p390_p9) }
  0x19   : > { %s433_s20 = scalar_select %p432_p10, %s1801_s29, 1  ;;  %v1373_v16 = vld [vmem:[%s2067_s2] ss:$0 sm:$0xff] }
  0x1b   : > { %s1371_s21 = sshll.u32 %s433_s20, 3  ;;  %s1696_s20 = smov 120  }
  0x1c   : > { %s435_s24 = scalar_lea.vmem %s2065_s0, %s1371_s21  ;;  %s1697_s21 = smov 88  }
  0x1d   : > { %v1833_v0 = vld [vmem:[%s435_s24] sm:$0xff]  ;;  %s1700_s24 = smov 72  }
  0x1e   : > { %v441_v1 = vsel %vm440_vm0, %v1833_v0, 0.0 }
  0x1f   : > { %442 = vadd.xlane.f32.xlu0 %v441_v1 }
  0xac   : > { %v443_v2 = vpop.xlane.xlu0 %442 }
  0xad   : > { %v445_v3 = vmul.f32 0.03125, %v443_v2 }
  0xaf   : > { %v446_v4 = vsub.f32 %v1833_v0, %v445_v3 }
  0xb1   : > { %v447_v5 = vmul.f32 %v446_v4, %v446_v4 }
  0xb3   : > { %v448_v6 = vsel %vm440_vm0, %v447_v5, 0.0 }
  0xb4   : > { %449 = vadd.xlane.f32.xlu0 %v448_v6 }
 0x141   : > { %v450_v10 = vpop.xlane.xlu0 %449 }
 0x142   : > { %v451_v11 = vmul.f32 0.03125, %v450_v10 }
 0x144   : > { %v452_v12 = vadd.f32 1e-05, %v451_v11 }
 0x146   : > { %1605 = vrsqrt.f32 %v452_v12 }
 0x150   : > { %v1606_v13 = vpop.eup %1605 }
 0x151   : > { %v454_v15 = vmul.f32 %v1606_v13, %v446_v4 }
 0x153   : > { %v461_v17 = vmul.f32 %v1372_v14, %v454_v15 }
 0x155   : > { %v468_v18 = vadd.f32 %v1373_v16, %v461_v17 }
 0x157   : > { %v469_v19 = vpack.c.bf16 %v468_v18, %v468_v18 }
 0x159   : > { %1449 = vmatmul.mubr.msk.bf16.vlgmr.msra.gmra.mrb[0].mxu0 %vm440_vm0, %v469_v19 }
 0x15a   : > { %1454 = vmatprep.mubr.msk.bf16.mxu0 %vm1694_vm1, %v1693_v8 }
 0x22c   : > { %v530_v21 = vpop.f32.mrb[0].mxu0 }
 0x22d   : > { %v531_v22 = vadd.f32 %v1374_v20, %v530_v21  ;;  %v1450_v23 = vpop.f32.mrb[1].mxu0 }
 0x22e   : > { %v533_v24 = vpop.f32.mrb[2].mxu0 }
 0x22f   : > { %v536_v25 = vmul.f32 0.35355338, %v531_v22  ;;  %v1865_v26 = vpack.c.bf16 %v531_v22, %v531_v22  ;;  %v1451_v27 = vpop.f32.mrb[3].mxu0 }
 0x231   : > { %v537_v28 = vpack.c.bf16 %v536_v25, %v536_v25  ;;  %546 = vrot.lane.b32.xlu1 %v1865_v26, %s1695_s16  ;;  %s1703_s16 = smov 56  }
 0x233   : > { %658 = vrot.lane.b32.xlu0 %v537_v28, %s1696_s20  ;;  %s1704_s20 = smov 48  }
 0x235   : > { %660 = vrot.lane.b32.xlu1 %v1865_v26, %s1697_s21  ;;  %s1705_s21 = smov 40  }
 0x239   : > { %776 = vrot.lane.b32.xlu1 %v1865_v26, %s1698_s22  ;;  %s1706_s22 = smov 8  }
 0x23d   : > { %774 = vrot.lane.b32.xlu1 %v537_v28, %s1699_s23 }
 0x241   : > { %892 = vrot.lane.b32.xlu1 %v1865_v26, %s1700_s24 }
 0x245   : > { %890 = vrot.lane.b32.xlu1 %v537_v28, %s1701_s30  ;;  %s429_s30 = sand.u32 1, %s1683_s26  }
 0x2a3   : > { %v547_v29 = vpop.permute.xlu1 %546 }
 0x2a4   : > { %v553_v30 = vsel %vm548_vm2, %v547_v29, 0 }
 0x2a5   : > { %1453 = vmatpush3.bf16.xpose.msra.mxu0 %v553_v30  ;;  %v659_v34 = vpop.permute.xlu0 %658 }
 0x2a6   : > { %1458 = vmatprep.subr.bf16.mxu0 %v1693_v8 }
 0x2a7   : > { %v661_v31 = vpop.permute.xlu1 %660 }
 0x2a8   : > { %v666_v32 = vsel %vm548_vm2, %v661_v31, 0 }
 0x2a9   : > { %1465 = vmatpush3.bf16.xpose.msra.mxu1 %v666_v32 }
 0x2aa   : > { %1476 = vmatprep.subr.bf16.mxu1 %v1693_v8 }
 0x2ab   : > { %v777_v33 = vpop.permute.xlu1 %776 }
 0x2ac   : > { %1455 = vmatmul.mubr.msk.bf16.vlgmr.msra.gmra.mrb[4].mxu0 %vm548_vm2, %v537_v28  ;;  %v782_v36 = vsel %vm548_vm2, %v777_v33, 0 }
 0x2ad   : > { %1460 = vmatprep.mubr.msk.bf16.mxu0 %vm1694_vm1, %v1693_v8 }
 0x2af   : > { %v775_v35 = vpop.permute.xlu1 %774 }
 0x2b0   : > { %1467 = vmatmul.mubr.msk.bf16.vlgmr.msra.gmra.mrb[0].mxu1 %vm548_vm2, %v659_v34 }
 0x2b1   : > { %1477 = vmatpush3.bf16.xpose.msra.mxu1 %v782_v36  ;;  %1478 = vmatprep.mubr.msk.bf16.mxu1 %vm1694_vm1, %v1693_v8 }
 0x2b2   : > { %1488 = vmatprep.subr.bf16.mxu1 %v1693_v8 }
 0x2b3   : > { %v893_v37 = vpop.permute.xlu1 %892 }
 0x2b4   : > { %v898_v38 = vsel %vm548_vm2, %v893_v37, 0 }
 0x2b7   : > { %v891_v39 = vpop.permute.xlu1 %890 }
 0x2b8   : > { %1479 = vmatmul.mubr.msk.bf16.vlgmr.msra.gmra.mrb[4].mxu1 %vm548_vm2, %v775_v35 }
 0x2b9   : > { %1489 = vmatpush3.bf16.xpose.msra.mxu1 %v898_v38  ;;  %1490 = vmatprep.mubr.msk.bf16.mxu1 %vm1694_vm1, %v1693_v8 }
 0x2ba   : > { %1500 = vmatprep.subr.bf16.mxu1 %v1693_v8 }
 0x2c0   : > { %1491 = vmatmul.mubr.msk.bf16.vlgmr.msra.gmra.mrb[8].mxu1 %vm548_vm2, %v891_v39 }
 0x2c1   : > { %1504 = vmatprep.mubr.msk.bf16.mxu1 %vm1694_vm1, %v1693_v8 }
 0x37f   : > { %v589_v44 = vpop.f32.mrb[4].mxu0 }
 0x380   : > { %v590_v45 = vadd.f32 %v589_v44, %v544_v43  ;;  %v1456_v46 = vpop.f32.mrb[5].mxu0 }
 0x381   : > { %v592_v47 = vpop.f32.mrb[6].mxu0 }
 0x382   : > { %v1457_v48 = vpop.f32.mrb[7].mxu0  ;;  %v595_v49 = vsel %vm548_vm2, %v590_v45, -inf }
 0x383   : > { %v702_v50 = vpop.f32.mrb[0].mxu1  ;;  %596 = vmax.xlane.f32.xlu1 %v595_v49 }
 0x384   : > { %v703_v51 = vadd.f32 %v702_v50, %v544_v43  ;;  %v1468_v52 = vpop.f32.mrb[1].mxu1 }
 0x385   : > { %v705_v53 = vpop.f32.mrb[2].mxu1 }
 0x386   : > { %v1469_v54 = vpop.f32.mrb[3].mxu1  ;;  %v708_v55 = vsel %vm548_vm2, %v703_v51, -inf }
 0x387   : > { %709 = vmax.xlane.f32.xlu0 %v708_v55 }
 0x38b   : > { %v818_v56 = vpop.f32.mrb[4].mxu1 }
 0x38c   : > { %v819_v57 = vadd.f32 %v818_v56, %v544_v43  ;;  %v1480_v58 = vpop.f32.mrb[5].mxu1 }
 0x38d   : > { %v821_v59 = vpop.f32.mrb[6].mxu1  ;;  %v1593_v58 = vld [vmem:[%s2051_s5] sm:$0xff]  }
 0x38e   : > { %v1481_v60 = vpop.f32.mrb[7].mxu1  ;;  %v824_v61 = vsel %vm548_vm2, %v819_v57, -inf  ;;  %1501 = vmatpush3.bf16.msra.mxu1 %v1593_v58  ;;  %v1594_v59 = vld [vmem:[%s2051_s5 + $0x8] sm:$0xff]  }
 0x38f   : > { %825 = vmax.xlane.f32.xlu1 %v824_v61  ;;  %1502 = vmatprep.subr.bf16.mxu1 %v1693_v8 }
 0x392   : > { %1503 = vmatpush3.bf16.msra.mxu1 %v1594_v59 }
 0x393   : > { %v934_v62 = vpop.f32.mrb[8].mxu1  ;;  %1516 = vmatprep.subr.bf16.mxu1 %v1693_v8 }
 0x394   : > { %v935_v63 = vadd.f32 %v934_v62, %v544_v43  ;;  %v1492_v1 = vpop.f32.mrb[9].mxu1 }
 0x395   : > { %v937_v2 = vpop.f32.mrb[10].mxu1 }
 0x396   : > { %v1493_v3 = vpop.f32.mrb[11].mxu1  ;;  %v940_v4 = vsel %vm548_vm2, %v935_v63, -inf }
 0x397   : > { %941 = vmax.xlane.f32.xlu0 %v940_v4 }
 0x410   : > { %v597_v5 = vpop.xlane.xlu1 %596 }
 0x411   : > { %v598_v6 = vsub.f32 %v590_v45, %v597_v5 }
 0x413   : > { %v599_v7 = vmul.f32 1.442695, %v598_v6 }
 0x414   : > { %v710_v9 = vpop.xlane.xlu0 %709 }
 0x415   : > { %1607 = vpow2.f32 %v599_v7  ;;  %v711_v10 = vsub.f32 %v703_v51, %v710_v9 }
 0x417   : > { %v712_v11 = vmul.f32 1.442695, %v711_v10 }
 0x419   : > { %1609 = vpow2.f32 %v712_v11  ;;  %v1386_v11 = vld [vmem:[%s2052_s6] ss:$0 sm:$0xff] }
 0x41c   : > { %v826_v21 = vpop.xlane.xlu1 %825 }
 0x41d   : > { %v827_v22 = vsub.f32 %v819_v57, %v826_v21 }
 0x41f   : > { %v1608_v12 = vpop.eup %1607  ;;  %v828_v23 = vmul.f32 1.442695, %v827_v22 }
 0x420   : > { %v601_v13 = vsel %vm548_vm2, %v1608_v12, 0.0 }
 0x421   : > { %602 = vadd.xlane.f32.xlu1 %v601_v13 }
 0x423   : > { %v1610_v14 = vpop.eup %1609 }
 0x424   : > { %v942_v15 = vpop.xlane.xlu0 %941  ;;  %v714_v16 = vsel %vm548_vm2, %v1610_v14, 0.0 }
 0x425   : > { %v943_v17 = vsub.f32 %v935_v63, %v942_v15  ;;  %715 = vadd.xlane.f32.xlu0 %v714_v16 }
 0x427   : > { %v944_v18 = vmul.f32 1.442695, %v943_v17 }
 0x429   : > { %1611 = vpow2.f32 %v944_v18 }
 0x42a   : > { %1613 = vpow2.f32 %v828_v23 }
 0x432   : > { %607 = vrot.lane.b32.xlu1 %v1865_v26, %s1702_s15  ;;  %s1370_s15 = sshll.u32 %s429_s30, 3 }
 0x433   : > { %v1612_v19 = vpop.eup %1611 }
 0x434   : > { %v946_v20 = vsel %vm548_vm2, %v1612_v19, 0.0  ;;  %v1614_v24 = vpop.eup %1613 }
 0x435   : > { %947 = vadd.xlane.f32.xlu0 %v946_v20  ;;  %v830_v25 = vsel %vm548_vm2, %v1614_v24, 0.0 }
 0x44b   : > { %720 = vrot.lane.b32.xlu0 %v1865_v26, %s1703_s16  ;;  %s1707_s16 = smov 16  }
 0x456   : > { %831 = vadd.xlane.f32.xlu1 %v830_v25 }
 0x467   : > { %836 = vrot.lane.b32.xlu1 %v1865_v26, %s1704_s20  ;;  %s1708_s20 = smov 24  }
 0x46b   : > { %952 = vrot.lane.b32.xlu1 %v1865_v26, %s1705_s21  ;;  %s1407_s21 = sshll.u32 %s1801_s29, 7  ;;  %s1294_s29 = scalar_lea.sflag [#allocation4], %s429_s30 }
 0x46c   : > { %s2003_s1 = scalar_lea.hbm %s2059_s13, %s1407_s21 }
 0x4ae   : > { %v603_v27 = vpop.xlane.xlu1 %602 }
 0x4af   : > { %1615 = vrcp.f32 %v603_v27 }
 0x4b2   : > { %v608_v28 = vpop.permute.xlu1 %607  ;;  %v716_v30 = vpop.xlane.xlu0 %715 }
 0x4b3   : > { %v614_v29 = vsel %vm612_vm4, %v608_v28, 0  ;;  %1617 = vrcp.f32 %v716_v30  ;;  %v1390_v30 = vld [vmem:[%s2053_s7] ss:$0 sm:$0xff] }
 0x4b4   : > { %1459 = vmatpush3.bf16.msra.mxu0 %v614_v29 }
 0x4b5   : > { %1470 = vmatprep.subr.bf16.mxu0 %v1693_v8 }
 0x4b9   : > { %v1616_v31 = vpop.eup %1615 }
 0x4ba   : > { %v605_v32 = vmul.f32 %v1616_v31, %v1608_v12 }
 0x4bc   : > { %v606_v33 = vpack.c.bf16 %v605_v32, %v605_v32  ;;  %v1391_v32 = vld [vmem:[%s2054_s8] ss:$0 sm:$0xff] }
 0x4bd   : > { %v1618_v26 = vpop.eup %1617 }
 0x4be   : > { %1461 = vmatmul.mubr.msk.bf16.vlgmr.msra.gmra.mrb[8].mxu0 %vm548_vm2, %v606_v33  ;;  %v718_v35 = vmul.f32 %v1618_v26, %v1610_v14 }
 0x4bf   : > { %1472 = vmatprep.mubr.msk.bf16.mxu0 %vm1694_vm1, %v1693_v8 }
 0x4c0   : > { %v719_v38 = vpack.c.bf16 %v718_v35, %v718_v35  ;;  %v1597_v35 = vld [vmem:[%s2057_s11] sm:$0xff]  }
 0x4c2   : > { %v948_v34 = vpop.xlane.xlu0 %947 }
 0x4c6   : > { %v721_v36 = vpop.permute.xlu0 %720 }
 0x4c7   : > { %v726_v37 = vsel %vm612_vm4, %v721_v36, 0  ;;  %v1598_v36 = vld [vmem:[%s2057_s11 + $0x8] sm:$0xff]  }
 0x4c8   : > { %1471 = vmatpush3.bf16.msra.mxu0 %v726_v37  ;;  %v1599_v37 = vld [vmem:[%s2057_s11 + $0x10] sm:$0xff]  }
 0x4c9   : > { %1482 = vmatprep.subr.bf16.mxu0 %v1693_v8 }
 0x4cb   : > { %1473 = vmatmul.mubr.msk.bf16.vlgmr.msra.gmra.mrb[12].mxu0 %vm548_vm2, %v719_v38  ;;  %v1600_v38 = vld [vmem:[%s2057_s11 + $0x18] sm:$0xff]  }
 0x4cc   : > { %1484 = vmatprep.mubr.msk.bf16.mxu0 %vm1694_vm1, %v1693_v8 }
 0x4e3   : > { %v832_v39 = vpop.xlane.xlu1 %831 }
 0x4e4   : > { %1619 = vrcp.f32 %v832_v39  ;;  %v1601_v39 = vld [vmem:[%s2057_s11 + $0x20] sm:$0xff]  }
 0x4e5   : > { %1621 = vrcp.f32 %v948_v34 }
 0x4e7   : > { %v837_v40 = vpop.permute.xlu1 %836 }
 0x4e8   : > { %v842_v41 = vsel %vm612_vm4, %v837_v40, 0  ;;  %v1602_v40 = vld [vmem:[%s2057_s11 + $0x28] sm:$0xff]  }
 0x4e9   : > { %1483 = vmatpush3.bf16.msra.mxu0 %v842_v41  ;;  %v1603_v41 = vld [vmem:[%s2057_s11 + $0x30] sm:$0xff]  }
 0x4ea   : > { %1494 = vmatprep.subr.bf16.mxu0 %v1693_v8 }
 0x4eb   : > { %v953_v44 = vpop.permute.xlu1 %952 }
 0x4ec   : > { %v958_v47 = vsel %vm612_vm4, %v953_v44, 0 }
 0x4ee   : > { %v1620_v42 = vpop.eup %1619 }
 0x4ef   : > { %v834_v43 = vmul.f32 %v1620_v42, %v1614_v24  ;;  %v1622_v46 = vpop.eup %1621  ;;  %v1595_v24 = vld [vmem:[%s2055_s9] sm:$0xff]   ;;  %v1604_v42 = vld [vmem:[%s2057_s11 + $0x38] sm:$0xff]  }
 0x4f0   : > { %v950_v48 = vmul.f32 %v1622_v46, %v1612_v19 }
 0x4f1   : > { %v835_v45 = vpack.c.bf16 %v834_v43, %v834_v43  ;;  %v1392_v43 = vld [vmem:[%s2056_s10] ss:$0 sm:$0xff] }
 0x4f2   : > { %v951_v49 = vpack.c.bf16 %v950_v48, %v950_v48 }
 0x4f3   : > { %1485 = vmatmul.mubr.msk.bf16.vlgmr.msra.gmra.mrb[16].mxu0 %vm548_vm2, %v835_v45 }
 0x4f4   : > { %1495 = vmatpush3.bf16.msra.mxu0 %v958_v47  ;;  %1496 = vmatprep.mubr.msk.bf16.mxu0 %vm1694_vm1, %v1693_v8 }
 0x4f5   : > { %1508 = vmatprep.subr.bf16.mxu0 %v1693_v8 }
 0x4fb   : > { %1497 = vmatmul.mubr.msk.bf16.vlgmr.msra.gmra.mrb[20].mxu0 %vm548_vm2, %v951_v49 }
 0x4fc   : > { %1512 = vmatprep.mubr.msk.bf16.mxu0 %vm1694_vm1, %v1693_v8  ;;  %1509 = vmatpush3.bf16.msra.mxu0 %v1595_v24 }
 0x4fd   : > { %1510 = vmatprep.subr.bf16.mxu0 %v1693_v8 }
 0x591   : > { %v650_v50 = vpop.f32.mrb[8].mxu0 }
 0x592   : > { %656 = vst.msk [vmem:[#allocation2] sm:$0xff] %vm548_vm2, %v650_v50  ;;  %v1462_v51 = vpop.f32.mrb[9].mxu0 }
 0x593   : > { %v653_v52 = vpop.f32.mrb[10].mxu0 }
 0x594   : > { %v1463_v53 = vpop.f32.mrb[11].mxu0 }
 0x59e   : > { %v762_v54 = vpop.f32.mrb[12].mxu0 }
 0x59f   : > { %769 = vrot.lane.b32.xlu0 %v762_v54, %s1706_s22  ;;  %v1474_v55 = vpop.f32.mrb[13].mxu0  ;;  %s431_s22 = scalar_lea.vmem [#allocation3], %s1370_s15 }
 0x5a0   : > { %v765_v56 = vpop.f32.mrb[14].mxu0  ;;  %v1397_v55 = vld [vmem:[%s2058_s12] ss:$0 sm:$0xff]  ;;  %s1307_s23 = sshll.u32 %s431_s22, 4  ;;  %s2005_s23 = int_to_ptr.vmem [resolvable:$true] %s1307_s23 }
 0x5a1   : > { %v1475_v57 = vpop.f32.mrb[15].mxu0  ;;  %s1629_s15 = scalar_lea.vmem %s2005_s23, 128 }
 0x5a2   : > { %p1630_p11 = scmp.ne.s32.totalorder %s2005_s23, %s1629_s15 }
 0x5a4   : > { %p1631_p12 = pnand %p1630_p11, %p1818_p5 }
 0x5a6   : > { %p1632_p13 = pneg %p1631_p12 }
 0x5c6   : > { %v878_v60 = vpop.f32.mrb[16].mxu0 }
 0x5c7   : > { %885 = vrot.lane.b32.xlu1 %v878_v60, %s1707_s16  ;;  %v1486_v61 = vpop.f32.mrb[17].mxu0  ;;  %s1709_s16 = smov [#allocation3]  }
 0x5c8   : > { %v881_v62 = vpop.f32.mrb[18].mxu0 }
 0x5c9   : > { %v1487_v63 = vpop.f32.mrb[19].mxu0 }
 0x5ce   : > { %v994_v1 = vpop.f32.mrb[20].mxu0 }
 0x5cf   : > { %1001 = vrot.lane.b32.xlu0 %v994_v1, %s1708_s20  ;;  %v1498_v2 = vpop.f32.mrb[21].mxu0  ;;  %s1633_s20 = sshll.u32 %s1709_s16, 4  ;;  %s1634_s20 = int_to_ptr.vmem [resolvable:$false] %s1633_s20 }
 0x5d0   : > { %v997_v3 = vpop.f32.mrb[22].mxu0  ;;  %s1635_s2 = scalar_lea.vmem %s1634_s20, 256  ;;  %p1636_p0 = scmp.lt.s32.totalorder %s2005_s23, %s1634_s20 }
 0x5d1   : > { %v1499_v4 = vpop.f32.mrb[23].mxu0  ;;  %p1637_p1 = scmp.lt.s32.totalorder %s1635_s2, %s1629_s15 }
 0x5d3   : > { %p1638_p2 = por %p1637_p1, %p1636_p0 }
 0x5d5   : > { %p1639_p3 = pnand %p1638_p2, %p1632_p13 }
 0x611   : > { %v770_v5 = vpop.permute.xlu0 %769 }
 0x612   : > { %773 = vst.msk [vmem:[#allocation2] sm:$0xff] %vm772_vm5, %v770_v5 }
 0x639   : > { %v886_v6 = vpop.permute.xlu1 %885 }
 0x63a   : > { %889 = vst.msk [vmem:[#allocation2] sm:$0xff] %vm888_vm6, %v886_v6 }
 0x641   : > { %v1002_v7 = vpop.permute.xlu0 %1001 }
 0x642   : > { %1005 = vst.msk [vmem:[#allocation2] sm:$0xff] %vm1004_vm7, %v1002_v7 }
 0x649   : > { %v1006_v9 = vld [vmem:[#allocation2] sm:$0xff] }
 0x64a   : > { %v1007_v10 = vpack.c.bf16 %v1006_v9, %v1006_v9 }
 0x64c   : > { %1505 = vmatmul.mubr.msk.bf16.vlgmr.msra.gmra.mrb[12].mxu1 %vm440_vm0, %v1007_v10 }
 0x64d   : > { %1532 = vmatprep.mubr.msk.bf16.mxu1 %vm1694_vm1, %v1693_v8  ;;  %1517 = vmatpush3.bf16.msra.mxu1 %v1597_v35 }
 0x64e   : > { %1518 = vmatprep.subr.bf16.mxu1 %v1693_v8 }
 0x651   : > { %1519 = vmatpush3.bf16.msra.mxu1 %v1598_v36 }
 0x652   : > { %1520 = vmatprep.subr.bf16.mxu1 %v1693_v8 }
 0x655   : > { %1521 = vmatpush3.bf16.msra.mxu1 %v1599_v37 }
 0x656   : > { %1522 = vmatprep.subr.bf16.mxu1 %v1693_v8 }
 0x659   : > { %1523 = vmatpush3.bf16.msra.mxu1 %v1600_v38 }
 0x65a   : > { %1524 = vmatprep.subr.bf16.mxu1 %v1693_v8 }
 0x65d   : > { %1525 = vmatpush3.bf16.msra.mxu1 %v1601_v39 }
 0x65e   : > { %1526 = vmatprep.subr.bf16.mxu1 %v1693_v8 }
 0x661   : > { %1527 = vmatpush3.bf16.msra.mxu1 %v1602_v40 }
 0x662   : > { %1528 = vmatprep.subr.bf16.mxu1 %v1693_v8 }
 0x665   : > { %1529 = vmatpush3.bf16.msra.mxu1 %v1603_v41 }
 0x666   : > { %1530 = vmatprep.subr.bf16.mxu1 %v1693_v8 }
 0x669   : > { %1531 = vmatpush3.bf16.msra.mxu1 %v1604_v42 }
 0x71f   : > { %v1068_v12 = vpop.f32.mrb[12].mxu1 }
 0x720   : > { %v1069_v13 = vadd.f32 %v1386_v11, %v1068_v12  ;;  %v1506_v14 = vpop.f32.mrb[13].mxu1 }
 0x721   : > { %v1071_v15 = vpop.f32.mrb[14].mxu1 }
 0x722   : > { %v1940_v16 = vadd.f32 %v1069_v13, %v1833_v0  ;;  %v1507_v17 = vpop.f32.mrb[15].mxu1  ;;  %v1596_v0 = vld [vmem:[%s2055_s9 + $0x8] sm:$0xff]  }
 0x723   : > { %1511 = vmatpush3.bf16.msra.mxu0 %v1596_v0 }
 0x724   : > { %v1077_v18 = vsel %vm440_vm0, %v1940_v16, 0.0 }
 0x725   : > { %1078 = vadd.xlane.f32.xlu1 %v1077_v18 }
 0x7b2   : > { %v1079_v19 = vpop.xlane.xlu1 %1078 }
 0x7b3   : > { %v1080_v20 = vmul.f32 0.03125, %v1079_v19 }
 0x7b5   : > { %v1081_v21 = vsub.f32 %v1940_v16, %v1080_v20 }
 0x7b7   : > { %v1082_v22 = vmul.f32 %v1081_v21, %v1081_v21 }
 0x7b9   : > { %v1083_v23 = vsel %vm440_vm0, %v1082_v22, 0.0 }
 0x7ba   : > { %1084 = vadd.xlane.f32.xlu0 %v1083_v23 }
 0x847   : > { %v1085_v25 = vpop.xlane.xlu0 %1084 }
 0x848   : > { %v1086_v27 = vmul.f32 0.03125, %v1085_v25 }
 0x84a   : > { %v1087_v28 = vadd.f32 1e-05, %v1086_v27 }
 0x84c   : > { %1623 = vrsqrt.f32 %v1087_v28 }
 0x856   : > { %v1624_v29 = vpop.eup %1623 }
 0x857   : > { %v1089_v31 = vmul.f32 %v1624_v29, %v1081_v21 }
 0x859   : > { %v1096_v33 = vmul.f32 %v1390_v30, %v1089_v31 }
 0x85b   : > { %v1103_v26 = vadd.f32 %v1391_v32, %v1096_v33 }
 0x85d   : > { %v1104_v34 = vpack.c.bf16 %v1103_v26, %v1103_v26 }
 0x85f   : > { %1513 = vmatmul.mubr.msk.bf16.vlgmr.msra.gmra.mrb[24].mxu0 %vm440_vm0, %v1104_v34 }
 0x932   : > { %v1165_v44 = vpop.f32.mrb[24].mxu0 }
 0x933   : > { %v1166_v45 = vadd.f32 %v1392_v43, %v1165_v44  ;;  %v1514_v46 = vpop.f32.mrb[25].mxu0 }
 0x934   : > { %v1168_v47 = vpop.f32.mrb[26].mxu0 }
 0x935   : > { %v1396_v48 = vmul.f32 -1.702, %v1166_v45  ;;  %v1515_v49 = vpop.f32.mrb[27].mxu0 }
 0x937   : > { %v1173_v50 = vmul.f32 1.442695, %v1396_v48 }
 0x939   : > { %1625 = vpow2.f32 %v1173_v50 }
 0x943   : > { %v1626_v8 = vpop.eup %1625 }
 0x944   : > { %v1175_v51 = vadd.f32 1.0, %v1626_v8 }
 0x946   : > { %1627 = vrcp.f32 %v1175_v51 }
 0x950   : > { %v1628_v52 = vpop.eup %1627 }
 0x951   : > { %v1178_v53 = vmul.f32 %v1628_v52, %v1166_v45 }
 0x953   : > { %v1179_v54 = vpack.c.bf16 %v1178_v53, %v1178_v53 }
 0x955   : > { %1533 = vmatmul.mubr.bf16.vlgmr.msra.gmra.mrb[16].mxu1 %v1179_v54 }
 0xa28   : > { %v1285_v56 = vpop.f32.mrb[16].mxu1 }
 0xa29   : > { %v1286_v57 = vadd.f32 %v1397_v55, %v1285_v56  ;;  %v1534_v58 = vpop.f32.mrb[17].mxu1 }
 0xa2a   : > { %v1288_v59 = vpop.f32.mrb[18].mxu1 }
 0xa2b   : > { %v1291_v60 = vadd.f32 %v1286_v57, %v1940_v16  ;;  %v1535_v61 = vpop.f32.mrb[19].mxu1 }
 0xa2d   : > { %1292 = vst.msk [vmem:[%s431_s22] sm:$0xff] %vm440_vm0, %v1291_v60 }
 0xa2e   : > { %1642 = shalt.err (!%p1639_p3)
}
 0xa2f   : > { %s1643_s0 = scalar_lea.hbm %s2003_s1, 128  ;;  %s1647_s22 = scalar_lea.hbm %s2059_s13, 256 }
 0xa30   : > { %p1644_p4 = scmp.ne.s32.totalorder %s2003_s1, %s1643_s0  ;;  %p1648_p9 = scmp.lt.u32.totalorder %s2003_s1, %s2059_s13 }
 0xa31   : > { %p1649_p10 = scmp.lt.u32.totalorder %s1647_s22, %s1643_s0  ;;  %p1651_p12 = scmp.lt.u32.totalorder %s1643_s0, %s2003_s1 }
 0xa32   : > { %p1645_p7 = pnand %p1644_p4, %p1818_p5 }
 0xa33   : > { %p1650_p11 = por %p1649_p10, %p1648_p9 }
 0xa34   : > { %p1646_p8 = pneg %p1645_p7 }
 0xa35   : > { %p1652_p13 = por %p1651_p12, %p1650_p11 }
 0xa37   : > { %p1653_p0 = pnand %p1652_p13, %p1646_p8 }
 0xa39   : > { %1656 = shalt.err (!%p1653_p0)
}
 0xa3a   : > { %1536 = dma.vmem_to_hbm [thread:$0]  (%p1818_p5), %s2005_s23, 128, %s2003_s1, %s1294_s29  }
 0xa3b PF: > { %p1542_p1 = scmp.ge.s32.totalorder %s1691_s28, 2  ;;  %s1319_s2 = sand.u32 1, %s1679_s25  }
 0xa3c   : > { %s1320_s15 = scalar_lea.sflag [#allocation4], %s1319_s2 }
 0xa3d   : > { %p1539_p2 = pnand %p1542_p1, %p1822_p6 }
 0xa3f   : > { %1674 = dma.done.wait (!%p1539_p2), %s1320_s15, 128  }
 0xa40   : > { %1676 = vsyncadd (!%p1539_p2), %s1320_s15, 4294967168  ;;  %p23_p3 = scmp.ge.s32.totalorder %s1805_s14, 4   ;;  %s2068_s25 = smov %s1683_s26 }
 0xa41   : > { %s2069_s26 = smov %s1687_s27  ;;  %s2070_s27 = smov %s1816_s17 }
 0xa42   : > { %s2071_s28 = smov %s1805_s14  ;;  %25 = sbr.rel (!%p23_p3) target bundleno = 7 (0x7), region = 107 }
 0xa49   :  { %1325 = vsyncpa [#allocation4], 1 }
 0xa4a   :  { %1327 = vsyncpa [#allocation4 + $0x1], 1 }

// kernel: tpu_custom_call.1
= control target key start
LH: loop header
LB: loop body
LE: loop exit
PB: predicated region body
PF: predicated region fallthrough
CT: control target
= control target key end

     0   :  { %s2046_s0 = inlined_call_operand.vmem [shape: f32[2,8,32], index: 0, kind: input, shape index: {}]   ;;  %s2047_s1 = inlined_call_operand.vmem [shape: f32[1,32], index: 1, kind: input, shape index: {}]   ;;  %s2048_s2 = inlined_call_operand.vmem [shape: f32[1,32], index: 2, kind: input, shape index: {}]   ;;  %s2049_s3 = inlined_call_operand.vmem [shape: bf16[32,96], index: 3, kind: input, shape index: {}]   ;;  %s2050_s4 = inlined_call_operand.vmem [shape: f32[1,96], index: 4, kind: input, shape index: {}]   ;;  %s2051_s5 = inlined_call_operand.vmem [shape: bf16[32,32], index: 5, kind: input, shape index: {}]   ;;  %s2052_s6 = inlined_call_operand.vmem [shape: f32[1,32], index: 6, kind: input, shape index: {}]   ;;  %s2053_s7 = inlined_call_operand.vmem [shape: f32[1,32], index: 7, kind: input, shape index: {}]   ;;  %s2054_s8 = inlined_call_operand.vmem [shape: f32[1,32], index: 8, kind: input, shape index: {}]   ;;  %s2055_s9 = inlined_call_operand.vmem [shape: bf16[32,128], index: 9, kind: input, shape index: {}]   ;;  %s2056_s10 = inlined_call_operand.vmem [shape: f32[1,128], index: 10, kind: input, shape index: {}]   ;;  %s2057_s11 = inlined_call_operand.vmem [shape: bf16[128,32], index: 11, kind: input, shape index: {}]   ;;  %s2058_s12 = inlined_call_operand.vmem [shape: f32[1,32], index: 12, kind: input, shape index: {}]   ;;  %s2059_s13 = inlined_call_operand.hbm [shape: f32[2,8,32], index: 13, kind: output, shape index: {}]  }
   0x1   :  { %2060 = sst [smem:[#allocation6_spill]] %s2046_s0 }
   0x2   :  { %2061 = sst [smem:[#allocation7_spill]] %s2047_s1 }
   0x3   :  { %2062 = sst [smem:[#allocation8_spill]] %s2048_s2 }
   0x4   :  { %18 = vsyncpa [#allocation4], 0 }
   0x5   :  { %20 = vsyncpa [#allocation4 + $0x1], 0  ;;  %s1780_s25 = smov 0   ;;  %s1782_s26 = smov 0  }
   0x6   :  { %s1784_s27 = smov 0   ;;  %s1786_s28 = smov 0  }
   0x7 LB: > { %s1801_s29 = sadd.s32 4294967295, %s1691_s28   ;;  %s1366_s30 = sadd.s32 4294967294, %s1691_s28   ;;  %s1691_s28 = sphi %s1786_s28, %s2071_s28   ;;  %s1687_s27 = sphi %s1784_s27, %s2070_s27   ;;  %s1683_s26 = sphi %s1782_s26, %s2069_s26   ;;  %s1679_s25 = sphi %s1780_s25, %s2068_s25  }
   0x8   : > { %s1805_s14 = sadd.s32 1, %s1691_s28   ;;  %s311_s15 = sadd.s32 1, %s1687_s27 }
   0x9   : > { %s308_s16 = ssub.s32 %s1691_s28, %s1805_s14  ;;  %p321_p0 = scmp.ne.s32.totalorder %s1687_s27, %s1683_s26 }
   0xa   : > { %p309_p1 = scmp.eq.s32.totalorder %s308_s16, 0  ;;  %p322_p2 = scmp.eq.s32.totalorder %s1801_s29, 1 }
   0xb   : > { %p327_p3 = scmp.ne.s32.totalorder %s1683_s26, %s1679_s25  ;;  %p328_p4 = scmp.eq.s32.totalorder %s1366_s30, 1 }
   0xc   : > { %s1816_s17 = scalar_select %p309_p1, %s1687_s27, %s311_s15  }
   0xd   : > { %p1818_p5 = por %p322_p2, %p321_p0  ;;  %p1822_p6 = por %p328_p4, %p327_p3 }
   0xe   : > { %p1369_p7 = scmp.ge.s32.totalorder %s1691_s28, 1  ;;  %p389_p8 = scmp.lt.s32.totalorder %s1691_s28, 3 }
  0x10   : > { %p390_p9 = pnand %p1369_p7, %p389_p8 }
  0x11   : > { %p432_p10 = scmp.lt.s32.totalorder (!%p390_p9), %s1801_s29, 1  ;;  %vm440_vm0 = vcmask (!%p390_p9), 261120   ;;  %s2065_s0 = sld [smem:[#allocation6_spill]] (!%p390_p9)  ;;  %v1591_v7 = vld [vmem:[%s2049_s3] sm:$0xff] (!%p390_p9)   ;;  %v1693_v8 = vmov (!%p390_p9), 0.0   ;;  %vm1694_vm1 = vmmov (!%p390_p9), 0   ;;  %v539_v40 = vlaneseq (!%p390_p9) }
  0x12   : > { %393 = sbr.rel (%p390_p9) target bundleno = 2619 (0xa3b), region = 72  ;;  %1444 = vmatprep.subr.bf16.mxu0 (!%p390_p9), %v1693_v8  ;;  %1448 = vmatprep.mubr.msk.bf16.mxu0 (!%p390_p9), %vm1694_vm1, %v1693_v8  ;;  %v1592_v9 = vld [vmem:[%s2049_s3 + $0x8] sm:$0xff] (!%p390_p9)   ;;  %s2066_s1 = sld [smem:[#allocation7_spill]] (!%p390_p9)  ;;  %v1374_v20 = vld [vmem:[%s2050_s4] ss:$0 sm:$0xff] (!%p390_p9)  ;;  %vm548_vm2 = vcmask (!%p390_p9), 64512  }
  0x13   : > { %1445 = vmatpush3.bf16.msra.mxu0 (!%p390_p9), %v1591_v7  ;;  %1464 = vmatprep.subr.bf16.mxu1 (!%p390_p9), %v1693_v8  ;;  %s2067_s2 = sld [smem:[#allocation8_spill]] (!%p390_p9)  ;;  %s1695_s16 = smov (!%p390_p9), 96   ;;  %v540_v41 = vshrl.u32 (!%p390_p9), %v539_v40, 7  ;;  %v542_v42 = vand.u32 (!%p390_p9), 127, %v539_v40  ;;  %vm612_vm4 = vcmask (!%p390_p9), 1043456   ;;  %vm772_vm5 = vcmask (!%p390_p9), 130112  }
  0x14   : > { %1446 = vmatprep.subr.bf16.mxu0 (!%p390_p9), %v1693_v8  ;;  %1466 = vmatprep.mubr.msk.bf16.mxu1 (!%p390_p9), %vm1694_vm1, %v1693_v8  ;;  %s1698_s22 = smov (!%p390_p9), 80   ;;  %s1699_s23 = smov (!%p390_p9), 112   ;;  %vm888_vm6 = vcmask (!%p390_p9), 195712   ;;  %vm1004_vm7 = vcmask (!%p390_p9), 261312  }
  0x15   : > { %s1701_s30 = smov (!%p390_p9), 104   ;;  %vm543_vm3 = vcmp.gt.s32.totalorder (!%p390_p9), %v542_v42, %v540_v41  ;;  %s1702_s15 = smov (!%p390_p9), 64  }
  0x16   : > { %v544_v43 = vsel (!%p390_p9), %vm543_vm3, -1e+30, %v1693_v8 }
  0x17   : > { %1447 = vmatpush3.bf16.msra.mxu0 (!%p390_p9), %v1592_v9 }
  0x18   : > { %1452 = vmatprep.subr.bf16.mxu0 (!%p390_p9), %v1693_v8  ;;  %v1372_v14 = vld [vmem:[%s2066_s1] ss:$0 sm:$0xff] (!%p390_p9) }
  0x19   : > { %s433_s20 = scalar_select %p432_p10, %s1801_s29, 1  ;;  %v1373_v16 = vld [vmem:[%s2067_s2] ss:$0 sm:$0xff] }
  0x1b   : > { %s1371_s21 = sshll.u32 %s433_s20, 3  ;;  %s1696_s20 = smov 120  }
  0x1c   : > { %s435_s24 = scalar_lea.vmem %s2065_s0, %s1371_s21  ;;  %s1697_s21 = smov 88  }
  0x1d   : > { %v1833_v0 = vld [vmem:[%s435_s24] sm:$0xff]  ;;  %s1700_s24 = smov 72  }
  0x1e   : > { %v441_v1 = vsel %vm440_vm0, %v1833_v0, 0.0 }
  0x1f   : > { %442 = vadd.xlane.f32.xlu0 %v441_v1 }
  0xac   : > { %v443_v2 = vpop.xlane.xlu0 %442 }
  0xad   : > { %v445_v3 = vmul.f32 0.03125, %v443_v2 }
  0xaf   : > { %v446_v4 = vsub.f32 %v1833_v0, %v445_v3 }
  0xb1   : > { %v447_v5 = vmul.f32 %v446_v4, %v446_v4 }
  0xb3   : > { %v448_v6 = vsel %vm440_vm0, %v447_v5, 0.0 }
  0xb4   : > { %449 = vadd.xlane.f32.xlu0 %v448_v6 }
 0x141   : > { %v450_v10 = vpop.xlane.xlu0 %449 }
 0x142   : > { %v451_v11 = vmul.f32 0.03125, %v450_v10 }
 0x144   : > { %v452_v12 = vadd.f32 1e-05, %v451_v11 }
 0x146   : > { %1605 = vrsqrt.f32 %v452_v12 }
 0x150   : > { %v1606_v13 = vpop.eup %1605 }
 0x151   : > { %v454_v15 = vmul.f32 %v1606_v13, %v446_v4 }
 0x153   : > { %v461_v17 = vmul.f32 %v1372_v14, %v454_v15 }
 0x155   : > { %v468_v18 = vadd.f32 %v1373_v16, %v461_v17 }
 0x157   : > { %v469_v19 = vpack.c.bf16 %v468_v18, %v468_v18 }
 0x159   : > { %1449 = vmatmul.mubr.msk.bf16.vlgmr.msra.gmra.mrb[0].mxu0 %vm440_vm0, %v469_v19 }
 0x15a   : > { %1454 = vmatprep.mubr.msk.bf16.mxu0 %vm1694_vm1, %v1693_v8 }
 0x22c   : > { %v530_v21 = vpop.f32.mrb[0].mxu0 }
 0x22d   : > { %v531_v22 = vadd.f32 %v1374_v20, %v530_v21  ;;  %v1450_v23 = vpop.f32.mrb[1].mxu0 }
 0x22e   : > { %v533_v24 = vpop.f32.mrb[2].mxu0 }
 0x22f   : > { %v536_v25 = vmul.f32 0.35355338, %v531_v22  ;;  %v1865_v26 = vpack.c.bf16 %v531_v22, %v531_v22  ;;  %v1451_v27 = vpop.f32.mrb[3].mxu0 }
 0x231   : > { %v537_v28 = vpack.c.bf16 %v536_v25, %v536_v25  ;;  %546 = vrot.lane.b32.xlu1 %v1865_v26, %s1695_s16  ;;  %s1703_s16 = smov 56  }
 0x233   : > { %658 = vrot.lane.b32.xlu0 %v537_v28, %s1696_s20  ;;  %s1704_s20 = smov 48  }
 0x235   : > { %660 = vrot.lane.b32.xlu1 %v1865_v26, %s1697_s21  ;;  %s1705_s21 = smov 40  }
 0x239   : > { %776 = vrot.lane.b32.xlu1 %v1865_v26, %s1698_s22  ;;  %s1706_s22 = smov 8  }
 0x23d   : > { %774 = vrot.lane.b32.xlu1 %v537_v28, %s1699_s23 }
 0x241   : > { %892 = vrot.lane.b32.xlu1 %v1865_v26, %s1700_s24 }
 0x245   : > { %890 = vrot.lane.b32.xlu1 %v537_v28, %s1701_s30  ;;  %s429_s30 = sand.u32 1, %s1683_s26  }
 0x2a3   : > { %v547_v29 = vpop.permute.xlu1 %546 }
 0x2a4   : > { %v553_v30 = vsel %vm548_vm2, %v547_v29, 0 }
 0x2a5   : > { %1453 = vmatpush3.bf16.xpose.msra.mxu0 %v553_v30  ;;  %v659_v34 = vpop.permute.xlu0 %658 }
 0x2a6   : > { %1458 = vmatprep.subr.bf16.mxu0 %v1693_v8 }
 0x2a7   : > { %v661_v31 = vpop.permute.xlu1 %660 }
 0x2a8   : > { %v666_v32 = vsel %vm548_vm2, %v661_v31, 0 }
 0x2a9   : > { %1465 = vmatpush3.bf16.xpose.msra.mxu1 %v666_v32 }
 0x2aa   : > { %1476 = vmatprep.subr.bf16.mxu1 %v1693_v8 }
 0x2ab   : > { %v777_v33 = vpop.permute.xlu1 %776 }
 0x2ac   : > { %1455 = vmatmul.mubr.msk.bf16.vlgmr.msra.gmra.mrb[4].mxu0 %vm548_vm2, %v537_v28  ;;  %v782_v36 = vsel %vm548_vm2, %v777_v33, 0 }
 0x2ad   : > { %1460 = vmatprep.mubr.msk.bf16.mxu0 %vm1694_vm1, %v1693_v8 }
 0x2af   : > { %v775_v35 = vpop.permute.xlu1 %774 }
 0x2b0   : > { %1467 = vmatmul.mubr.msk.bf16.vlgmr.msra.gmra.mrb[0].mxu1 %vm548_vm2, %v659_v34 }
 0x2b1   : > { %1477 = vmatpush3.bf16.xpose.msra.mxu1 %v782_v36  ;;  %1478 = vmatprep.mubr.msk.bf16.mxu1 %vm1694_vm1, %v1693_v8 }
 0x2b2   : > { %1488 = vmatprep.subr.bf16.mxu1 %v1693_v8 }
 0x2b3   : > { %v893_v37 = vpop.permute.xlu1 %892 }
 0x2b4   : > { %v898_v38 = vsel %vm548_vm2, %v893_v37, 0 }
 0x2b7   : > { %v891_v39 = vpop.permute.xlu1 %890 }
 0x2b8   : > { %1479 = vmatmul.mubr.msk.bf16.vlgmr.msra.gmra.mrb[4].mxu1 %vm548_vm2, %v775_v35 }
 0x2b9   : > { %1489 = vmatpush3.bf16.xpose.msra.mxu1 %v898_v38  ;;  %1490 = vmatprep.mubr.msk.bf16.mxu1 %vm1694_vm1, %v1693_v8 }
 0x2ba   : > { %1500 = vmatprep.subr.bf16.mxu1 %v1693_v8 }
 0x2c0   : > { %1491 = vmatmul.mubr.msk.bf16.vlgmr.msra.gmra.mrb[8].mxu1 %vm548_vm2, %v891_v39 }
 0x2c1   : > { %1504 = vmatprep.mubr.msk.bf16.mxu1 %vm1694_vm1, %v1693_v8 }
 0x37f   : > { %v589_v44 = vpop.f32.mrb[4].mxu0 }
 0x380   : > { %v590_v45 = vadd.f32 %v589_v44, %v544_v43  ;;  %v1456_v46 = vpop.f32.mrb[5].mxu0 }
 0x381   : > { %v592_v47 = vpop.f32.mrb[6].mxu0 }
 0x382   : > { %v1457_v48 = vpop.f32.mrb[7].mxu0  ;;  %v595_v49 = vsel %vm548_vm2, %v590_v45, -inf }
 0x383   : > { %v702_v50 = vpop.f32.mrb[0].mxu1  ;;  %596 = vmax.xlane.f32.xlu1 %v595_v49 }
 0x384   : > { %v703_v51 = vadd.f32 %v702_v50, %v544_v43  ;;  %v1468_v52 = vpop.f32.mrb[1].mxu1 }
 0x385   : > { %v705_v53 = vpop.f32.mrb[2].mxu1 }
 0x386   : > { %v1469_v54 = vpop.f32.mrb[3].mxu1  ;;  %v708_v55 = vsel %vm548_vm2, %v703_v51, -inf }
 0x387   : > { %709 = vmax.xlane.f32.xlu0 %v708_v55 }
 0x38b   : > { %v818_v56 = vpop.f32.mrb[4].mxu1 }
 0x38c   : > { %v819_v57 = vadd.f32 %v818_v56, %v544_v43  ;;  %v1480_v58 = vpop.f32.mrb[5].mxu1 }
 0x38d   : > { %v821_v59 = vpop.f32.mrb[6].mxu1  ;;  %v1593_v58 = vld [vmem:[%s2051_s5] sm:$0xff]  }
 0x38e   : > { %v1481_v60 = vpop.f32.mrb[7].mxu1  ;;  %v824_v61 = vsel %vm548_vm2, %v819_v57, -inf  ;;  %1501 = vmatpush3.bf16.msra.mxu1 %v1593_v58  ;;  %v1594_v59 = vld [vmem:[%s2051_s5 + $0x8] sm:$0xff]  }
 0x38f   : > { %825 = vmax.xlane.f32.xlu1 %v824_v61  ;;  %1502 = vmatprep.subr.bf16.mxu1 %v1693_v8 }
 0x392   : > { %1503 = vmatpush3.bf16.msra.mxu1 %v1594_v59 }
 0x393   : > { %v934_v62 = vpop.f32.mrb[8].mxu1  ;;  %1516 = vmatprep.subr.bf16.mxu1 %v1693_v8 }
 0x394   : > { %v935_v63 = vadd.f32 %v934_v62, %v544_v43  ;;  %v1492_v1 = vpop.f32.mrb[9].mxu1 }
 0x395   : > { %v937_v2 = vpop.f32.mrb[10].mxu1 }
 0x396   : > { %v1493_v3 = vpop.f32.mrb[11].mxu1  ;;  %v940_v4 = vsel %vm548_vm2, %v935_v63, -inf }
 0x397   : > { %941 = vmax.xlane.f32.xlu0 %v940_v4 }
 0x410   : > { %v597_v5 = vpop.xlane.xlu1 %596 }
 0x411   : > { %v598_v6 = vsub.f32 %v590_v45, %v597_v5 }
 0x413   : > { %v599_v7 = vmul.f32 1.442695, %v598_v6 }
 0x414   : > { %v710_v9 = vpop.xlane.xlu0 %709 }
 0x415   : > { %1607 = vpow2.f32 %v599_v7  ;;  %v711_v10 = vsub.f32 %v703_v51, %v710_v9 }
 0x417   : > { %v712_v11 = vmul.f32 1.442695, %v711_v10 }
 0x419   : > { %1609 = vpow2.f32 %v712_v11  ;;  %v1386_v11 = vld [vmem:[%s2052_s6] ss:$0 sm:$0xff] }
 0x41c   : > { %v826_v21 = vpop.xlane.xlu1 %825 }
 0x41d   : > { %v827_v22 = vsub.f32 %v819_v57, %v826_v21 }
 0x41f   : > { %v1608_v12 = vpop.eup %1607  ;;  %v828_v23 = vmul.f32 1.442695, %v827_v22 }
 0x420   : > { %v601_v13 = vsel %vm548_vm2, %v1608_v12, 0.0 }
 0x421   : > { %602 = vadd.xlane.f32.xlu1 %v601_v13 }
 0x423   : > { %v1610_v14 = vpop.eup %1609 }
 0x424   : > { %v942_v15 = vpop.xlane.xlu0 %941  ;;  %v714_v16 = vsel %vm548_vm2, %v1610_v14, 0.0 }
 0x425   : > { %v943_v17 = vsub.f32 %v935_v63, %v942_v15  ;;  %715 = vadd.xlane.f32.xlu0 %v714_v16 }
 0x427   : > { %v944_v18 = vmul.f32 1.442695, %v943_v17 }
 0x429   : > { %1611 = vpow2.f32 %v944_v18 }
 0x42a   : > { %1613 = vpow2.f32 %v828_v23 }
 0x432   : > { %607 = vrot.lane.b32.xlu1 %v1865_v26, %s1702_s15  ;;  %s1370_s15 = sshll.u32 %s429_s30, 3 }
 0x433   : > { %v1612_v19 = vpop.eup %1611 }
 0x434   : > { %v946_v20 = vsel %vm548_vm2, %v1612_v19, 0.0  ;;  %v1614_v24 = vpop.eup %1613 }
 0x435   : > { %947 = vadd.xlane.f32.xlu0 %v946_v20  ;;  %v830_v25 = vsel %vm548_vm2, %v1614_v24, 0.0 }
 0x44b   : > { %720 = vrot.lane.b32.xlu0 %v1865_v26, %s1703_s16  ;;  %s1707_s16 = smov 16  }
 0x456   : > { %831 = vadd.xlane.f32.xlu1 %v830_v25 }
 0x467   : > { %836 = vrot.lane.b32.xlu1 %v1865_v26, %s1704_s20  ;;  %s1708_s20 = smov 24  }
 0x46b   : > { %952 = vrot.lane.b32.xlu1 %v1865_v26, %s1705_s21  ;;  %s1407_s21 = sshll.u32 %s1801_s29, 7  ;;  %s1294_s29 = scalar_lea.sflag [#allocation4], %s429_s30 }
 0x46c   : > { %s2003_s1 = scalar_lea.hbm %s2059_s13, %s1407_s21 }
 0x4ae   : > { %v603_v27 = vpop.xlane.xlu1 %602 }
 0x4af   : > { %1615 = vrcp.f32 %v603_v27 }
 0x4b2   : > { %v608_v28 = vpop.permute.xlu1 %607  ;;  %v716_v30 = vpop.xlane.xlu0 %715 }
 0x4b3   : > { %v614_v29 = vsel %vm612_vm4, %v608_v28, 0  ;;  %1617 = vrcp.f32 %v716_v30  ;;  %v1390_v30 = vld [vmem:[%s2053_s7] ss:$0 sm:$0xff] }
 0x4b4   : > { %1459 = vmatpush3.bf16.msra.mxu0 %v614_v29 }
 0x4b5   : > { %1470 = vmatprep.subr.bf16.mxu0 %v1693_v8 }
 0x4b9   : > { %v1616_v31 = vpop.eup %1615 }
 0x4ba   : > { %v605_v32 = vmul.f32 %v1616_v31, %v1608_v12 }
 0x4bc   : > { %v606_v33 = vpack.c.bf16 %v605_v32, %v605_v32  ;;  %v1391_v32 = vld [vmem:[%s2054_s8] ss:$0 sm:$0xff] }
 0x4bd   : > { %v1618_v26 = vpop.eup %1617 }
 0x4be   : > { %1461 = vmatmul.mubr.msk.bf16.vlgmr.msra.gmra.mrb[8].mxu0 %vm548_vm2, %v606_v33  ;;  %v718_v35 = vmul.f32 %v1618_v26, %v1610_v14 }
 0x4bf   : > { %1472 = vmatprep.mubr.msk.bf16.mxu0 %vm1694_vm1, %v1693_v8 }
 0x4c0   : > { %v719_v38 = vpack.c.bf16 %v718_v35, %v718_v35  ;;  %v1597_v35 = vld [vmem:[%s2057_s11] sm:$0xff]  }
 0x4c2   : > { %v948_v34 = vpop.xlane.xlu0 %947 }
 0x4c6   : > { %v721_v36 = vpop.permute.xlu0 %720 }
 0x4c7   : > { %v726_v37 = vsel %vm612_vm4, %v721_v36, 0  ;;  %v1598_v36 = vld [vmem:[%s2057_s11 + $0x8] sm:$0xff]  }
 0x4c8   : > { %1471 = vmatpush3.bf16.msra.mxu0 %v726_v37  ;;  %v1599_v37 = vld [vmem:[%s2057_s11 + $0x10] sm:$0xff]  }
 0x4c9   : > { %1482 = vmatprep.subr.bf16.mxu0 %v1693_v8 }
 0x4cb   : > { %1473 = vmatmul.mubr.msk.bf16.vlgmr.msra.gmra.mrb[12].mxu0 %vm548_vm2, %v719_v38  ;;  %v1600_v38 = vld [vmem:[%s2057_s11 + $0x18] sm:$0xff]  }
 0x4cc   : > { %1484 = vmatprep.mubr.msk.bf16.mxu0 %vm1694_vm1, %v1693_v8 }
 0x4e3   : > { %v832_v39 = vpop.xlane.xlu1 %831 }
 0x4e4   : > { %1619 = vrcp.f32 %v832_v39  ;;  %v1601_v39 = vld [vmem:[%s2057_s11 + $0x20] sm:$0xff]  }
 0x4e5   : > { %1621 = vrcp.f32 %v948_v34 }
 0x4e7   : > { %v837_v40 = vpop.permute.xlu1 %836 }
 0x4e8   : > { %v842_v41 = vsel %vm612_vm4, %v837_v40, 0  ;;  %v1602_v40 = vld [vmem:[%s2057_s11 + $0x28] sm:$0xff]  }
 0x4e9   : > { %1483 = vmatpush3.bf16.msra.mxu0 %v842_v41  ;;  %v1603_v41 = vld [vmem:[%s2057_s11 + $0x30] sm:$0xff]  }
 0x4ea   : > { %1494 = vmatprep.subr.bf16.mxu0 %v1693_v8 }
 0x4eb   : > { %v953_v44 = vpop.permute.xlu1 %952 }
 0x4ec   : > { %v958_v47 = vsel %vm612_vm4, %v953_v44, 0 }
 0x4ee   : > { %v1620_v42 = vpop.eup %1619 }
 0x4ef   : > { %v834_v43 = vmul.f32 %v1620_v42, %v1614_v24  ;;  %v1622_v46 = vpop.eup %1621  ;;  %v1595_v24 = vld [vmem:[%s2055_s9] sm:$0xff]   ;;  %v1604_v42 = vld [vmem:[%s2057_s11 + $0x38] sm:$0xff]  }
 0x4f0   : > { %v950_v48 = vmul.f32 %v1622_v46, %v1612_v19 }
 0x4f1   : > { %v835_v45 = vpack.c.bf16 %v834_v43, %v834_v43  ;;  %v1392_v43 = vld [vmem:[%s2056_s10] ss:$0 sm:$0xff] }
 0x4f2   : > { %v951_v49 = vpack.c.bf16 %v950_v48, %v950_v48 }
 0x4f3   : > { %1485 = vmatmul.mubr.msk.bf16.vlgmr.msra.gmra.mrb[16].mxu0 %vm548_vm2, %v835_v45 }
 0x4f4   : > { %1495 = vmatpush3.bf16.msra.mxu0 %v958_v47  ;;  %1496 = vmatprep.mubr.msk.bf16.mxu0 %vm1694_vm1, %v1693_v8 }
 0x4f5   : > { %1508 = vmatprep.subr.bf16.mxu0 %v1693_v8 }
 0x4fb   : > { %1497 = vmatmul.mubr.msk.bf16.vlgmr.msra.gmra.mrb[20].mxu0 %vm548_vm2, %v951_v49 }
 0x4fc   : > { %1512 = vmatprep.mubr.msk.bf16.mxu0 %vm1694_vm1, %v1693_v8  ;;  %1509 = vmatpush3.bf16.msra.mxu0 %v1595_v24 }
 0x4fd   : > { %1510 = vmatprep.subr.bf16.mxu0 %v1693_v8 }
 0x591   : > { %v650_v50 = vpop.f32.mrb[8].mxu0 }
 0x592   : > { %656 = vst.msk [vmem:[#allocation2] sm:$0xff] %vm548_vm2, %v650_v50  ;;  %v1462_v51 = vpop.f32.mrb[9].mxu0 }
 0x593   : > { %v653_v52 = vpop.f32.mrb[10].mxu0 }
 0x594   : > { %v1463_v53 = vpop.f32.mrb[11].mxu0 }
 0x59e   : > { %v762_v54 = vpop.f32.mrb[12].mxu0 }
 0x59f   : > { %769 = vrot.lane.b32.xlu0 %v762_v54, %s1706_s22  ;;  %v1474_v55 = vpop.f32.mrb[13].mxu0  ;;  %s431_s22 = scalar_lea.vmem [#allocation3], %s1370_s15 }
 0x5a0   : > { %v765_v56 = vpop.f32.mrb[14].mxu0  ;;  %v1397_v55 = vld [vmem:[%s2058_s12] ss:$0 sm:$0xff]  ;;  %s1307_s23 = sshll.u32 %s431_s22, 4  ;;  %s2005_s23 = int_to_ptr.vmem [resolvable:$true] %s1307_s23 }
 0x5a1   : > { %v1475_v57 = vpop.f32.mrb[15].mxu0  ;;  %s1629_s15 = scalar_lea.vmem %s2005_s23, 128 }
 0x5a2   : > { %p1630_p11 = scmp.ne.s32.totalorder %s2005_s23, %s1629_s15 }
 0x5a4   : > { %p1631_p12 = pnand %p1630_p11, %p1818_p5 }
 0x5a6   : > { %p1632_p13 = pneg %p1631_p12 }
 0x5c6   : > { %v878_v60 = vpop.f32.mrb[16].mxu0 }
 0x5c7   : > { %885 = vrot.lane.b32.xlu1 %v878_v60, %s1707_s16  ;;  %v1486_v61 = vpop.f32.mrb[17].mxu0  ;;  %s1709_s16 = smov [#allocation3]  }
 0x5c8   : > { %v881_v62 = vpop.f32.mrb[18].mxu0 }
 0x5c9   : > { %v1487_v63 = vpop.f32.mrb[19].mxu0 }
 0x5ce   : > { %v994_v1 = vpop.f32.mrb[20].mxu0 }
 0x5cf   : > { %1001 = vrot.lane.b32.xlu0 %v994_v1, %s1708_s20  ;;  %v1498_v2 = vpop.f32.mrb[21].mxu0  ;;  %s1633_s20 = sshll.u32 %s1709_s16, 4  ;;  %s1634_s20 = int_to_ptr.vmem [resolvable:$false] %s1633_s20 }
 0x5d0   : > { %v997_v3 = vpop.f32.mrb[22].mxu0  ;;  %s1635_s2 = scalar_lea.vmem %s1634_s20, 256  ;;  %p1636_p0 = scmp.lt.s32.totalorder %s2005_s23, %s1634_s20 }
 0x5d1   : > { %v1499_v4 = vpop.f32.mrb[23].mxu0  ;;  %p1637_p1 = scmp.lt.s32.totalorder %s1635_s2, %s1629_s15 }
 0x5d3   : > { %p1638_p2 = por %p1637_p1, %p1636_p0 }
 0x5d5   : > { %p1639_p3 = pnand %p1638_p2, %p1632_p13 }
 0x611   : > { %v770_v5 = vpop.permute.xlu0 %769 }
 0x612   : > { %773 = vst.msk [vmem:[#allocation2] sm:$0xff] %vm772_vm5, %v770_v5 }
 0x639   : > { %v886_v6 = vpop.permute.xlu1 %885 }
 0x63a   : > { %889 = vst.msk [vmem:[#allocation2] sm:$0xff] %vm888_vm6, %v886_v6 }
 0x641   : > { %v1002_v7 = vpop.permute.xlu0 %1001 }
 0x642   : > { %1005 = vst.msk [vmem:[#allocation2] sm:$0xff] %vm1004_vm7, %v1002_v7 }
 0x649   : > { %v1006_v9 = vld [vmem:[#allocation2] sm:$0xff] }
 0x64a   : > { %v1007_v10 = vpack.c.bf16 %v1006_v9, %v1006_v9 }
 0x64c   : > { %1505 = vmatmul.mubr.msk.bf16.vlgmr.msra.gmra.mrb[12].mxu1 %vm440_vm0, %v1007_v10 }
 0x64d   : > { %1532 = vmatprep.mubr.msk.bf16.mxu1 %vm1694_vm1, %v1693_v8  ;;  %1517 = vmatpush3.bf16.msra.mxu1 %v1597_v35 }
 0x64e   : > { %1518 = vmatprep.subr.bf16.mxu1 %v1693_v8 }
 0x651   : > { %1519 = vmatpush3.bf16.msra.mxu1 %v1598_v36 }
 0x652   : > { %1520 = vmatprep.subr.bf16.mxu1 %v1693_v8 }
 0x655   : > { %1521 = vmatpush3.bf16.msra.mxu1 %v1599_v37 }
 0x656   : > { %1522 = vmatprep.subr.bf16.mxu1 %v1693_v8 }
 0x659   : > { %1523 = vmatpush3.bf16.msra.mxu1 %v1600_v38 }
 0x65a   : > { %1524 = vmatprep.subr.bf16.mxu1 %v1693_v8 }
 0x65d   : > { %1525 = vmatpush3.bf16.msra.mxu1 %v1601_v39 }
 0x65e   : > { %1526 = vmatprep.subr.bf16.mxu1 %v1693_v8 }
 0x661   : > { %1527 = vmatpush3.bf16.msra.mxu1 %v1602_v40 }
 0x662   : > { %1528 = vmatprep.subr.bf16.mxu1 %v1693_v8 }
 0x665   : > { %1529 = vmatpush3.bf16.msra.mxu1 %v1603_v41 }
 0x666   : > { %1530 = vmatprep.subr.bf16.mxu1 %v1693_v8 }
 0x669   : > { %1531 = vmatpush3.bf16.msra.mxu1 %v1604_v42 }
 0x71f   : > { %v1068_v12 = vpop.f32.mrb[12].mxu1 }
 0x720   : > { %v1069_v13 = vadd.f32 %v1386_v11, %v1068_v12  ;;  %v1506_v14 = vpop.f32.mrb[13].mxu1 }
 0x721   : > { %v1071_v15 = vpop.f32.mrb[14].mxu1 }
 0x722   : > { %v1940_v16 = vadd.f32 %v1069_v13, %v1833_v0  ;;  %v1507_v17 = vpop.f32.mrb[15].mxu1  ;;  %v1596_v0 = vld [vmem:[%s2055_s9 + $0x8] sm:$0xff]  }
 0x723   : > { %1511 = vmatpush3.bf16.msra.mxu0 %v1596_v0 }
 0x724   : > { %v1077_v18 = vsel %vm440_vm0, %v1940_v16, 0.0 }
 0x725   : > { %1078 = vadd.xlane.f32.xlu1 %v1077_v18 }
 0x7b2   : > { %v1079_v19 = vpop.xlane.xlu1 %1078 }
 0x7b3   : > { %v1080_v20 = vmul.f32 0.03125, %v1079_v19 }
 0x7b5   : > { %v1081_v21 = vsub.f32 %v1940_v16, %v1080_v20 }
 0x7b7   : > { %v1082_v22 = vmul.f32 %v1081_v21, %v1081_v21 }
 0x7b9   : > { %v1083_v23 = vsel %vm440_vm0, %v1082_v22, 0.0 }
 0x7ba   : > { %1084 = vadd.xlane.f32.xlu0 %v1083_v23 }
 0x847   : > { %v1085_v25 = vpop.xlane.xlu0 %1084 }
 0x848   : > { %v1086_v27 = vmul.f32 0.03125, %v1085_v25 }
 0x84a   : > { %v1087_v28 = vadd.f32 1e-05, %v1086_v27 }
 0x84c   : > { %1623 = vrsqrt.f32 %v1087_v28 }
 0x856   : > { %v1624_v29 = vpop.eup %1623 }
 0x857   : > { %v1089_v31 = vmul.f32 %v1624_v29, %v1081_v21 }
 0x859   : > { %v1096_v33 = vmul.f32 %v1390_v30, %v1089_v31 }
 0x85b   : > { %v1103_v26 = vadd.f32 %v1391_v32, %v1096_v33 }
 0x85d   : > { %v1104_v34 = vpack.c.bf16 %v1103_v26, %v1103_v26 }
 0x85f   : > { %1513 = vmatmul.mubr.msk.bf16.vlgmr.msra.gmra.mrb[24].mxu0 %vm440_vm0, %v1104_v34 }
 0x932   : > { %v1165_v44 = vpop.f32.mrb[24].mxu0 }
 0x933   : > { %v1166_v45 = vadd.f32 %v1392_v43, %v1165_v44  ;;  %v1514_v46 = vpop.f32.mrb[25].mxu0 }
 0x934   : > { %v1168_v47 = vpop.f32.mrb[26].mxu0 }
 0x935   : > { %v1396_v48 = vmul.f32 -1.702, %v1166_v45  ;;  %v1515_v49 = vpop.f32.mrb[27].mxu0 }
 0x937   : > { %v1173_v50 = vmul.f32 1.442695, %v1396_v48 }
 0x939   : > { %1625 = vpow2.f32 %v1173_v50 }
 0x943   : > { %v1626_v8 = vpop.eup %1625 }
 0x944   : > { %v1175_v51 = vadd.f32 1.0, %v1626_v8 }
 0x946   : > { %1627 = vrcp.f32 %v1175_v51 }
 0x950   : > { %v1628_v52 = vpop.eup %1627 }
 0x951   : > { %v1178_v53 = vmul.f32 %v1628_v52, %v1166_v45 }
 0x953   : > { %v1179_v54 = vpack.c.bf16 %v1178_v53, %v1178_v53 }
 0x955   : > { %1533 = vmatmul.mubr.bf16.vlgmr.msra.gmra.mrb[16].mxu1 %v1179_v54 }
 0xa28   : > { %v1285_v56 = vpop.f32.mrb[16].mxu1 }
 0xa29   : > { %v1286_v57 = vadd.f32 %v1397_v55, %v1285_v56  ;;  %v1534_v58 = vpop.f32.mrb[17].mxu1 }
 0xa2a   : > { %v1288_v59 = vpop.f32.mrb[18].mxu1 }
 0xa2b   : > { %v1291_v60 = vadd.f32 %v1286_v57, %v1940_v16  ;;  %v1535_v61 = vpop.f32.mrb[19].mxu1 }
 0xa2d   : > { %1292 = vst.msk [vmem:[%s431_s22] sm:$0xff] %vm440_vm0, %v1291_v60 }
 0xa2e   : > { %1642 = shalt.err (!%p1639_p3)
}
 0xa2f   : > { %s1643_s0 = scalar_lea.hbm %s2003_s1, 128  ;;  %s1647_s22 = scalar_lea.hbm %s2059_s13, 256 }
 0xa30   : > { %p1644_p4 = scmp.ne.s32.totalorder %s2003_s1, %s1643_s0  ;;  %p1648_p9 = scmp.lt.u32.totalorder %s2003_s1, %s2059_s13 }
 0xa31   : > { %p1649_p10 = scmp.lt.u32.totalorder %s1647_s22, %s1643_s0  ;;  %p1651_p12 = scmp.lt.u32.totalorder %s1643_s0, %s2003_s1 }
 0xa32   : > { %p1645_p7 = pnand %p1644_p4, %p1818_p5 }
 0xa33   : > { %p1650_p11 = por %p1649_p10, %p1648_p9 }
 0xa34   : > { %p1646_p8 = pneg %p1645_p7 }
 0xa35   : > { %p1652_p13 = por %p1651_p12, %p1650_p11 }
 0xa37   : > { %p1653_p0 = pnand %p1652_p13, %p1646_p8 }
 0xa39   : > { %1656 = shalt.err (!%p1653_p0)
}
 0xa3a   : > { %1536 = dma.vmem_to_hbm [thread:$0]  (%p1818_p5), %s2005_s23, 128, %s2003_s1, %s1294_s29  }
 0xa3b PF: > { %p1542_p1 = scmp.ge.s32.totalorder %s1691_s28, 2  ;;  %s1319_s2 = sand.u32 1, %s1679_s25  }
 0xa3c   : > { %s1320_s15 = scalar_lea.sflag [#allocation4], %s1319_s2 }
 0xa3d   : > { %p1539_p2 = pnand %p1542_p1, %p1822_p6 }
 0xa3f   : > { %1674 = dma.done.wait (!%p1539_p2), %s1320_s15, 128  }
 0xa40   : > { %1676 = vsyncadd (!%p1539_p2), %s1320_s15, 4294967168  ;;  %p23_p3 = scmp.ge.s32.totalorder %s1805_s14, 4   ;;  %s2068_s25 = smov %s1683_s26 }
 0xa41   : > { %s2069_s26 = smov %s1687_s27  ;;  %s2070_s27 = smov %s1816_s17 }
 0xa42   : > { %s2071_s28 = smov %s1805_s14  ;;  %25 = sbr.rel (!%p23_p3) target bundleno = 7 (0x7), region = 107 }
 0xa49   :  { %1325 = vsyncpa [#allocation4], 1 }
 0xa4a   :  { %1327 = vsyncpa [#allocation4 + $0x1], 1 }

// kernel: tpu_custom_call.1
= control target key start
LH: loop header
LB: loop body
LE: loop exit
PB: predicated region body
PF: predicated region fallthrough
CT: control target
= control target key end

     0   :  { %s2046_s0 = inlined_call_operand.vmem [shape: f32[2,8,32], index: 0, kind: input, shape index: {}]   ;;  %s2047_s1 = inlined_call_operand.vmem [shape: f32[1,32], index: 1, kind: input, shape index: {}]   ;;  %s2048_s2 = inlined_call_operand.vmem [shape: f32[1,32], index: 2, kind: input, shape index: {}]   ;;  %s2049_s3 = inlined_call_operand.vmem [shape: bf16[32,96], index: 3, kind: input, shape index: {}]   ;;  %s2050_s4 = inlined_call_operand.vmem [shape: f32[1,96], index: 4, kind: input, shape index: {}]   ;;  %s2051_s5 = inlined_call_operand.vmem [shape: bf16[32,32], index: 5, kind: input, shape index: {}]   ;;  %s2052_s6 = inlined_call_operand.vmem [shape: f32[1,32], index: 6, kind: input, shape index: {}]   ;;  %s2053_s7 = inlined_call_operand.vmem [shape: f32[1,32], index: 7, kind: input, shape index: {}]   ;;  %s2054_s8 = inlined_call_operand.vmem [shape: f32[1,32], index: 8, kind: input, shape index: {}]   ;;  %s2055_s9 = inlined_call_operand.vmem [shape: bf16[32,128], index: 9, kind: input, shape index: {}]   ;;  %s2056_s10 = inlined_call_operand.vmem [shape: f32[1,128], index: 10, kind: input, shape index: {}]   ;;  %s2057_s11 = inlined_call_operand.vmem [shape: bf16[128,32], index: 11, kind: input, shape index: {}]   ;;  %s2058_s12 = inlined_call_operand.vmem [shape: f32[1,32], index: 12, kind: input, shape index: {}]   ;;  %s2059_s13 = inlined_call_operand.hbm [shape: f32[2,8,32], index: 13, kind: output, shape index: {}]  }
   0x1   :  { %2060 = sst [smem:[#allocation6_spill]] %s2046_s0 }
   0x2   :  { %2061 = sst [smem:[#allocation7_spill]] %s2047_s1 }
   0x3   :  { %2062 = sst [smem:[#allocation8_spill]] %s2048_s2 }
   0x4   :  { %18 = vsyncpa [#allocation4], 0 }
   0x5   :  { %20 = vsyncpa [#allocation4 + $0x1], 0  ;;  %s1780_s25 = smov 0   ;;  %s1782_s26 = smov 0  }
   0x6   :  { %s1784_s27 = smov 0   ;;  %s1786_s28 = smov 0  }
   0x7 LB: > { %s1801_s29 = sadd.s32 4294967295, %s1691_s28   ;;  %s1366_s30 = sadd.s32 4294967294, %s1691_s28   ;;  %s1691_s28 = sphi %s1786_s28, %s2071_s28   ;;  %s1687_s27 = sphi %s1784_s27, %s2070_s27   ;;  %s1683_s26 = sphi %s1782_s26, %s2069_s26   ;;  %s1679_s25 = sphi %s1780_s25, %s2068_s25  }
   0x8   : > { %s1805_s14 = sadd.s32 1, %s1691_s28   ;;  %s311_s15 = sadd.s32 1, %s1687_s27 }
   0x9   : > { %s308_s16 = ssub.s32 %s1691_s28, %s1805_s14  ;;  %p321_p0 = scmp.ne.s32.totalorder %s1687_s27, %s1683_s26 }
   0xa   : > { %p309_p1 = scmp.eq.s32.totalorder %s308_s16, 0  ;;  %p322_p2 = scmp.eq.s32.totalorder %s1801_s29, 1 }
   0xb   : > { %p327_p3 = scmp.ne.s32.totalorder %s1683_s26, %s1679_s25  ;;  %p328_p4 = scmp.eq.s32.totalorder %s1366_s30, 1 }
   0xc   : > { %s1816_s17 = scalar_select %p309_p1, %s1687_s27, %s311_s15  }
   0xd   : > { %p1818_p5 = por %p322_p2, %p321_p0  ;;  %p1822_p6 = por %p328_p4, %p327_p3 }
   0xe   : > { %p1369_p7 = scmp.ge.s32.totalorder %s1691_s28, 1  ;;  %p389_p8 = scmp.lt.s32.totalorder %s1691_s28, 3 }
  0x10   : > { %p390_p9 = pnand %p1369_p7, %p389_p8 }
  0x11   : > { %p432_p10 = scmp.lt.s32.totalorder (!%p390_p9), %s1801_s29, 1  ;;  %vm440_vm0 = vcmask (!%p390_p9), 261120   ;;  %s2065_s0 = sld [smem:[#allocation6_spill]] (!%p390_p9)  ;;  %v1591_v7 = vld [vmem:[%s2049_s3] sm:$0xff] (!%p390_p9)   ;;  %v1693_v8 = vmov (!%p390_p9), 0.0   ;;  %vm1694_vm1 = vmmov (!%p390_p9), 0   ;;  %v539_v40 = vlaneseq (!%p390_p9) }
  0x12   : > { %393 = sbr.rel (%p390_p9) target bundleno = 2619 (0xa3b), region = 72  ;;  %1444 = vmatprep.subr.bf16.mxu0 (!%p390_p9), %v1693_v8  ;;  %1448 = vmatprep.mubr.msk.bf16.mxu0 (!%p390_p9), %vm1694_vm1, %v1693_v8  ;;  %v1592_v9 = vld [vmem:[%s2049_s3 + $0x8] sm:$0xff] (!%p390_p9)   ;;  %s2066_s1 = sld [smem:[#allocation7_spill]] (!%p390_p9)  ;;  %v1374_v20 = vld [vmem:[%s2050_s4] ss:$0 sm:$0xff] (!%p390_p9)  ;;  %vm548_vm2 = vcmask (!%p390_p9), 64512  }
  0x13   : > { %1445 = vmatpush3.bf16.msra.mxu0 (!%p390_p9), %v1591_v7  ;;  %1464 = vmatprep.subr.bf16.mxu1 (!%p390_p9), %v1693_v8  ;;  %s2067_s2 = sld [smem:[#allocation8_spill]] (!%p390_p9)  ;;  %s1695_s16 = smov (!%p390_p9), 96   ;;  %v540_v41 = vshrl.u32 (!%p390_p9), %v539_v40, 7  ;;  %v542_v42 = vand.u32 (!%p390_p9), 127, %v539_v40  ;;  %vm612_vm4 = vcmask (!%p390_p9), 1043456   ;;  %vm772_vm5 = vcmask (!%p390_p9), 130112  }
  0x14   : > { %1446 = vmatprep.subr.bf16.mxu0 (!%p390_p9), %v1693_v8  ;;  %1466 = vmatprep.mubr.msk.bf16.mxu1 (!%p390_p9), %vm1694_vm1, %v1693_v8  ;;  %s1698_s22 = smov (!%p390_p9), 80   ;;  %s1699_s23 = smov (!%p390_p9), 112   ;;  %vm888_vm6 = vcmask (!%p390_p9), 195712   ;;  %vm1004_vm7 = vcmask (!%p390_p9), 261312  }
  0x15   : > { %s1701_s30 = smov (!%p390_p9), 104   ;;  %vm543_vm3 = vcmp.gt.s32.totalorder (!%p390_p9), %v542_v42, %v540_v41  ;;  %s1702_s15 = smov (!%p390_p9), 64  }
  0x16   : > { %v544_v43 = vsel (!%p390_p9), %vm543_vm3, -1e+30, %v1693_v8 }
  0x17   : > { %1447 = vmatpush3.bf16.msra.mxu0 (!%p390_p9), %v1592_v9 }
  0x18   : > { %1452 = vmatprep.subr.bf16.mxu0 (!%p390_p9), %v1693_v8  ;;  %v1372_v14 = vld [vmem:[%s2066_s1] ss:$0 sm:$0xff] (!%p390_p9) }
  0x19   : > { %s433_s20 = scalar_select %p432_p10, %s1801_s29, 1  ;;  %v1373_v16 = vld [vmem:[%s2067_s2] ss:$0 sm:$0xff] }
  0x1b   : > { %s1371_s21 = sshll.u32 %s433_s20, 3  ;;  %s1696_s20 = smov 120  }
  0x1c   : > { %s435_s24 = scalar_lea.vmem %s2065_s0, %s1371_s21  ;;  %s1697_s21 = smov 88  }
  0x1d   : > { %v1833_v0 = vld [vmem:[%s435_s24] sm:$0xff]  ;;  %s1700_s24 = smov 72  }
  0x1e   : > { %v441_v1 = vsel %vm440_vm0, %v1833_v0, 0.0 }
  0x1f   : > { %442 = vadd.xlane.f32.xlu0 %v441_v1 }
  0xac   : > { %v443_v2 = vpop.xlane.xlu0 %442 }
  0xad   : > { %v445_v3 = vmul.f32 0.03125, %v443_v2 }
  0xaf   : > { %v446_v4 = vsub.f32 %v1833_v0, %v445_v3 }
  0xb1   : > { %v447_v5 = vmul.f32 %v446_v4, %v446_v4 }
  0xb3   : > { %v448_v6 = vsel %vm440_vm0, %v447_v5, 0.0 }
  0xb4   : > { %449 = vadd.xlane.f32.xlu0 %v448_v6 }
 0x141   : > { %v450_v10 = vpop.xlane.xlu0 %449 }
 0x142   : > { %v451_v11 = vmul.f32 0.03125, %v450_v10 }
 0x144   : > { %v452_v12 = vadd.f32 1e-05, %v451_v11 }
 0x146   : > { %1605 = vrsqrt.f32 %v452_v12 }
 0x150   : > { %v1606_v13 = vpop.eup %1605 }
 0x151   : > { %v454_v15 = vmul.f32 %v1606_v13, %v446_v4 }
 0x153   : > { %v461_v17 = vmul.f32 %v1372_v14, %v454_v15 }
 0x155   : > { %v468_v18 = vadd.f32 %v1373_v16, %v461_v17 }
 0x157   : > { %v469_v19 = vpack.c.bf16 %v468_v18, %v468_v18 }
 0x159   : > { %1449 = vmatmul.mubr.msk.bf16.vlgmr.msra.gmra.mrb[0].mxu0 %vm440_vm0, %v469_v19 }
 0x15a   : > { %1454 = vmatprep.mubr.msk.bf16.mxu0 %vm1694_vm1, %v1693_v8 }
 0x22c   : > { %v530_v21 = vpop.f32.mrb[0].mxu0 }
 0x22d   : > { %v531_v22 = vadd.f32 %v1374_v20, %v530_v21  ;;  %v1450_v23 = vpop.f32.mrb[1].mxu0 }
 0x22e   : > { %v533_v24 = vpop.f32.mrb[2].mxu0 }
 0x22f   : > { %v536_v25 = vmul.f32 0.35355338, %v531_v22  ;;  %v1865_v26 = vpack.c.bf16 %v531_v22, %v531_v22  ;;  %v1451_v27 = vpop.f32.mrb[3].mxu0 }
 0x231   : > { %v537_v28 = vpack.c.bf16 %v536_v25, %v536_v25  ;;  %546 = vrot.lane.b32.xlu1 %v1865_v26, %s1695_s16  ;;  %s1703_s16 = smov 56  }
 0x233   : > { %658 = vrot.lane.b32.xlu0 %v537_v28, %s1696_s20  ;;  %s1704_s20 = smov 48  }
 0x235   : > { %660 = vrot.lane.b32.xlu1 %v1865_v26, %s1697_s21  ;;  %s1705_s21 = smov 40  }
 0x239   : > { %776 = vrot.lane.b32.xlu1 %v1865_v26, %s1698_s22  ;;  %s1706_s22 = smov 8  }
 0x23d   : > { %774 = vrot.lane.b32.xlu1 %v537_v28, %s1699_s23 }
 0x241   : > { %892 = vrot.lane.b32.xlu1 %v1865_v26, %s1700_s24 }
 0x245   : > { %890 = vrot.lane.b32.xlu1 %v537_v28, %s1701_s30  ;;  %s429_s30 = sand.u32 1, %s1683_s26  }
 0x2a3   : > { %v547_v29 = vpop.permute.xlu1 %546 }
 0x2a4   : > { %v553_v30 = vsel %vm548_vm2, %v547_v29, 0 }
 0x2a5   : > { %1453 = vmatpush3.bf16.xpose.msra.mxu0 %v553_v30  ;;  %v659_v34 = vpop.permute.xlu0 %658 }
 0x2a6   : > { %1458 = vmatprep.subr.bf16.mxu0 %v1693_v8 }
 0x2a7   : > { %v661_v31 = vpop.permute.xlu1 %660 }
 0x2a8   : > { %v666_v32 = vsel %vm548_vm2, %v661_v31, 0 }
 0x2a9   : > { %1465 = vmatpush3.bf16.xpose.msra.mxu1 %v666_v32 }
 0x2aa   : > { %1476 = vmatprep.subr.bf16.mxu1 %v1693_v8 }
 0x2ab   : > { %v777_v33 = vpop.permute.xlu1 %776 }
 0x2ac   : > { %1455 = vmatmul.mubr.msk.bf16.vlgmr.msra.gmra.mrb[4].mxu0 %vm548_vm2, %v537_v28  ;;  %v782_v36 = vsel %vm548_vm2, %v777_v33, 0 }
 0x2ad   : > { %1460 = vmatprep.mubr.msk.bf16.mxu0 %vm1694_vm1, %v1693_v8 }
 0x2af   : > { %v775_v35 = vpop.permute.xlu1 %774 }
 0x2b0   : > { %1467 = vmatmul.mubr.msk.bf16.vlgmr.msra.gmra.mrb[0].mxu1 %vm548_vm2, %v659_v34 }
 0x2b1   : > { %1477 = vmatpush3.bf16.xpose.msra.mxu1 %v782_v36  ;;  %1478 = vmatprep.mubr.msk.bf16.mxu1 %vm1694_vm1, %v1693_v8 }
 0x2b2   : > { %1488 = vmatprep.subr.bf16.mxu1 %v1693_v8 }
 0x2b3   : > { %v893_v37 = vpop.permute.xlu1 %892 }
 0x2b4   : > { %v898_v38 = vsel %vm548_vm2, %v893_v37, 0 }
 0x2b7   : > { %v891_v39 = vpop.permute.xlu1 %890 }
 0x2b8   : > { %1479 = vmatmul.mubr.msk.bf16.vlgmr.msra.gmra.mrb[4].mxu1 %vm548_vm2, %v775_v35 }
 0x2b9   : > { %1489 = vmatpush3.bf16.xpose.msra.mxu1 %v898_v38  ;;  %1490 = vmatprep.mubr.msk.bf16.mxu1 %vm1694_vm1, %v1693_v8 }
 0x2ba   : > { %1500 = vmatprep.subr.bf16.mxu1 %v1693_v8 }
 0x2c0   : > { %1491 = vmatmul.mubr.msk.bf16.vlgmr.msra.gmra.mrb[8].mxu1 %vm548_vm2, %v891_v39 }
 0x2c1   : > { %1504 = vmatprep.mubr.msk.bf16.mxu1 %vm1694_vm1, %v1693_v8 }
 0x37f   : > { %v589_v44 = vpop.f32.mrb[4].mxu0 }
 0x380   : > { %v590_v45 = vadd.f32 %v589_v44, %v544_v43  ;;  %v1456_v46 = vpop.f32.mrb[5].mxu0 }
 0x381   : > { %v592_v47 = vpop.f32.mrb[6].mxu0 }
 0x382   : > { %v1457_v48 = vpop.f32.mrb[7].mxu0  ;;  %v595_v49 = vsel %vm548_vm2, %v590_v45, -inf }
 0x383   : > { %v702_v50 = vpop.f32.mrb[0].mxu1  ;;  %596 = vmax.xlane.f32.xlu1 %v595_v49 }
 0x384   : > { %v703_v51 = vadd.f32 %v702_v50, %v544_v43  ;;  %v1468_v52 = vpop.f32.mrb[1].mxu1 }
 0x385   : > { %v705_v53 = vpop.f32.mrb[2].mxu1 }
 0x386   : > { %v1469_v54 = vpop.f32.mrb[3].mxu1  ;;  %v708_v55 = vsel %vm548_vm2, %v703_v51, -inf }
 0x387   : > { %709 = vmax.xlane.f32.xlu0 %v708_v55 }
 0x38b   : > { %v818_v56 = vpop.f32.mrb[4].mxu1 }
 0x38c   : > { %v819_v57 = vadd.f32 %v818_v56, %v544_v43  ;;  %v1480_v58 = vpop.f32.mrb[5].mxu1 }
 0x38d   : > { %v821_v59 = vpop.f32.mrb[6].mxu1  ;;  %v1593_v58 = vld [vmem:[%s2051_s5] sm:$0xff]  }
 0x38e   : > { %v1481_v60 = vpop.f32.mrb[7].mxu1  ;;  %v824_v61 = vsel %vm548_vm2, %v819_v57, -inf  ;;  %1501 = vmatpush3.bf16.msra.mxu1 %v1593_v58  ;;  %v1594_v59 = vld [vmem:[%s2051_s5 + $0x8] sm:$0xff]  }
 0x38f   : > { %825 = vmax.xlane.f32.xlu1 %v824_v61  ;;  %1502 = vmatprep.subr.bf16.mxu1 %v1693_v8 }
 0x392   : > { %1503 = vmatpush3.bf16.msra.mxu1 %v1594_v59 }
 0x393   : > { %v934_v62 = vpop.f32.mrb[8].mxu1  ;;  %1516 = vmatprep.subr.bf16.mxu1 %v1693_v8 }
 0x394   : > { %v935_v63 = vadd.f32 %v934_v62, %v544_v43  ;;  %v1492_v1 = vpop.f32.mrb[9].mxu1 }
 0x395   : > { %v937_v2 = vpop.f32.mrb[10].mxu1 }
 0x396   : > { %v1493_v3 = vpop.f32.mrb[11].mxu1  ;;  %v940_v4 = vsel %vm548_vm2, %v935_v63, -inf }
 0x397   : > { %941 = vmax.xlane.f32.xlu0 %v940_v4 }
 0x410   : > { %v597_v5 = vpop.xlane.xlu1 %596 }
 0x411   : > { %v598_v6 = vsub.f32 %v590_v45, %v597_v5 }
 0x413   : > { %v599_v7 = vmul.f32 1.442695, %v598_v6 }
 0x414   : > { %v710_v9 = vpop.xlane.xlu0 %709 }
 0x415   : > { %1607 = vpow2.f32 %v599_v7  ;;  %v711_v10 = vsub.f32 %v703_v51, %v710_v9 }
 0x417   : > { %v712_v11 = vmul.f32 1.442695, %v711_v10 }
 0x419   : > { %1609 = vpow2.f32 %v712_v11  ;;  %v1386_v11 = vld [vmem:[%s2052_s6] ss:$0 sm:$0xff] }
 0x41c   : > { %v826_v21 = vpop.xlane.xlu1 %825 }
 0x41d   : > { %v827_v22 = vsub.f32 %v819_v57, %v826_v21 }
 0x41f   : > { %v1608_v12 = vpop.eup %1607  ;;  %v828_v23 = vmul.f32 1.442695, %v827_v22 }
 0x420   : > { %v601_v13 = vsel %vm548_vm2, %v1608_v12, 0.0 }
 0x421   : > { %602 = vadd.xlane.f32.xlu1 %v601_v13 }
 0x423   : > { %v1610_v14 = vpop.eup %1609 }
 0x424   : > { %v942_v15 = vpop.xlane.xlu0 %941  ;;  %v714_v16 = vsel %vm548_vm2, %v1610_v14, 0.0 }
 0x425   : > { %v943_v17 = vsub.f32 %v935_v63, %v942_v15  ;;  %715 = vadd.xlane.f32.xlu0 %v714_v16 }
 0x427   : > { %v944_v18 = vmul.f32 1.442695, %v943_v17 }
 0x429   : > { %1611 = vpow2.f32 %v944_v18 }
 0x42a   : > { %1613 = vpow2.f32 %v828_v23 }
 0x432   : > { %607 = vrot.lane.b32.xlu1 %v1865_v26, %s1702_s15  ;;  %s1370_s15 = sshll.u32 %s429_s30, 3 }
 0x433   : > { %v1612_v19 = vpop.eup %1611 }
 0x434   : > { %v946_v20 = vsel %vm548_vm2, %v1612_v19, 0.0  ;;  %v1614_v24 = vpop.eup %1613 }
 0x435   : > { %947 = vadd.xlane.f32.xlu0 %v946_v20  ;;  %v830_v25 = vsel %vm548_vm2, %v1614_v24, 0.0 }
 0x44b   : > { %720 = vrot.lane.b32.xlu0 %v1865_v26, %s1703_s16  ;;  %s1707_s16 = smov 16  }
 0x456   : > { %831 = vadd.xlane.f32.xlu1 %v830_v25 }
 0x467   : > { %836 = vrot.lane.b32.xlu1 %v1865_v26, %s1704_s20  ;;  %s1708_s20 = smov 24  }
 0x46b   : > { %952 = vrot.lane.b32.xlu1 %v1865_v26, %s1705_s21  ;;  %s1407_s21 = sshll.u32 %s1801_s29, 7  ;;  %s1294_s29 = scalar_lea.sflag [#allocation4], %s429_s30 }
 0x46c   : > { %s2003_s1 = scalar_lea.hbm %s2059_s13, %s1407_s21 }
 0x4ae   : > { %v603_v27 = vpop.xlane.xlu1 %602 }
 0x4af   : > { %1615 = vrcp.f32 %v603_v27 }
 0x4b2   : > { %v608_v28 = vpop.permute.xlu1 %607  ;;  %v716_v30 = vpop.xlane.xlu0 %715 }
 0x4b3   : > { %v614_v29 = vsel %vm612_vm4, %v608_v28, 0  ;;  %1617 = vrcp.f32 %v716_v30  ;;  %v1390_v30 = vld [vmem:[%s2053_s7] ss:$0 sm:$0xff] }
 0x4b4   : > { %1459 = vmatpush3.bf16.msra.mxu0 %v614_v29 }
 0x4b5   : > { %1470 = vmatprep.subr.bf16.mxu0 %v1693_v8 }
 0x4b9   : > { %v1616_v31 = vpop.eup %1615 }
 0x4ba   : > { %v605_v32 = vmul.f32 %v1616_v31, %v1608_v12 }
 0x4bc   : > { %v606_v33 = vpack.c.bf16 %v605_v32, %v605_v32  ;;  %v1391_v32 = vld [vmem:[%s2054_s8] ss:$0 sm:$0xff] }
 0x4bd   : > { %v1618_v26 = vpop.eup %1617 }
 0x4be   : > { %1461 = vmatmul.mubr.msk.bf16.vlgmr.msra.gmra.mrb[8].mxu0 %vm548_vm2, %v606_v33  ;;  %v718_v35 = vmul.f32 %v1618_v26, %v1610_v14 }
 0x4bf   : > { %1472 = vmatprep.mubr.msk.bf16.mxu0 %vm1694_vm1, %v1693_v8 }
 0x4c0   : > { %v719_v38 = vpack.c.bf16 %v718_v35, %v718_v35  ;;  %v1597_v35 = vld [vmem:[%s2057_s11] sm:$0xff]  }
 0x4c2   : > { %v948_v34 = vpop.xlane.xlu0 %947 }
 0x4c6   : > { %v721_v36 = vpop.permute.xlu0 %720 }
 0x4c7   : > { %v726_v37 = vsel %vm612_vm4, %v721_v36, 0  ;;  %v1598_v36 = vld [vmem:[%s2057_s11 + $0x8] sm:$0xff]  }
 0x4c8   : > { %1471 = vmatpush3.bf16.msra.mxu0 %v726_v37  ;;  %v1599_v37 = vld [vmem:[%s2057_s11 + $0x10] sm:$0xff]  }
 0x4c9   : > { %1482 = vmatprep.subr.bf16.mxu0 %v1693_v8 }
 0x4cb   : > { %1473 = vmatmul.mubr.msk.bf16.vlgmr.msra.gmra.mrb[12].mxu0 %vm548_vm2, %v719_v38  ;;  %v1600_v38 = vld [vmem:[%s2057_s11 + $0x18] sm:$0xff]  }
 0x4cc   : > { %1484 = vmatprep.mubr.msk.bf16.mxu0 %vm1694_vm1, %v1693_v8 }
 0x4e3   : > { %v832_v39 = vpop.xlane.xlu1 %831 }
 0x4e4   : > { %1619 = vrcp.f32 %v832_v39  ;;  %v1601_v39 = vld [vmem:[%s2057_s11 + $0x20] sm:$0xff]  }
 0x4e5   : > { %1621 = vrcp.f32 %v948_v34 }
 0x4e7   : > { %v837_v40 = vpop.permute.xlu1 %836 }
 0x4e8   : > { %v842_v41 = vsel %vm612_vm4, %v837_v40, 0  ;;  %v1602_v40 = vld [vmem:[%s2057_s11 + $0x28] sm:$0xff]  }
 0x4e9   : > { %1483 = vmatpush3.bf16.msra.mxu0 %v842_v41  ;;  %v1603_v41 = vld [vmem:[%s2057_s11 + $0x30] sm:$0xff]  }
 0x4ea   : > { %1494 = vmatprep.subr.bf16.mxu0 %v1693_v8 }
 0x4eb   : > { %v953_v44 = vpop.permute.xlu1 %952 }
 0x4ec   : > { %v958_v47 = vsel %vm612_vm4, %v953_v44, 0 }
 0x4ee   : > { %v1620_v42 = vpop.eup %1619 }
 0x4ef   : > { %v834_v43 = vmul.f32 %v1620_v42, %v1614_v24  ;;  %v1622_v46 = vpop.eup %1621  ;;  %v1595_v24 = vld [vmem:[%s2055_s9] sm:$0xff]   ;;  %v1604_v42 = vld [vmem:[%s2057_s11 + $0x38] sm:$0xff]  }
 0x4f0   : > { %v950_v48 = vmul.f32 %v1622_v46, %v1612_v19 }
 0x4f1   : > { %v835_v45 = vpack.c.bf16 %v834_v43, %v834_v43  ;;  %v1392_v43 = vld [vmem:[%s2056_s10] ss:$0 sm:$0xff] }
 0x4f2   : > { %v951_v49 = vpack.c.bf16 %v950_v48, %v950_v48 }
 0x4f3   : > { %1485 = vmatmul.mubr.msk.bf16.vlgmr.msra.gmra.mrb[16].mxu0 %vm548_vm2, %v835_v45 }
 0x4f4   : > { %1495 = vmatpush3.bf16.msra.mxu0 %v958_v47  ;;  %1496 = vmatprep.mubr.msk.bf16.mxu0 %vm1694_vm1, %v1693_v8 }
 0x4f5   : > { %1508 = vmatprep.subr.bf16.mxu0 %v1693_v8 }
 0x4fb   : > { %1497 = vmatmul.mubr.msk.bf16.vlgmr.msra.gmra.mrb[20].mxu0 %vm548_vm2, %v951_v49 }
 0x4fc   : > { %1512 = vmatprep.mubr.msk.bf16.mxu0 %vm1694_vm1, %v1693_v8  ;;  %1509 = vmatpush3.bf16.msra.mxu0 %v1595_v24 }
 0x4fd   : > { %1510 = vmatprep.subr.bf16.mxu0 %v1693_v8 }
 0x591   : > { %v650_v50 = vpop.f32.mrb[8].mxu0 }
 0x592   : > { %656 = vst.msk [vmem:[#allocation2] sm:$0xff] %vm548_vm2, %v650_v50  ;;  %v1462_v51 = vpop.f32.mrb[9].mxu0 }
 0x593   : > { %v653_v52 = vpop.f32.mrb[10].mxu0 }
 0x594   : > { %v1463_v53 = vpop.f32.mrb[11].mxu0 }
 0x59e   : > { %v762_v54 = vpop.f32.mrb[12].mxu0 }
 0x59f   : > { %769 = vrot.lane.b32.xlu0 %v762_v54, %s1706_s22  ;;  %v1474_v55 = vpop.f32.mrb[13].mxu0  ;;  %s431_s22 = scalar_lea.vmem [#allocation3], %s1370_s15 }
 0x5a0   : > { %v765_v56 = vpop.f32.mrb[14].mxu0  ;;  %v1397_v55 = vld [vmem:[%s2058_s12] ss:$0 sm:$0xff]  ;;  %s1307_s23 = sshll.u32 %s431_s22, 4  ;;  %s2005_s23 = int_to_ptr.vmem [resolvable:$true] %s1307_s23 }
 0x5a1   : > { %v1475_v57 = vpop.f32.mrb[15].mxu0  ;;  %s1629_s15 = scalar_lea.vmem %s2005_s23, 128 }
 0x5a2   : > { %p1630_p11 = scmp.ne.s32.totalorder %s2005_s23, %s1629_s15 }
 0x5a4   : > { %p1631_p12 = pnand %p1630_p11, %p1818_p5 }
 0x5a6   : > { %p1632_p13 = pneg %p1631_p12 }
 0x5c6   : > { %v878_v60 = vpop.f32.mrb[16].mxu0 }
 0x5c7   : > { %885 = vrot.lane.b32.xlu1 %v878_v60, %s1707_s16  ;;  %v1486_v61 = vpop.f32.mrb[17].mxu0  ;;  %s1709_s16 = smov [#allocation3]  }
 0x5c8   : > { %v881_v62 = vpop.f32.mrb[18].mxu0 }
 0x5c9   : > { %v1487_v63 = vpop.f32.mrb[19].mxu0 }
 0x5ce   : > { %v994_v1 = vpop.f32.mrb[20].mxu0 }
 0x5cf   : > { %1001 = vrot.lane.b32.xlu0 %v994_v1, %s1708_s20  ;;  %v1498_v2 = vpop.f32.mrb[21].mxu0  ;;  %s1633_s20 = sshll.u32 %s1709_s16, 4  ;;  %s1634_s20 = int_to_ptr.vmem [resolvable:$false] %s1633_s20 }
 0x5d0   : > { %v997_v3 = vpop.f32.mrb[22].mxu0  ;;  %s1635_s2 = scalar_lea.vmem %s1634_s20, 256  ;;  %p1636_p0 = scmp.lt.s32.totalorder %s2005_s23, %s1634_s20 }
 0x5d1   : > { %v1499_v4 = vpop.f32.mrb[23].mxu0  ;;  %p1637_p1 = scmp.lt.s32.totalorder %s1635_s2, %s1629_s15 }
 0x5d3   : > { %p1638_p2 = por %p1637_p1, %p1636_p0 }
 0x5d5   : > { %p1639_p3 = pnand %p1638_p2, %p1632_p13 }
 0x611   : > { %v770_v5 = vpop.permute.xlu0 %769 }
 0x612   : > { %773 = vst.msk [vmem:[#allocation2] sm:$0xff] %vm772_vm5, %v770_v5 }
 0x639   : > { %v886_v6 = vpop.permute.xlu1 %885 }
 0x63a   : > { %889 = vst.msk [vmem:[#allocation2] sm:$0xff] %vm888_vm6, %v886_v6 }
 0x641   : > { %v1002_v7 = vpop.permute.xlu0 %1001 }
 0x642   : > { %1005 = vst.msk [vmem:[#allocation2] sm:$0xff] %vm1004_vm7, %v1002_v7 }
 0x649   : > { %v1006_v9 = vld [vmem:[#allocation2] sm:$0xff] }
 0x64a   : > { %v1007_v10 = vpack.c.bf16 %v1006_v9, %v1006_v9 }
 0x64c   : > { %1505 = vmatmul.mubr.msk.bf16.vlgmr.msra.gmra.mrb[12].mxu1 %vm440_vm0, %v1007_v10 }
 0x64d   : > { %1532 = vmatprep.mubr.msk.bf16.mxu1 %vm1694_vm1, %v1693_v8  ;;  %1517 = vmatpush3.bf16.msra.mxu1 %v1597_v35 }
 0x64e   : > { %1518 = vmatprep.subr.bf16.mxu1 %v1693_v8 }
 0x651   : > { %1519 = vmatpush3.bf16.msra.mxu1 %v1598_v36 }
 0x652   : > { %1520 = vmatprep.subr.bf16.mxu1 %v1693_v8 }
 0x655   : > { %1521 = vmatpush3.bf16.msra.mxu1 %v1599_v37 }
 0x656   : > { %1522 = vmatprep.subr.bf16.mxu1 %v1693_v8 }
 0x659   : > { %1523 = vmatpush3.bf16.msra.mxu1 %v1600_v38 }
 0x65a   : > { %1524 = vmatprep.subr.bf16.mxu1 %v1693_v8 }
 0x65d   : > { %1525 = vmatpush3.bf16.msra.mxu1 %v1601_v39 }
 0x65e   : > { %1526 = vmatprep.subr.bf16.mxu1 %v1693_v8 }
 0x661   : > { %1527 = vmatpush3.bf16.msra.mxu1 %v1602_v40 }
 0x662   : > { %1528 = vmatprep.subr.bf16.mxu1 %v1693_v8 }
 0x665   : > { %1529 = vmatpush3.bf16.msra.mxu1 %v1603_v41 }
 0x666   : > { %1530 = vmatprep.subr.bf16.mxu1 %v1693_v8 }
 0x669   : > { %1531 = vmatpush3.bf16.msra.mxu1 %v1604_v42 }
 0x71f   : > { %v1068_v12 = vpop.f32.mrb[12].mxu1 }
 0x720   : > { %v1069_v13 = vadd.f32 %v1386_v11, %v1068_v12  ;;  %v1506_v14 = vpop.f32.mrb[13].mxu1 }
 0x721   : > { %v1071_v15 = vpop.f32.mrb[14].mxu1 }
 0x722   : > { %v1940_v16 = vadd.f32 %v1069_v13, %v1833_v0  ;;  %v1507_v17 = vpop.f32.mrb[15].mxu1  ;;  %v1596_v0 = vld [vmem:[%s2055_s9 + $0x8] sm:$0xff]  }
 0x723   : > { %1511 = vmatpush3.bf16.msra.mxu0 %v1596_v0 }
 0x724   : > { %v1077_v18 = vsel %vm440_vm0, %v1940_v16, 0.0 }
 0x725   : > { %1078 = vadd.xlane.f32.xlu1 %v1077_v18 }
 0x7b2   : > { %v1079_v19 = vpop.xlane.xlu1 %1078 }
 0x7b3   : > { %v1080_v20 = vmul.f32 0.03125, %v1079_v19 }
 0x7b5   : > { %v1081_v21 = vsub.f32 %v1940_v16, %v1080_v20 }
 0x7b7   : > { %v1082_v22 = vmul.f32 %v1081_v21, %v1081_v21 }
 0x7b9   : > { %v1083_v23 = vsel %vm440_vm0, %v1082_v22, 0.0 }
 0x7ba   : > { %1084 = vadd.xlane.f32.xlu0 %v1083_v23 }
 0x847   : > { %v1085_v25 = vpop.xlane.xlu0 %1084 }
 0x848   : > { %v1086_v27 = vmul.f32 0.03125, %v1085_v25 }
 0x84a   : > { %v1087_v28 = vadd.f32 1e-05, %v1086_v27 }
 0x84c   : > { %1623 = vrsqrt.f32 %v1087_v28 }
 0x856   : > { %v1624_v29 = vpop.eup %1623 }
 0x857   : > { %v1089_v31 = vmul.f32 %v1624_v29, %v1081_v21 }
 0x859   : > { %v1096_v33 = vmul.f32 %v1390_v30, %v1089_v31 }
 0x85b   : > { %v1103_v26 = vadd.f32 %v1391_v32, %v1096_v33 }
 0x85d   : > { %v1104_v34 = vpack.c.bf16 %v1103_v26, %v1103_v26 }
 0x85f   : > { %1513 = vmatmul.mubr.msk.bf16.vlgmr.msra.gmra.mrb[24].mxu0 %vm440_vm0, %v1104_v34 }
 0x932   : > { %v1165_v44 = vpop.f32.mrb[24].mxu0 }
 0x933   : > { %v1166_v45 = vadd.f32 %v1392_v43, %v1165_v44  ;;  %v1514_v46 = vpop.f32.mrb[25].mxu0 }
 0x934   : > { %v1168_v47 = vpop.f32.mrb[26].mxu0 }
 0x935   : > { %v1396_v48 = vmul.f32 -1.702, %v1166_v45  ;;  %v1515_v49 = vpop.f32.mrb[27].mxu0 }
 0x937   : > { %v1173_v50 = vmul.f32 1.442695, %v1396_v48 }
 0x939   : > { %1625 = vpow2.f32 %v1173_v50 }
 0x943   : > { %v1626_v8 = vpop.eup %1625 }
 0x944   : > { %v1175_v51 = vadd.f32 1.0, %v1626_v8 }
 0x946   : > { %1627 = vrcp.f32 %v1175_v51 }
 0x950   : > { %v1628_v52 = vpop.eup %1627 }
 0x951   : > { %v1178_v53 = vmul.f32 %v1628_v52, %v1166_v45 }
 0x953   : > { %v1179_v54 = vpack.c.bf16 %v1178_v53, %v1178_v53 }
 0x955   : > { %1533 = vmatmul.mubr.bf16.vlgmr.msra.gmra.mrb[16].mxu1 %v1179_v54 }
 0xa28   : > { %v1285_v56 = vpop.f32.mrb[16].mxu1 }
 0xa29   : > { %v1286_v57 = vadd.f32 %v1397_v55, %v1285_v56  ;;  %v1534_v58 = vpop.f32.mrb[17].mxu1 }
 0xa2a   : > { %v1288_v59 = vpop.f32.mrb[18].mxu1 }
 0xa2b   : > { %v1291_v60 = vadd.f32 %v1286_v57, %v1940_v16  ;;  %v1535_v61 = vpop.f32.mrb[19].mxu1 }
 0xa2d   : > { %1292 = vst.msk [vmem:[%s431_s22] sm:$0xff] %vm440_vm0, %v1291_v60 }
 0xa2e   : > { %1642 = shalt.err (!%p1639_p3)
}
 0xa2f   : > { %s1643_s0 = scalar_lea.hbm %s2003_s1, 128  ;;  %s1647_s22 = scalar_lea.hbm %s2059_s13, 256 }
 0xa30   : > { %p1644_p4 = scmp.ne.s32.totalorder %s2003_s1, %s1643_s0  ;;  %p1648_p9 = scmp.lt.u32.totalorder %s2003_s1, %s2059_s13 }
 0xa31   : > { %p1649_p10 = scmp.lt.u32.totalorder %s1647_s22, %s1643_s0  ;;  %p1651_p12 = scmp.lt.u32.totalorder %s1643_s0, %s2003_s1 }
 0xa32   : > { %p1645_p7 = pnand %p1644_p4, %p1818_p5 }
 0xa33   : > { %p1650_p11 = por %p1649_p10, %p1648_p9 }
 0xa34   : > { %p1646_p8 = pneg %p1645_p7 }
 0xa35   : > { %p1652_p13 = por %p1651_p12, %p1650_p11 }
 0xa37   : > { %p1653_p0 = pnand %p1652_p13, %p1646_p8 }
 0xa39   : > { %1656 = shalt.err (!%p1653_p0)
}
 0xa3a   : > { %1536 = dma.vmem_to_hbm [thread:$0]  (%p1818_p5), %s2005_s23, 128, %s2003_s1, %s1294_s29  }
 0xa3b PF: > { %p1542_p1 = scmp.ge.s32.totalorder %s1691_s28, 2  ;;  %s1319_s2 = sand.u32 1, %s1679_s25  }
 0xa3c   : > { %s1320_s15 = scalar_lea.sflag [#allocation4], %s1319_s2 }
 0xa3d   : > { %p1539_p2 = pnand %p1542_p1, %p1822_p6 }
 0xa3f   : > { %1674 = dma.done.wait (!%p1539_p2), %s1320_s15, 128  }
 0xa40   : > { %1676 = vsyncadd (!%p1539_p2), %s1320_s15, 4294967168  ;;  %p23_p3 = scmp.ge.s32.totalorder %s1805_s14, 4   ;;  %s2068_s25 = smov %s1683_s26 }
 0xa41   : > { %s2069_s26 = smov %s1687_s27  ;;  %s2070_s27 = smov %s1816_s17 }
 0xa42   : > { %s2071_s28 = smov %s1805_s14  ;;  %25 = sbr.rel (!%p23_p3) target bundleno = 7 (0x7), region = 107 }
 0xa49   :  { %1325 = vsyncpa [#allocation4], 1 }
 0xa4a   :  { %1327 = vsyncpa [#allocation4 + $0x1], 1 }

</bundles_post_ra>
